<compile_context>
chip_gen: v7x
topology: tpu7x:2x2x1
jax: 0.10.0
libtpu: 0.0.40
codegen_flags: <defaults>
</compile_context>

<pallas_src>
import functools

import numpy as np
import jax
import jax.numpy as jnp
from jax import lax
from jax.experimental import pallas as pl
from jax.experimental.pallas import tpu as pltpu


# ----------------------------------------------------------------------------
# Pallas kernels
# ----------------------------------------------------------------------------

def _conv3x3_relu_kernel(x_ref, w_ref, b_ref, o_ref, *, H, W):
    """Fused 3x3 'same' conv + bias + ReLU for one image.

    x_ref: (H*W + 2*(W+1), Cin) f32 -- image rows in (h, w) raster order with a
           zero halo of (W+1) rows on each side (supplies the dy=+-1 taps).
    w_ref: (9, Cin, Cout) bf16      -- tap-major conv weights, t = ky*3 + kx.
    b_ref: (1, Cout) f32
    o_ref: (H*W, Cout)              -- conv + ReLU output, raster order.
    """
    HW = H * W
    halo = W + 1
    Cout = o_ref.shape[-1]

    # Column index of every output row, for masking the horizontal edge taps
    # (vertical out-of-range taps read the zero halo rows and need no mask).
    wcol = lax.broadcasted_iota(jnp.int32, (HW, 1), 0) % W
    left_ok = wcol >= 1            # tap dx = -1 is invalid at w == 0
    right_ok = wcol <= W - 2       # tap dx = +1 is invalid at w == W-1

    acc = jnp.zeros((HW, Cout), jnp.float32)
    for dy in (-1, 0, 1):
        for dx in (-1, 0, 1):
            t = (dy + 1) * 3 + (dx + 1)
            # In-kernel im2col: tap (dy, dx) of output row p is input row
            # p + dy*W + dx of the halo-padded raster layout.
            slab = x_ref[pl.ds(halo + dy * W + dx, HW), :]
            if dx == -1:
                slab = jnp.where(left_ok, slab, 0.0)
            elif dx == 1:
                slab = jnp.where(right_ok, slab, 0.0)
            acc = acc + jnp.dot(slab.astype(jnp.bfloat16), w_ref[t],
                                preferred_element_type=jnp.float32)
    o_ref[...] = jnp.maximum(acc + b_ref[...], 0.0).astype(o_ref.dtype)


def _matmul_bias_kernel(x_ref, w_ref, b_ref, o_ref, *, relu):
    """(tm, K) @ (K, C) + bias (+ ReLU); f32 accumulation, cast on store."""
    y = jnp.dot(x_ref[...], w_ref[...], preferred_element_type=jnp.float32)
    y = y + b_ref[...]
    if relu:
        y = jnp.maximum(y, 0.0)
    o_ref[...] = y.astype(o_ref.dtype)


# ----------------------------------------------------------------------------
# pallas_call wrappers
# ----------------------------------------------------------------------------

def conv3x3_relu(x_flat, wtaps, b, *, H, W, out_dtype):
    """x_flat: (N, H*W, Cin) f32 raster-order pixels -> (N, H*W, Cout)."""
    N, HW, Cin = x_flat.shape
    Cout = wtaps.shape[-1]
    halo = W + 1
    xp = jnp.pad(x_flat, ((0, 0), (halo, halo), (0, 0)))   # zero halo rows
    HWp = HW + 2 * halo

    flops = 2 * N * HW * 9 * Cin * Cout
    bytes_accessed = (N * HWp * Cin * 4 + 9 * Cin * Cout * 2 + Cout * 4
                      + N * HW * Cout * np.dtype(out_dtype).itemsize)

    return pl.pallas_call(
        functools.partial(_conv3x3_relu_kernel, H=H, W=W),
        out_shape=jax.ShapeDtypeStruct((N, HW, Cout), out_dtype),
        grid=(N,),
        in_specs=[pl.BlockSpec((None, HWp, Cin), lambda n: (n, 0, 0)),
                  pl.BlockSpec((9, Cin, Cout), lambda n: (0, 0, 0)),
                  pl.BlockSpec((1, Cout), lambda n: (0, 0))],
        out_specs=pl.BlockSpec((None, HW, Cout), lambda n: (n, 0, 0)),
        compiler_params=pltpu.CompilerParams(
            dimension_semantics=("parallel",)),
        cost_estimate=pl.CostEstimate(flops=flops, transcendentals=0,
                                      bytes_accessed=bytes_accessed),
    )(xp, wtaps, b)


def matmul_bias(x, w, b, *, relu, out_dtype, tm=512):
    """Row-tiled (P, K) @ (K, C) + bias (+ ReLU)."""
    P, K = x.shape
    C = w.shape[-1]
    tm = min(tm, P)
    if P % tm:
        tm = P                       # small shapes: fall back to a single tile
    flops = 2 * P * K * C
    bytes_accessed = (P * K * x.dtype.itemsize + K * C * w.dtype.itemsize
                      + C * 4 + P * C * np.dtype(out_dtype).itemsize)
    return pl.pallas_call(
        functools.partial(_matmul_bias_kernel, relu=relu),
        out_shape=jax.ShapeDtypeStruct((P, C), out_dtype),
        grid=(P // tm,),
        in_specs=[pl.BlockSpec((tm, K), lambda i: (i, 0)),
                  pl.BlockSpec((K, C), lambda i: (0, 0)),
                  pl.BlockSpec((1, C), lambda i: (0, 0))],
        out_specs=pl.BlockSpec((tm, C), lambda i: (i, 0)),
        compiler_params=pltpu.CompilerParams(
            dimension_semantics=("parallel",)),
        cost_estimate=pl.CostEstimate(flops=flops, transcendentals=0,
                                      bytes_accessed=bytes_accessed),
    )(x, w, b)


# ----------------------------------------------------------------------------
# Model wrapper (layout glue only; all matmuls/conv/bias/ReLU run in Pallas)
# ----------------------------------------------------------------------------

def enc_block(x_flat, H, W, wtaps, b):
    """Conv2d(3x3, pad=1) + ReLU + MaxPool2d(2) on raster-order pixels."""
    N = x_flat.shape[0]
    Cout = wtaps.shape[-1]
    y = conv3x3_relu(x_flat, wtaps, b, H=H, W=W, out_dtype=jnp.float32)
    # TODO(synk): the 2x2 max-pool stays a tiny XLA reshape+max between Pallas
    # calls; fusing it in-kernel needs strided sublane extraction of the
    # (h even, w even) rows, not worth the lowering risk at these sizes.
    y = y.reshape(N, H // 2, 2, W // 2, 2, Cout).max(axis=(2, 4))
    return y.reshape(N, (H // 2) * (W // 2), Cout)


def simple_encoder_decoder(packed, x_nchw, *, num_classes):
    N, _, H, W = x_nchw.shape
    H2, W2, H4, W4 = H // 2, W // 2, H // 4, W // 4

    # NCHW -> raster-order (N, H*W, C) pixels.
    x = jnp.transpose(x_nchw, (0, 2, 3, 1)).reshape(N, H * W, -1)

    x = enc_block(x, H, W, packed["enc1_w"], packed["enc1_b"])       # (N, H2*W2, 32)
    x = enc_block(x, H2, W2, packed["enc2_w"], packed["enc2_b"])     # (N, H4*W4, 64)
    x = conv3x3_relu(x, packed["bott_w"], packed["bott_b"],
                     H=H4, W=W4, out_dtype=jnp.bfloat16)             # (N, H4*W4, 128)

    cb = packed["bott_w"].shape[-1]
    x = x.reshape(N * H4 * W4, cb)
    # dec2 / dec1: ConvTranspose2d(k=2, s=2) + ReLU as per-pixel matmuls whose
    # (dy, dx, co) columns are folded into new rows (no interleave transpose).
    x = matmul_bias(x, packed["dec2_w"], packed["dec2_b"], relu=True,
                    out_dtype=jnp.bfloat16)                          # (P, 4*64)
    x = x.reshape(N * H4 * W4 * 4, -1)                               # rows (n,h4,w4,dy,dx)
    x = matmul_bias(x, packed["dec1_w"], packed["dec1_b"], relu=True,
                    out_dtype=jnp.bfloat16)                          # (P*4, 4*32)
    x = x.reshape(N * H4 * W4 * 16, -1)                              # rows (...,dy2,dx2)

    # 1x1 conv head; output is zero-padded to 128 lanes for dense stores.
    y = matmul_bias(x, packed["out_w"], packed["out_b"], relu=False,
                    out_dtype=jnp.float32)                           # (P*16, 128)
    y = y[:, :num_classes]

    # Single final spatial rearrangement: h = 4*h4 + 2*dy + dy2 (w likewise),
    # plus NHWC -> NCHW, in one transpose on the smallest tensor.
    y = y.reshape(N, H4, W4, 2, 2, 2, 2, num_classes)
    y = jnp.transpose(y, (0, 7, 1, 3, 5, 2, 4, 6))
    return y.reshape(N, num_classes, H, W)


# ----------------------------------------------------------------------------
# Parameters (torch layouts) and one-time packing into kernel layouts
# ----------------------------------------------------------------------------

def init_params(key, in_channels, num_classes=4):
    ks = jax.random.split(key, 12)

    def conv_w(k, cout, cin, kh, kw):          # torch Conv2d weight layout
        fan_in = cin * kh * kw
        return jax.random.normal(k, (cout, cin, kh, kw), jnp.float32) / jnp.sqrt(fan_in)

    def convT_w(k, cin, cout, kh, kw):         # torch ConvTranspose2d weight layout
        fan_in = cin * kh * kw
        return jax.random.normal(k, (cin, cout, kh, kw), jnp.float32) / jnp.sqrt(fan_in)

    def bias(k, c):
        return 0.01 * jax.random.normal(k, (c,), jnp.float32)

    return dict(
        enc1_w=conv_w(ks[0], 32, in_channels, 3, 3), enc1_b=bias(ks[1], 32),
        enc2_w=conv_w(ks[2], 64, 32, 3, 3),          enc2_b=bias(ks[3], 64),
        bott_w=conv_w(ks[4], 128, 64, 3, 3),         bott_b=bias(ks[5], 128),
        dec2_w=convT_w(ks[6], 128, 64, 2, 2),        dec2_b=bias(ks[7], 64),
        dec1_w=convT_w(ks[8], 64, 32, 2, 2),         dec1_b=bias(ks[9], 32),
        out_w=conv_w(ks[10], num_classes, 32, 1, 1), out_b=bias(ks[11], num_classes),
    )


HEAD_PAD = 128   # lane-dense output width for the 1x1 head


def pack_params(p):
    """One-time (outside jit) repack of torch-layout weights into kernel layouts."""
    def conv_taps(w):                     # (Cout, Cin, 3, 3) -> (9, Cin, Cout) bf16
        cout, cin = w.shape[0], w.shape[1]
        return jnp.transpose(w, (2, 3, 1, 0)).reshape(9, cin, cout).astype(jnp.bfloat16)

    def convT_mat(w):                     # (Cin, Cout, 2, 2) -> (Cin, 4*Cout) bf16
        cin, cout = w.shape[0], w.shape[1]
        # column order (dy, dx, co)
        return jnp.transpose(w, (0, 2, 3, 1)).reshape(cin, 4 * cout).astype(jnp.bfloat16)

    def row(b):
        return b.reshape(1, -1).astype(jnp.float32)

    ncls, cin_head = p["out_w"].shape[0], p["out_w"].shape[1]
    w_head = jnp.transpose(p["out_w"], (2, 3, 1, 0)).reshape(cin_head, ncls)
    w_head = jnp.zeros((cin_head, HEAD_PAD), jnp.bfloat16).at[:, :ncls].set(
        w_head.astype(jnp.bfloat16))
    b_head = jnp.zeros((1, HEAD_PAD), jnp.float32).at[:, :ncls].set(p["out_b"])

    return dict(
        enc1_w=conv_taps(p["enc1_w"]), enc1_b=row(p["enc1_b"]),
        enc2_w=conv_taps(p["enc2_w"]), enc2_b=row(p["enc2_b"]),
        bott_w=conv_taps(p["bott_w"]), bott_b=row(p["bott_b"]),
        dec2_w=convT_mat(p["dec2_w"]), dec2_b=row(jnp.tile(p["dec2_b"], 4)),
        dec1_w=convT_mat(p["dec1_w"]), dec1_b=row(jnp.tile(p["dec1_b"], 4)),
        out_w=w_head, out_b=b_head,
    )


if __name__ == "__main__":
    key = jax.random.PRNGKey(0)
    kx, kp = jax.random.split(key)
    # batch=2, in_channels=4, spatial=16x16  (NCHW, like the PyTorch module)
    x = jax.random.normal(kx, (2, 4, 16, 16), jnp.float32)
    params = init_params(kp, in_channels=4, num_classes=4)
    packed = pack_params(params)          # weight packing happens once, outside jit

    fwd = jax.jit(functools.partial(simple_encoder_decoder, num_classes=4))
    y = fwd(packed, x)
    jax.block_until_ready(y)
    assert y.shape == (2, 4, 16, 16) and y.dtype == jnp.float32
    print("KERNEL_OK")
</pallas_src>

<mosaic_0001>
module attributes {stable_mosaic.version = 11 : i64} {
  func.func @_conv3x3_relu_kernel(%arg0: i32, %arg1: memref<1x290x4xf32, #tpu.memory_space<vmem>>, %arg2: memref<9x4x32xbf16, #tpu.memory_space<vmem>>, %arg3: memref<1x32xf32, #tpu.memory_space<vmem>>, %arg4: memref<1x256x32xf32, #tpu.memory_space<vmem>>) attributes {dimension_semantics = [#tpu.dimension_semantics<parallel>], iteration_bounds = array<i64: 2>, scalar_prefetch = 0 : i64, scratch_operands = 0 : i64, tpu.core_type = #tpu.core_type<tc>, window_params = [{transform_indices = @transform_0, window_bounds = array<i64: 1, 290, 4>}, {pipeline_mode = #tpu.pipeline_mode<synchronous>, transform_indices = @transform_1, window_bounds = array<i64: 9, 4, 32>}, {pipeline_mode = #tpu.pipeline_mode<synchronous>, transform_indices = @transform_2, window_bounds = array<i64: 1, 32>}, {transform_indices = @transform_3, window_bounds = array<i64: 1, 256, 32>}]} {
    %0 = tpu.iota {dimensions = array<i32: 0>} : vector<256x1xi32>
    %c16_i32 = arith.constant 16 : i32
    %c0_i32 = arith.constant 0 : i32
    %1 = arith.cmpi eq, %c16_i32, %c0_i32 : i32
    %c1_i32 = arith.constant 1 : i32
    %2 = arith.select %1, %c1_i32, %c16_i32 : i32
    %3 = vector.broadcast %2 : i32 to vector<256x1xi32>
    %4 = arith.remsi %0, %3 : vector<256x1xi32>
    %c0_i32_0 = arith.constant 0 : i32
    %5 = vector.broadcast %c0_i32_0 : i32 to vector<256x1xi32>
    %6 = arith.cmpi ne, %4, %5 : vector<256x1xi32>
    %c0_i32_1 = arith.constant 0 : i32
    %7 = vector.broadcast %c0_i32_1 : i32 to vector<256x1xi32>
    %8 = arith.cmpi slt, %4, %7 : vector<256x1xi32>
    %c0_i32_2 = arith.constant 0 : i32
    %9 = arith.cmpi slt, %2, %c0_i32_2 : i32
    %10 = vector.broadcast %9 : i1 to vector<256x1xi1>
    %11 = vector.broadcast %10 : vector<256x1xi1> to vector<256x1xi1>
    %12 = arith.xori %8, %11 : vector<256x1xi1>
    %13 = arith.andi %12, %6 : vector<256x1xi1>
    %14 = vector.broadcast %2 : i32 to vector<256x1xi32>
    %15 = arith.addi %4, %14 : vector<256x1xi32>
    %16 = arith.select %13, %15, %4 : vector<256x1xi1>, vector<256x1xi32>
    %c1_i32_3 = arith.constant 1 : i32
    %17 = vector.broadcast %c1_i32_3 : i32 to vector<256x1xi32>
    %18 = arith.cmpi sge, %16, %17 : vector<256x1xi32>
    %c14_i32 = arith.constant 14 : i32
    %19 = vector.broadcast %c14_i32 : i32 to vector<256x1xi32>
    %20 = arith.cmpi sle, %16, %19 : vector<256x1xi32>
    %cst = arith.constant 0.000000e+00 : f32
    %21 = vector.broadcast %cst : f32 to vector<256x32xf32>
    %c0 = arith.constant 0 : index
    %c0_4 = arith.constant 0 : index
    %c0_5 = arith.constant 0 : index
    %22 = vector.load %arg1[%c0, %c0_4, %c0_5] : memref<1x290x4xf32, #tpu.memory_space<vmem>>, vector<1x256x4xf32>
    %23 = vector.shape_cast %22 : vector<1x256x4xf32> to vector<256x4xf32>
    %cst_6 = arith.constant 0.000000e+00 : f32
    %24 = vector.shape_cast %18 : vector<256x1xi1> to vector<256x1xi1>
    %25 = vector.broadcast %24 : vector<256x1xi1> to vector<256x4xi1>
    %26 = vector.broadcast %cst_6 : f32 to vector<256x4xf32>
    %27 = arith.select %25, %23, %26 : vector<256x4xi1>, vector<256x4xf32>
    %28 = arith.truncf %27 : vector<256x4xf32> to vector<256x4xbf16>
    %c0_7 = arith.constant 0 : index
    %c0_8 = arith.constant 0 : index
    %c0_9 = arith.constant 0 : index
    %29 = vector.load %arg2[%c0_7, %c0_8, %c0_9] : memref<9x4x32xbf16, #tpu.memory_space<vmem>>, vector<1x4x32xbf16>
    %30 = vector.shape_cast %29 : vector<1x4x32xbf16> to vector<4x32xbf16>
    %cst_10 = arith.constant dense<0.000000e+00> : vector<256x32xf32>
    %31 = tpu.matmul %28, %30, %cst_10 {dimension_numbers = #tpu.dot_dimension_numbers<[1], [0], [0], [1], [0, 0, 1, 1], [], []>} : vector<256x4xbf16>, vector<4x32xbf16>, vector<256x32xf32> -> vector<256x32xf32>
    %32 = arith.addf %21, %31 : vector<256x32xf32>
    %c0_11 = arith.constant 0 : index
    %c1 = arith.constant 1 : index
    %c0_12 = arith.constant 0 : index
    %33 = vector.load %arg1[%c0_11, %c1, %c0_12] : memref<1x290x4xf32, #tpu.memory_space<vmem>>, vector<1x256x4xf32>
    %34 = vector.shape_cast %33 : vector<1x256x4xf32> to vector<256x4xf32>
    %35 = arith.truncf %34 : vector<256x4xf32> to vector<256x4xbf16>
    %c1_13 = arith.constant 1 : index
    %c0_14 = arith.constant 0 : index
    %c0_15 = arith.constant 0 : index
    %36 = vector.load %arg2[%c1_13, %c0_14, %c0_15] : memref<9x4x32xbf16, #tpu.memory_space<vmem>>, vector<1x4x32xbf16>
    %37 = vector.shape_cast %36 : vector<1x4x32xbf16> to vector<4x32xbf16>
    %cst_16 = arith.constant dense<0.000000e+00> : vector<256x32xf32>
    %38 = tpu.matmul %35, %37, %cst_16 {dimension_numbers = #tpu.dot_dimension_numbers<[1], [0], [0], [1], [0, 0, 1, 1], [], []>} : vector<256x4xbf16>, vector<4x32xbf16>, vector<256x32xf32> -> vector<256x32xf32>
    %39 = arith.addf %32, %38 : vector<256x32xf32>
    %c0_17 = arith.constant 0 : index
    %c2 = arith.constant 2 : index
    %c0_18 = arith.constant 0 : index
    %40 = vector.load %arg1[%c0_17, %c2, %c0_18] : memref<1x290x4xf32, #tpu.memory_space<vmem>>, vector<1x256x4xf32>
    %41 = vector.shape_cast %40 : vector<1x256x4xf32> to vector<256x4xf32>
    %cst_19 = arith.constant 0.000000e+00 : f32
    %42 = vector.shape_cast %20 : vector<256x1xi1> to vector<256x1xi1>
    %43 = vector.broadcast %42 : vector<256x1xi1> to vector<256x4xi1>
    %44 = vector.broadcast %cst_19 : f32 to vector<256x4xf32>
    %45 = arith.select %43, %41, %44 : vector<256x4xi1>, vector<256x4xf32>
    %46 = arith.truncf %45 : vector<256x4xf32> to vector<256x4xbf16>
    %c2_20 = arith.constant 2 : index
    %c0_21 = arith.constant 0 : index
    %c0_22 = arith.constant 0 : index
    %47 = vector.load %arg2[%c2_20, %c0_21, %c0_22] : memref<9x4x32xbf16, #tpu.memory_space<vmem>>, vector<1x4x32xbf16>
    %48 = vector.shape_cast %47 : vector<1x4x32xbf16> to vector<4x32xbf16>
    %cst_23 = arith.constant dense<0.000000e+00> : vector<256x32xf32>
    %49 = tpu.matmul %46, %48, %cst_23 {dimension_numbers = #tpu.dot_dimension_numbers<[1], [0], [0], [1], [0, 0, 1, 1], [], []>} : vector<256x4xbf16>, vector<4x32xbf16>, vector<256x32xf32> -> vector<256x32xf32>
    %50 = arith.addf %39, %49 : vector<256x32xf32>
    %c0_24 = arith.constant 0 : index
    %c16 = arith.constant 16 : index
    %c0_25 = arith.constant 0 : index
    %51 = vector.load %arg1[%c0_24, %c16, %c0_25] : memref<1x290x4xf32, #tpu.memory_space<vmem>>, vector<1x256x4xf32>
    %52 = vector.shape_cast %51 : vector<1x256x4xf32> to vector<256x4xf32>
    %cst_26 = arith.constant 0.000000e+00 : f32
    %53 = vector.shape_cast %18 : vector<256x1xi1> to vector<256x1xi1>
    %54 = vector.broadcast %53 : vector<256x1xi1> to vector<256x4xi1>
    %55 = vector.broadcast %cst_26 : f32 to vector<256x4xf32>
    %56 = arith.select %54, %52, %55 : vector<256x4xi1>, vector<256x4xf32>
    %57 = arith.truncf %56 : vector<256x4xf32> to vector<256x4xbf16>
    %c3 = arith.constant 3 : index
    %c0_27 = arith.constant 0 : index
    %c0_28 = arith.constant 0 : index
    %58 = vector.load %arg2[%c3, %c0_27, %c0_28] : memref<9x4x32xbf16, #tpu.memory_space<vmem>>, vector<1x4x32xbf16>
    %59 = vector.shape_cast %58 : vector<1x4x32xbf16> to vector<4x32xbf16>
    %cst_29 = arith.constant dense<0.000000e+00> : vector<256x32xf32>
    %60 = tpu.matmul %57, %59, %cst_29 {dimension_numbers = #tpu.dot_dimension_numbers<[1], [0], [0], [1], [0, 0, 1, 1], [], []>} : vector<256x4xbf16>, vector<4x32xbf16>, vector<256x32xf32> -> vector<256x32xf32>
    %61 = arith.addf %50, %60 : vector<256x32xf32>
    %c0_30 = arith.constant 0 : index
    %c17 = arith.constant 17 : index
    %c0_31 = arith.constant 0 : index
    %62 = vector.load %arg1[%c0_30, %c17, %c0_31] : memref<1x290x4xf32, #tpu.memory_space<vmem>>, vector<1x256x4xf32>
    %63 = vector.shape_cast %62 : vector<1x256x4xf32> to vector<256x4xf32>
    %64 = arith.truncf %63 : vector<256x4xf32> to vector<256x4xbf16>
    %c4 = arith.constant 4 : index
    %c0_32 = arith.constant 0 : index
    %c0_33 = arith.constant 0 : index
    %65 = vector.load %arg2[%c4, %c0_32, %c0_33] : memref<9x4x32xbf16, #tpu.memory_space<vmem>>, vector<1x4x32xbf16>
    %66 = vector.shape_cast %65 : vector<1x4x32xbf16> to vector<4x32xbf16>
    %cst_34 = arith.constant dense<0.000000e+00> : vector<256x32xf32>
    %67 = tpu.matmul %64, %66, %cst_34 {dimension_numbers = #tpu.dot_dimension_numbers<[1], [0], [0], [1], [0, 0, 1, 1], [], []>} : vector<256x4xbf16>, vector<4x32xbf16>, vector<256x32xf32> -> vector<256x32xf32>
    %68 = arith.addf %61, %67 : vector<256x32xf32>
    %c0_35 = arith.constant 0 : index
    %c18 = arith.constant 18 : index
    %c0_36 = arith.constant 0 : index
    %69 = vector.load %arg1[%c0_35, %c18, %c0_36] : memref<1x290x4xf32, #tpu.memory_space<vmem>>, vector<1x256x4xf32>
    %70 = vector.shape_cast %69 : vector<1x256x4xf32> to vector<256x4xf32>
    %cst_37 = arith.constant 0.000000e+00 : f32
    %71 = vector.shape_cast %20 : vector<256x1xi1> to vector<256x1xi1>
    %72 = vector.broadcast %71 : vector<256x1xi1> to vector<256x4xi1>
    %73 = vector.broadcast %cst_37 : f32 to vector<256x4xf32>
    %74 = arith.select %72, %70, %73 : vector<256x4xi1>, vector<256x4xf32>
    %75 = arith.truncf %74 : vector<256x4xf32> to vector<256x4xbf16>
    %c5 = arith.constant 5 : index
    %c0_38 = arith.constant 0 : index
    %c0_39 = arith.constant 0 : index
    %76 = vector.load %arg2[%c5, %c0_38, %c0_39] : memref<9x4x32xbf16, #tpu.memory_space<vmem>>, vector<1x4x32xbf16>
    %77 = vector.shape_cast %76 : vector<1x4x32xbf16> to vector<4x32xbf16>
    %cst_40 = arith.constant dense<0.000000e+00> : vector<256x32xf32>
    %78 = tpu.matmul %75, %77, %cst_40 {dimension_numbers = #tpu.dot_dimension_numbers<[1], [0], [0], [1], [0, 0, 1, 1], [], []>} : vector<256x4xbf16>, vector<4x32xbf16>, vector<256x32xf32> -> vector<256x32xf32>
    %79 = arith.addf %68, %78 : vector<256x32xf32>
    %c0_41 = arith.constant 0 : index
    %c32 = arith.constant 32 : index
    %c0_42 = arith.constant 0 : index
    %80 = vector.load %arg1[%c0_41, %c32, %c0_42] : memref<1x290x4xf32, #tpu.memory_space<vmem>>, vector<1x256x4xf32>
    %81 = vector.shape_cast %80 : vector<1x256x4xf32> to vector<256x4xf32>
    %cst_43 = arith.constant 0.000000e+00 : f32
    %82 = vector.shape_cast %18 : vector<256x1xi1> to vector<256x1xi1>
    %83 = vector.broadcast %82 : vector<256x1xi1> to vector<256x4xi1>
    %84 = vector.broadcast %cst_43 : f32 to vector<256x4xf32>
    %85 = arith.select %83, %81, %84 : vector<256x4xi1>, vector<256x4xf32>
    %86 = arith.truncf %85 : vector<256x4xf32> to vector<256x4xbf16>
    %c6 = arith.constant 6 : index
    %c0_44 = arith.constant 0 : index
    %c0_45 = arith.constant 0 : index
    %87 = vector.load %arg2[%c6, %c0_44, %c0_45] : memref<9x4x32xbf16, #tpu.memory_space<vmem>>, vector<1x4x32xbf16>
    %88 = vector.shape_cast %87 : vector<1x4x32xbf16> to vector<4x32xbf16>
    %cst_46 = arith.constant dense<0.000000e+00> : vector<256x32xf32>
    %89 = tpu.matmul %86, %88, %cst_46 {dimension_numbers = #tpu.dot_dimension_numbers<[1], [0], [0], [1], [0, 0, 1, 1], [], []>} : vector<256x4xbf16>, vector<4x32xbf16>, vector<256x32xf32> -> vector<256x32xf32>
    %90 = arith.addf %79, %89 : vector<256x32xf32>
    %c0_47 = arith.constant 0 : index
    %c33 = arith.constant 33 : index
    %c0_48 = arith.constant 0 : index
    %91 = vector.load %arg1[%c0_47, %c33, %c0_48] : memref<1x290x4xf32, #tpu.memory_space<vmem>>, vector<1x256x4xf32>
    %92 = vector.shape_cast %91 : vector<1x256x4xf32> to vector<256x4xf32>
    %93 = arith.truncf %92 : vector<256x4xf32> to vector<256x4xbf16>
    %c7 = arith.constant 7 : index
    %c0_49 = arith.constant 0 : index
    %c0_50 = arith.constant 0 : index
    %94 = vector.load %arg2[%c7, %c0_49, %c0_50] : memref<9x4x32xbf16, #tpu.memory_space<vmem>>, vector<1x4x32xbf16>
    %95 = vector.shape_cast %94 : vector<1x4x32xbf16> to vector<4x32xbf16>
    %cst_51 = arith.constant dense<0.000000e+00> : vector<256x32xf32>
    %96 = tpu.matmul %93, %95, %cst_51 {dimension_numbers = #tpu.dot_dimension_numbers<[1], [0], [0], [1], [0, 0, 1, 1], [], []>} : vector<256x4xbf16>, vector<4x32xbf16>, vector<256x32xf32> -> vector<256x32xf32>
    %97 = arith.addf %90, %96 : vector<256x32xf32>
    %c0_52 = arith.constant 0 : index
    %c34 = arith.constant 34 : index
    %c0_53 = arith.constant 0 : index
    %98 = vector.load %arg1[%c0_52, %c34, %c0_53] : memref<1x290x4xf32, #tpu.memory_space<vmem>>, vector<1x256x4xf32>
    %99 = vector.shape_cast %98 : vector<1x256x4xf32> to vector<256x4xf32>
    %cst_54 = arith.constant 0.000000e+00 : f32
    %100 = vector.shape_cast %20 : vector<256x1xi1> to vector<256x1xi1>
    %101 = vector.broadcast %100 : vector<256x1xi1> to vector<256x4xi1>
    %102 = vector.broadcast %cst_54 : f32 to vector<256x4xf32>
    %103 = arith.select %101, %99, %102 : vector<256x4xi1>, vector<256x4xf32>
    %104 = arith.truncf %103 : vector<256x4xf32> to vector<256x4xbf16>
    %c8 = arith.constant 8 : index
    %c0_55 = arith.constant 0 : index
    %c0_56 = arith.constant 0 : index
    %105 = vector.load %arg2[%c8, %c0_55, %c0_56] : memref<9x4x32xbf16, #tpu.memory_space<vmem>>, vector<1x4x32xbf16>
    %106 = vector.shape_cast %105 : vector<1x4x32xbf16> to vector<4x32xbf16>
    %cst_57 = arith.constant dense<0.000000e+00> : vector<256x32xf32>
    %107 = tpu.matmul %104, %106, %cst_57 {dimension_numbers = #tpu.dot_dimension_numbers<[1], [0], [0], [1], [0, 0, 1, 1], [], []>} : vector<256x4xbf16>, vector<4x32xbf16>, vector<256x32xf32> -> vector<256x32xf32>
    %108 = arith.addf %97, %107 : vector<256x32xf32>
    %c0_58 = arith.constant 0 : index
    %c0_59 = arith.constant 0 : index
    %109 = vector.load %arg3[%c0_58, %c0_59] : memref<1x32xf32, #tpu.memory_space<vmem>>, vector<1x32xf32>
    %110 = vector.broadcast %109 : vector<1x32xf32> to vector<256x32xf32>
    %111 = arith.addf %108, %110 : vector<256x32xf32>
    %cst_60 = arith.constant 0.000000e+00 : f32
    %112 = vector.broadcast %cst_60 : f32 to vector<256x32xf32>
    %113 = arith.maximumf %111, %112 : vector<256x32xf32>
    %c0_61 = arith.constant 0 : index
    %c0_62 = arith.constant 0 : index
    %c0_63 = arith.constant 0 : index
    %114 = vector.load %arg4[%c0_61, %c0_62, %c0_63] : memref<1x256x32xf32, #tpu.memory_space<vmem>>, vector<1x256x32xf32>
    %115 = vector.shape_cast %114 : vector<1x256x32xf32> to vector<256x32xf32>
    %116 = vector.shape_cast %113 : vector<256x32xf32> to vector<1x256x32xf32>
    tpu.vector_store %arg4[%c0_61, %c0_62, %c0_63], %116 {strides = array<i32>} : memref<1x256x32xf32, #tpu.memory_space<vmem>>, vector<1x256x32xf32>,
    return
  }
  func.func @transform_0(%arg0: i32) -> (i32, i32, i32) {
    %c0_i32 = arith.constant 0 : i32
    %c0_i32_0 = arith.constant 0 : i32
    %c0_i32_1 = arith.constant 0 : i32
    return %arg0, %c0_i32, %c0_i32_0 : i32, i32, i32
  }
  func.func @transform_1(%arg0: i32) -> (i32, i32, i32) {
    %c0_i32 = arith.constant 0 : i32
    %c0_i32_0 = arith.constant 0 : i32
    %c0_i32_1 = arith.constant 0 : i32
    %c0_i32_2 = arith.constant 0 : i32
    return %c0_i32, %c0_i32_0, %c0_i32_1 : i32, i32, i32
  }
  func.func @transform_2(%arg0: i32) -> (i32, i32) {
    %c0_i32 = arith.constant 0 : i32
    %c0_i32_0 = arith.constant 0 : i32
    %c0_i32_1 = arith.constant 0 : i32
    return %c0_i32, %c0_i32_0 : i32, i32
  }
  func.func @transform_3(%arg0: i32) -> (i32, i32, i32) {
    %c0_i32 = arith.constant 0 : i32
    %c0_i32_0 = arith.constant 0 : i32
    %c0_i32_1 = arith.constant 0 : i32
    return %arg0, %c0_i32, %c0_i32_0 : i32, i32, i32
  }
}

module attributes {stable_mosaic.version = 11 : i64} {
  func.func @_conv3x3_relu_kernel(%arg0: i32, %arg1: memref<1x82x32xf32, #tpu.memory_space<vmem>>, %arg2: memref<9x32x64xbf16, #tpu.memory_space<vmem>>, %arg3: memref<1x64xf32, #tpu.memory_space<vmem>>, %arg4: memref<1x64x64xf32, #tpu.memory_space<vmem>>) attributes {dimension_semantics = [#tpu.dimension_semantics<parallel>], iteration_bounds = array<i64: 2>, scalar_prefetch = 0 : i64, scratch_operands = 0 : i64, tpu.core_type = #tpu.core_type<tc>, window_params = [{transform_indices = @transform_0, window_bounds = array<i64: 1, 82, 32>}, {pipeline_mode = #tpu.pipeline_mode<synchronous>, transform_indices = @transform_1, window_bounds = array<i64: 9, 32, 64>}, {pipeline_mode = #tpu.pipeline_mode<synchronous>, transform_indices = @transform_2, window_bounds = array<i64: 1, 64>}, {transform_indices = @transform_3, window_bounds = array<i64: 1, 64, 64>}]} {
    %0 = tpu.iota {dimensions = array<i32: 0>} : vector<64x1xi32>
    %c8_i32 = arith.constant 8 : i32
    %c0_i32 = arith.constant 0 : i32
    %1 = arith.cmpi eq, %c8_i32, %c0_i32 : i32
    %c1_i32 = arith.constant 1 : i32
    %2 = arith.select %1, %c1_i32, %c8_i32 : i32
    %3 = vector.broadcast %2 : i32 to vector<64x1xi32>
    %4 = arith.remsi %0, %3 : vector<64x1xi32>
    %c0_i32_0 = arith.constant 0 : i32
    %5 = vector.broadcast %c0_i32_0 : i32 to vector<64x1xi32>
    %6 = arith.cmpi ne, %4, %5 : vector<64x1xi32>
    %c0_i32_1 = arith.constant 0 : i32
    %7 = vector.broadcast %c0_i32_1 : i32 to vector<64x1xi32>
    %8 = arith.cmpi slt, %4, %7 : vector<64x1xi32>
    %c0_i32_2 = arith.constant 0 : i32
    %9 = arith.cmpi slt, %2, %c0_i32_2 : i32
    %10 = vector.broadcast %9 : i1 to vector<64x1xi1>
    %11 = vector.broadcast %10 : vector<64x1xi1> to vector<64x1xi1>
    %12 = arith.xori %8, %11 : vector<64x1xi1>
    %13 = arith.andi %12, %6 : vector<64x1xi1>
    %14 = vector.broadcast %2 : i32 to vector<64x1xi32>
    %15 = arith.addi %4, %14 : vector<64x1xi32>
    %16 = arith.select %13, %15, %4 : vector<64x1xi1>, vector<64x1xi32>
    %c1_i32_3 = arith.constant 1 : i32
    %17 = vector.broadcast %c1_i32_3 : i32 to vector<64x1xi32>
    %18 = arith.cmpi sge, %16, %17 : vector<64x1xi32>
    %c6_i32 = arith.constant 6 : i32
    %19 = vector.broadcast %c6_i32 : i32 to vector<64x1xi32>
    %20 = arith.cmpi sle, %16, %19 : vector<64x1xi32>
    %cst = arith.constant 0.000000e+00 : f32
    %21 = vector.broadcast %cst : f32 to vector<64x64xf32>
    %c0 = arith.constant 0 : index
    %c0_4 = arith.constant 0 : index
    %c0_5 = arith.constant 0 : index
    %22 = vector.load %arg1[%c0, %c0_4, %c0_5] : memref<1x82x32xf32, #tpu.memory_space<vmem>>, vector<1x64x32xf32>
    %23 = vector.shape_cast %22 : vector<1x64x32xf32> to vector<64x32xf32>
    %cst_6 = arith.constant 0.000000e+00 : f32
    %24 = vector.shape_cast %18 : vector<64x1xi1> to vector<64x1xi1>
    %25 = vector.broadcast %24 : vector<64x1xi1> to vector<64x32xi1>
    %26 = vector.broadcast %cst_6 : f32 to vector<64x32xf32>
    %27 = arith.select %25, %23, %26 : vector<64x32xi1>, vector<64x32xf32>
    %28 = arith.truncf %27 : vector<64x32xf32> to vector<64x32xbf16>
    %c0_7 = arith.constant 0 : index
    %c0_8 = arith.constant 0 : index
    %c0_9 = arith.constant 0 : index
    %29 = vector.load %arg2[%c0_7, %c0_8, %c0_9] : memref<9x32x64xbf16, #tpu.memory_space<vmem>>, vector<1x32x64xbf16>
    %30 = vector.shape_cast %29 : vector<1x32x64xbf16> to vector<32x64xbf16>
    %cst_10 = arith.constant dense<0.000000e+00> : vector<64x64xf32>
    %31 = tpu.matmul %28, %30, %cst_10 {dimension_numbers = #tpu.dot_dimension_numbers<[1], [0], [0], [1], [0, 0, 1, 1], [], []>} : vector<64x32xbf16>, vector<32x64xbf16>, vector<64x64xf32> -> vector<64x64xf32>
    %32 = arith.addf %21, %31 : vector<64x64xf32>
    %c0_11 = arith.constant 0 : index
    %c1 = arith.constant 1 : index
    %c0_12 = arith.constant 0 : index
    %33 = vector.load %arg1[%c0_11, %c1, %c0_12] : memref<1x82x32xf32, #tpu.memory_space<vmem>>, vector<1x64x32xf32>
    %34 = vector.shape_cast %33 : vector<1x64x32xf32> to vector<64x32xf32>
    %35 = arith.truncf %34 : vector<64x32xf32> to vector<64x32xbf16>
    %c1_13 = arith.constant 1 : index
    %c0_14 = arith.constant 0 : index
    %c0_15 = arith.constant 0 : index
    %36 = vector.load %arg2[%c1_13, %c0_14, %c0_15] : memref<9x32x64xbf16, #tpu.memory_space<vmem>>, vector<1x32x64xbf16>
    %37 = vector.shape_cast %36 : vector<1x32x64xbf16> to vector<32x64xbf16>
    %cst_16 = arith.constant dense<0.000000e+00> : vector<64x64xf32>
    %38 = tpu.matmul %35, %37, %cst_16 {dimension_numbers = #tpu.dot_dimension_numbers<[1], [0], [0], [1], [0, 0, 1, 1], [], []>} : vector<64x32xbf16>, vector<32x64xbf16>, vector<64x64xf32> -> vector<64x64xf32>
    %39 = arith.addf %32, %38 : vector<64x64xf32>
    %c0_17 = arith.constant 0 : index
    %c2 = arith.constant 2 : index
    %c0_18 = arith.constant 0 : index
    %40 = vector.load %arg1[%c0_17, %c2, %c0_18] : memref<1x82x32xf32, #tpu.memory_space<vmem>>, vector<1x64x32xf32>
    %41 = vector.shape_cast %40 : vector<1x64x32xf32> to vector<64x32xf32>
    %cst_19 = arith.constant 0.000000e+00 : f32
    %42 = vector.shape_cast %20 : vector<64x1xi1> to vector<64x1xi1>
    %43 = vector.broadcast %42 : vector<64x1xi1> to vector<64x32xi1>
    %44 = vector.broadcast %cst_19 : f32 to vector<64x32xf32>
    %45 = arith.select %43, %41, %44 : vector<64x32xi1>, vector<64x32xf32>
    %46 = arith.truncf %45 : vector<64x32xf32> to vector<64x32xbf16>
    %c2_20 = arith.constant 2 : index
    %c0_21 = arith.constant 0 : index
    %c0_22 = arith.constant 0 : index
    %47 = vector.load %arg2[%c2_20, %c0_21, %c0_22] : memref<9x32x64xbf16, #tpu.memory_space<vmem>>, vector<1x32x64xbf16>
    %48 = vector.shape_cast %47 : vector<1x32x64xbf16> to vector<32x64xbf16>
    %cst_23 = arith.constant dense<0.000000e+00> : vector<64x64xf32>
    %49 = tpu.matmul %46, %48, %cst_23 {dimension_numbers = #tpu.dot_dimension_numbers<[1], [0], [0], [1], [0, 0, 1, 1], [], []>} : vector<64x32xbf16>, vector<32x64xbf16>, vector<64x64xf32> -> vector<64x64xf32>
    %50 = arith.addf %39, %49 : vector<64x64xf32>
    %c0_24 = arith.constant 0 : index
    %c8 = arith.constant 8 : index
    %c0_25 = arith.constant 0 : index
    %51 = vector.load %arg1[%c0_24, %c8, %c0_25] : memref<1x82x32xf32, #tpu.memory_space<vmem>>, vector<1x64x32xf32>
    %52 = vector.shape_cast %51 : vector<1x64x32xf32> to vector<64x32xf32>
    %cst_26 = arith.constant 0.000000e+00 : f32
    %53 = vector.shape_cast %18 : vector<64x1xi1> to vector<64x1xi1>
    %54 = vector.broadcast %53 : vector<64x1xi1> to vector<64x32xi1>
    %55 = vector.broadcast %cst_26 : f32 to vector<64x32xf32>
    %56 = arith.select %54, %52, %55 : vector<64x32xi1>, vector<64x32xf32>
    %57 = arith.truncf %56 : vector<64x32xf32> to vector<64x32xbf16>
    %c3 = arith.constant 3 : index
    %c0_27 = arith.constant 0 : index
    %c0_28 = arith.constant 0 : index
    %58 = vector.load %arg2[%c3, %c0_27, %c0_28] : memref<9x32x64xbf16, #tpu.memory_space<vmem>>, vector<1x32x64xbf16>
    %59 = vector.shape_cast %58 : vector<1x32x64xbf16> to vector<32x64xbf16>
    %cst_29 = arith.constant dense<0.000000e+00> : vector<64x64xf32>
    %60 = tpu.matmul %57, %59, %cst_29 {dimension_numbers = #tpu.dot_dimension_numbers<[1], [0], [0], [1], [0, 0, 1, 1], [], []>} : vector<64x32xbf16>, vector<32x64xbf16>, vector<64x64xf32> -> vector<64x64xf32>
    %61 = arith.addf %50, %60 : vector<64x64xf32>
    %c0_30 = arith.constant 0 : index
    %c9 = arith.constant 9 : index
    %c0_31 = arith.constant 0 : index
    %62 = vector.load %arg1[%c0_30, %c9, %c0_31] : memref<1x82x32xf32, #tpu.memory_space<vmem>>, vector<1x64x32xf32>
    %63 = vector.shape_cast %62 : vector<1x64x32xf32> to vector<64x32xf32>
    %64 = arith.truncf %63 : vector<64x32xf32> to vector<64x32xbf16>
    %c4 = arith.constant 4 : index
    %c0_32 = arith.constant 0 : index
    %c0_33 = arith.constant 0 : index
    %65 = vector.load %arg2[%c4, %c0_32, %c0_33] : memref<9x32x64xbf16, #tpu.memory_space<vmem>>, vector<1x32x64xbf16>
    %66 = vector.shape_cast %65 : vector<1x32x64xbf16> to vector<32x64xbf16>
    %cst_34 = arith.constant dense<0.000000e+00> : vector<64x64xf32>
    %67 = tpu.matmul %64, %66, %cst_34 {dimension_numbers = #tpu.dot_dimension_numbers<[1], [0], [0], [1], [0, 0, 1, 1], [], []>} : vector<64x32xbf16>, vector<32x64xbf16>, vector<64x64xf32> -> vector<64x64xf32>
    %68 = arith.addf %61, %67 : vector<64x64xf32>
    %c0_35 = arith.constant 0 : index
    %c10 = arith.constant 10 : index
    %c0_36 = arith.constant 0 : index
    %69 = vector.load %arg1[%c0_35, %c10, %c0_36] : memref<1x82x32xf32, #tpu.memory_space<vmem>>, vector<1x64x32xf32>
    %70 = vector.shape_cast %69 : vector<1x64x32xf32> to vector<64x32xf32>
    %cst_37 = arith.constant 0.000000e+00 : f32
    %71 = vector.shape_cast %20 : vector<64x1xi1> to vector<64x1xi1>
    %72 = vector.broadcast %71 : vector<64x1xi1> to vector<64x32xi1>
    %73 = vector.broadcast %cst_37 : f32 to vector<64x32xf32>
    %74 = arith.select %72, %70, %73 : vector<64x32xi1>, vector<64x32xf32>
    %75 = arith.truncf %74 : vector<64x32xf32> to vector<64x32xbf16>
    %c5 = arith.constant 5 : index
    %c0_38 = arith.constant 0 : index
    %c0_39 = arith.constant 0 : index
    %76 = vector.load %arg2[%c5, %c0_38, %c0_39] : memref<9x32x64xbf16, #tpu.memory_space<vmem>>, vector<1x32x64xbf16>
    %77 = vector.shape_cast %76 : vector<1x32x64xbf16> to vector<32x64xbf16>
    %cst_40 = arith.constant dense<0.000000e+00> : vector<64x64xf32>
    %78 = tpu.matmul %75, %77, %cst_40 {dimension_numbers = #tpu.dot_dimension_numbers<[1], [0], [0], [1], [0, 0, 1, 1], [], []>} : vector<64x32xbf16>, vector<32x64xbf16>, vector<64x64xf32> -> vector<64x64xf32>
    %79 = arith.addf %68, %78 : vector<64x64xf32>
    %c0_41 = arith.constant 0 : index
    %c16 = arith.constant 16 : index
    %c0_42 = arith.constant 0 : index
    %80 = vector.load %arg1[%c0_41, %c16, %c0_42] : memref<1x82x32xf32, #tpu.memory_space<vmem>>, vector<1x64x32xf32>
    %81 = vector.shape_cast %80 : vector<1x64x32xf32> to vector<64x32xf32>
    %cst_43 = arith.constant 0.000000e+00 : f32
    %82 = vector.shape_cast %18 : vector<64x1xi1> to vector<64x1xi1>
    %83 = vector.broadcast %82 : vector<64x1xi1> to vector<64x32xi1>
    %84 = vector.broadcast %cst_43 : f32 to vector<64x32xf32>
    %85 = arith.select %83, %81, %84 : vector<64x32xi1>, vector<64x32xf32>
    %86 = arith.truncf %85 : vector<64x32xf32> to vector<64x32xbf16>
    %c6 = arith.constant 6 : index
    %c0_44 = arith.constant 0 : index
    %c0_45 = arith.constant 0 : index
    %87 = vector.load %arg2[%c6, %c0_44, %c0_45] : memref<9x32x64xbf16, #tpu.memory_space<vmem>>, vector<1x32x64xbf16>
    %88 = vector.shape_cast %87 : vector<1x32x64xbf16> to vector<32x64xbf16>
    %cst_46 = arith.constant dense<0.000000e+00> : vector<64x64xf32>
    %89 = tpu.matmul %86, %88, %cst_46 {dimension_numbers = #tpu.dot_dimension_numbers<[1], [0], [0], [1], [0, 0, 1, 1], [], []>} : vector<64x32xbf16>, vector<32x64xbf16>, vector<64x64xf32> -> vector<64x64xf32>
    %90 = arith.addf %79, %89 : vector<64x64xf32>
    %c0_47 = arith.constant 0 : index
    %c17 = arith.constant 17 : index
    %c0_48 = arith.constant 0 : index
    %91 = vector.load %arg1[%c0_47, %c17, %c0_48] : memref<1x82x32xf32, #tpu.memory_space<vmem>>, vector<1x64x32xf32>
    %92 = vector.shape_cast %91 : vector<1x64x32xf32> to vector<64x32xf32>
    %93 = arith.truncf %92 : vector<64x32xf32> to vector<64x32xbf16>
    %c7 = arith.constant 7 : index
    %c0_49 = arith.constant 0 : index
    %c0_50 = arith.constant 0 : index
    %94 = vector.load %arg2[%c7, %c0_49, %c0_50] : memref<9x32x64xbf16, #tpu.memory_space<vmem>>, vector<1x32x64xbf16>
    %95 = vector.shape_cast %94 : vector<1x32x64xbf16> to vector<32x64xbf16>
    %cst_51 = arith.constant dense<0.000000e+00> : vector<64x64xf32>
    %96 = tpu.matmul %93, %95, %cst_51 {dimension_numbers = #tpu.dot_dimension_numbers<[1], [0], [0], [1], [0, 0, 1, 1], [], []>} : vector<64x32xbf16>, vector<32x64xbf16>, vector<64x64xf32> -> vector<64x64xf32>
    %97 = arith.addf %90, %96 : vector<64x64xf32>
    %c0_52 = arith.constant 0 : index
    %c18 = arith.constant 18 : index
    %c0_53 = arith.constant 0 : index
    %98 = vector.load %arg1[%c0_52, %c18, %c0_53] : memref<1x82x32xf32, #tpu.memory_space<vmem>>, vector<1x64x32xf32>
    %99 = vector.shape_cast %98 : vector<1x64x32xf32> to vector<64x32xf32>
    %cst_54 = arith.constant 0.000000e+00 : f32
    %100 = vector.shape_cast %20 : vector<64x1xi1> to vector<64x1xi1>
    %101 = vector.broadcast %100 : vector<64x1xi1> to vector<64x32xi1>
    %102 = vector.broadcast %cst_54 : f32 to vector<64x32xf32>
    %103 = arith.select %101, %99, %102 : vector<64x32xi1>, vector<64x32xf32>
    %104 = arith.truncf %103 : vector<64x32xf32> to vector<64x32xbf16>
    %c8_55 = arith.constant 8 : index
    %c0_56 = arith.constant 0 : index
    %c0_57 = arith.constant 0 : index
    %105 = vector.load %arg2[%c8_55, %c0_56, %c0_57] : memref<9x32x64xbf16, #tpu.memory_space<vmem>>, vector<1x32x64xbf16>
    %106 = vector.shape_cast %105 : vector<1x32x64xbf16> to vector<32x64xbf16>
    %cst_58 = arith.constant dense<0.000000e+00> : vector<64x64xf32>
    %107 = tpu.matmul %104, %106, %cst_58 {dimension_numbers = #tpu.dot_dimension_numbers<[1], [0], [0], [1], [0, 0, 1, 1], [], []>} : vector<64x32xbf16>, vector<32x64xbf16>, vector<64x64xf32> -> vector<64x64xf32>
    %108 = arith.addf %97, %107 : vector<64x64xf32>
    %c0_59 = arith.constant 0 : index
    %c0_60 = arith.constant 0 : index
    %109 = vector.load %arg3[%c0_59, %c0_60] : memref<1x64xf32, #tpu.memory_space<vmem>>, vector<1x64xf32>
    %110 = vector.broadcast %109 : vector<1x64xf32> to vector<64x64xf32>
    %111 = arith.addf %108, %110 : vector<64x64xf32>
    %cst_61 = arith.constant 0.000000e+00 : f32
    %112 = vector.broadcast %cst_61 : f32 to vector<64x64xf32>
    %113 = arith.maximumf %111, %112 : vector<64x64xf32>
    %c0_62 = arith.constant 0 : index
    %c0_63 = arith.constant 0 : index
    %c0_64 = arith.constant 0 : index
    %114 = vector.load %arg4[%c0_62, %c0_63, %c0_64] : memref<1x64x64xf32, #tpu.memory_space<vmem>>, vector<1x64x64xf32>
    %115 = vector.shape_cast %114 : vector<1x64x64xf32> to vector<64x64xf32>
    %116 = vector.shape_cast %113 : vector<64x64xf32> to vector<1x64x64xf32>
    tpu.vector_store %arg4[%c0_62, %c0_63, %c0_64], %116 {strides = array<i32>} : memref<1x64x64xf32, #tpu.memory_space<vmem>>, vector<1x64x64xf32>,
    return
  }
  func.func @transform_0(%arg0: i32) -> (i32, i32, i32) {
    %c0_i32 = arith.constant 0 : i32
    %c0_i32_0 = arith.constant 0 : i32
    %c0_i32_1 = arith.constant 0 : i32
    return %arg0, %c0_i32, %c0_i32_0 : i32, i32, i32
  }
  func.func @transform_1(%arg0: i32) -> (i32, i32, i32) {
    %c0_i32 = arith.constant 0 : i32
    %c0_i32_0 = arith.constant 0 : i32
    %c0_i32_1 = arith.constant 0 : i32
    %c0_i32_2 = arith.constant 0 : i32
    return %c0_i32, %c0_i32_0, %c0_i32_1 : i32, i32, i32
  }
  func.func @transform_2(%arg0: i32) -> (i32, i32) {
    %c0_i32 = arith.constant 0 : i32
    %c0_i32_0 = arith.constant 0 : i32
    %c0_i32_1 = arith.constant 0 : i32
    return %c0_i32, %c0_i32_0 : i32, i32
  }
  func.func @transform_3(%arg0: i32) -> (i32, i32, i32) {
    %c0_i32 = arith.constant 0 : i32
    %c0_i32_0 = arith.constant 0 : i32
    %c0_i32_1 = arith.constant 0 : i32
    return %arg0, %c0_i32, %c0_i32_0 : i32, i32, i32
  }
}

module attributes {stable_mosaic.version = 11 : i64} {
  func.func @_conv3x3_relu_kernel(%arg0: i32, %arg1: memref<1x26x64xf32, #tpu.memory_space<vmem>>, %arg2: memref<9x64x128xbf16, #tpu.memory_space<vmem>>, %arg3: memref<1x128xf32, #tpu.memory_space<vmem>>, %arg4: memref<1x16x128xbf16, #tpu.memory_space<vmem>>) attributes {dimension_semantics = [#tpu.dimension_semantics<parallel>], iteration_bounds = array<i64: 2>, scalar_prefetch = 0 : i64, scratch_operands = 0 : i64, tpu.core_type = #tpu.core_type<tc>, window_params = [{transform_indices = @transform_0, window_bounds = array<i64: 1, 26, 64>}, {pipeline_mode = #tpu.pipeline_mode<synchronous>, transform_indices = @transform_1, window_bounds = array<i64: 9, 64, 128>}, {pipeline_mode = #tpu.pipeline_mode<synchronous>, transform_indices = @transform_2, window_bounds = array<i64: 1, 128>}, {transform_indices = @transform_3, window_bounds = array<i64: 1, 16, 128>}]} {
    %0 = tpu.iota {dimensions = array<i32: 0>} : vector<16x1xi32>
    %c4_i32 = arith.constant 4 : i32
    %c0_i32 = arith.constant 0 : i32
    %1 = arith.cmpi eq, %c4_i32, %c0_i32 : i32
    %c1_i32 = arith.constant 1 : i32
    %2 = arith.select %1, %c1_i32, %c4_i32 : i32
    %3 = vector.broadcast %2 : i32 to vector<16x1xi32>
    %4 = arith.remsi %0, %3 : vector<16x1xi32>
    %c0_i32_0 = arith.constant 0 : i32
    %5 = vector.broadcast %c0_i32_0 : i32 to vector<16x1xi32>
    %6 = arith.cmpi ne, %4, %5 : vector<16x1xi32>
    %c0_i32_1 = arith.constant 0 : i32
    %7 = vector.broadcast %c0_i32_1 : i32 to vector<16x1xi32>
    %8 = arith.cmpi slt, %4, %7 : vector<16x1xi32>
    %c0_i32_2 = arith.constant 0 : i32
    %9 = arith.cmpi slt, %2, %c0_i32_2 : i32
    %10 = vector.broadcast %9 : i1 to vector<16x1xi1>
    %11 = vector.broadcast %10 : vector<16x1xi1> to vector<16x1xi1>
    %12 = arith.xori %8, %11 : vector<16x1xi1>
    %13 = arith.andi %12, %6 : vector<16x1xi1>
    %14 = vector.broadcast %2 : i32 to vector<16x1xi32>
    %15 = arith.addi %4, %14 : vector<16x1xi32>
    %16 = arith.select %13, %15, %4 : vector<16x1xi1>, vector<16x1xi32>
    %c1_i32_3 = arith.constant 1 : i32
    %17 = vector.broadcast %c1_i32_3 : i32 to vector<16x1xi32>
    %18 = arith.cmpi sge, %16, %17 : vector<16x1xi32>
    %c2_i32 = arith.constant 2 : i32
    %19 = vector.broadcast %c2_i32 : i32 to vector<16x1xi32>
    %20 = arith.cmpi sle, %16, %19 : vector<16x1xi32>
    %cst = arith.constant 0.000000e+00 : f32
    %21 = vector.broadcast %cst : f32 to vector<16x128xf32>
    %c0 = arith.constant 0 : index
    %c0_4 = arith.constant 0 : index
    %c0_5 = arith.constant 0 : index
    %22 = vector.load %arg1[%c0, %c0_4, %c0_5] : memref<1x26x64xf32, #tpu.memory_space<vmem>>, vector<1x16x64xf32>
    %23 = vector.shape_cast %22 : vector<1x16x64xf32> to vector<16x64xf32>
    %cst_6 = arith.constant 0.000000e+00 : f32
    %24 = vector.shape_cast %18 : vector<16x1xi1> to vector<16x1xi1>
    %25 = vector.broadcast %24 : vector<16x1xi1> to vector<16x64xi1>
    %26 = vector.broadcast %cst_6 : f32 to vector<16x64xf32>
    %27 = arith.select %25, %23, %26 : vector<16x64xi1>, vector<16x64xf32>
    %28 = arith.truncf %27 : vector<16x64xf32> to vector<16x64xbf16>
    %c0_7 = arith.constant 0 : index
    %c0_8 = arith.constant 0 : index
    %c0_9 = arith.constant 0 : index
    %29 = vector.load %arg2[%c0_7, %c0_8, %c0_9] : memref<9x64x128xbf16, #tpu.memory_space<vmem>>, vector<1x64x128xbf16>
    %30 = vector.shape_cast %29 : vector<1x64x128xbf16> to vector<64x128xbf16>
    %cst_10 = arith.constant dense<0.000000e+00> : vector<16x128xf32>
    %31 = tpu.matmul %28, %30, %cst_10 {dimension_numbers = #tpu.dot_dimension_numbers<[1], [0], [0], [1], [0, 0, 1, 1], [], []>} : vector<16x64xbf16>, vector<64x128xbf16>, vector<16x128xf32> -> vector<16x128xf32>
    %32 = arith.addf %21, %31 : vector<16x128xf32>
    %c0_11 = arith.constant 0 : index
    %c1 = arith.constant 1 : index
    %c0_12 = arith.constant 0 : index
    %33 = vector.load %arg1[%c0_11, %c1, %c0_12] : memref<1x26x64xf32, #tpu.memory_space<vmem>>, vector<1x16x64xf32>
    %34 = vector.shape_cast %33 : vector<1x16x64xf32> to vector<16x64xf32>
    %35 = arith.truncf %34 : vector<16x64xf32> to vector<16x64xbf16>
    %c1_13 = arith.constant 1 : index
    %c0_14 = arith.constant 0 : index
    %c0_15 = arith.constant 0 : index
    %36 = vector.load %arg2[%c1_13, %c0_14, %c0_15] : memref<9x64x128xbf16, #tpu.memory_space<vmem>>, vector<1x64x128xbf16>
    %37 = vector.shape_cast %36 : vector<1x64x128xbf16> to vector<64x128xbf16>
    %cst_16 = arith.constant dense<0.000000e+00> : vector<16x128xf32>
    %38 = tpu.matmul %35, %37, %cst_16 {dimension_numbers = #tpu.dot_dimension_numbers<[1], [0], [0], [1], [0, 0, 1, 1], [], []>} : vector<16x64xbf16>, vector<64x128xbf16>, vector<16x128xf32> -> vector<16x128xf32>
    %39 = arith.addf %32, %38 : vector<16x128xf32>
    %c0_17 = arith.constant 0 : index
    %c2 = arith.constant 2 : index
    %c0_18 = arith.constant 0 : index
    %40 = vector.load %arg1[%c0_17, %c2, %c0_18] : memref<1x26x64xf32, #tpu.memory_space<vmem>>, vector<1x16x64xf32>
    %41 = vector.shape_cast %40 : vector<1x16x64xf32> to vector<16x64xf32>
    %cst_19 = arith.constant 0.000000e+00 : f32
    %42 = vector.shape_cast %20 : vector<16x1xi1> to vector<16x1xi1>
    %43 = vector.broadcast %42 : vector<16x1xi1> to vector<16x64xi1>
    %44 = vector.broadcast %cst_19 : f32 to vector<16x64xf32>
    %45 = arith.select %43, %41, %44 : vector<16x64xi1>, vector<16x64xf32>
    %46 = arith.truncf %45 : vector<16x64xf32> to vector<16x64xbf16>
    %c2_20 = arith.constant 2 : index
    %c0_21 = arith.constant 0 : index
    %c0_22 = arith.constant 0 : index
    %47 = vector.load %arg2[%c2_20, %c0_21, %c0_22] : memref<9x64x128xbf16, #tpu.memory_space<vmem>>, vector<1x64x128xbf16>
    %48 = vector.shape_cast %47 : vector<1x64x128xbf16> to vector<64x128xbf16>
    %cst_23 = arith.constant dense<0.000000e+00> : vector<16x128xf32>
    %49 = tpu.matmul %46, %48, %cst_23 {dimension_numbers = #tpu.dot_dimension_numbers<[1], [0], [0], [1], [0, 0, 1, 1], [], []>} : vector<16x64xbf16>, vector<64x128xbf16>, vector<16x128xf32> -> vector<16x128xf32>
    %50 = arith.addf %39, %49 : vector<16x128xf32>
    %c0_24 = arith.constant 0 : index
    %c4 = arith.constant 4 : index
    %c0_25 = arith.constant 0 : index
    %51 = vector.load %arg1[%c0_24, %c4, %c0_25] : memref<1x26x64xf32, #tpu.memory_space<vmem>>, vector<1x16x64xf32>
    %52 = vector.shape_cast %51 : vector<1x16x64xf32> to vector<16x64xf32>
    %cst_26 = arith.constant 0.000000e+00 : f32
    %53 = vector.shape_cast %18 : vector<16x1xi1> to vector<16x1xi1>
    %54 = vector.broadcast %53 : vector<16x1xi1> to vector<16x64xi1>
    %55 = vector.broadcast %cst_26 : f32 to vector<16x64xf32>
    %56 = arith.select %54, %52, %55 : vector<16x64xi1>, vector<16x64xf32>
    %57 = arith.truncf %56 : vector<16x64xf32> to vector<16x64xbf16>
    %c3 = arith.constant 3 : index
    %c0_27 = arith.constant 0 : index
    %c0_28 = arith.constant 0 : index
    %58 = vector.load %arg2[%c3, %c0_27, %c0_28] : memref<9x64x128xbf16, #tpu.memory_space<vmem>>, vector<1x64x128xbf16>
    %59 = vector.shape_cast %58 : vector<1x64x128xbf16> to vector<64x128xbf16>
    %cst_29 = arith.constant dense<0.000000e+00> : vector<16x128xf32>
    %60 = tpu.matmul %57, %59, %cst_29 {dimension_numbers = #tpu.dot_dimension_numbers<[1], [0], [0], [1], [0, 0, 1, 1], [], []>} : vector<16x64xbf16>, vector<64x128xbf16>, vector<16x128xf32> -> vector<16x128xf32>
    %61 = arith.addf %50, %60 : vector<16x128xf32>
    %c0_30 = arith.constant 0 : index
    %c5 = arith.constant 5 : index
    %c0_31 = arith.constant 0 : index
    %62 = vector.load %arg1[%c0_30, %c5, %c0_31] : memref<1x26x64xf32, #tpu.memory_space<vmem>>, vector<1x16x64xf32>
    %63 = vector.shape_cast %62 : vector<1x16x64xf32> to vector<16x64xf32>
    %64 = arith.truncf %63 : vector<16x64xf32> to vector<16x64xbf16>
    %c4_32 = arith.constant 4 : index
    %c0_33 = arith.constant 0 : index
    %c0_34 = arith.constant 0 : index
    %65 = vector.load %arg2[%c4_32, %c0_33, %c0_34] : memref<9x64x128xbf16, #tpu.memory_space<vmem>>, vector<1x64x128xbf16>
    %66 = vector.shape_cast %65 : vector<1x64x128xbf16> to vector<64x128xbf16>
    %cst_35 = arith.constant dense<0.000000e+00> : vector<16x128xf32>
    %67 = tpu.matmul %64, %66, %cst_35 {dimension_numbers = #tpu.dot_dimension_numbers<[1], [0], [0], [1], [0, 0, 1, 1], [], []>} : vector<16x64xbf16>, vector<64x128xbf16>, vector<16x128xf32> -> vector<16x128xf32>
    %68 = arith.addf %61, %67 : vector<16x128xf32>
    %c0_36 = arith.constant 0 : index
    %c6 = arith.constant 6 : index
    %c0_37 = arith.constant 0 : index
    %69 = vector.load %arg1[%c0_36, %c6, %c0_37] : memref<1x26x64xf32, #tpu.memory_space<vmem>>, vector<1x16x64xf32>
    %70 = vector.shape_cast %69 : vector<1x16x64xf32> to vector<16x64xf32>
    %cst_38 = arith.constant 0.000000e+00 : f32
    %71 = vector.shape_cast %20 : vector<16x1xi1> to vector<16x1xi1>
    %72 = vector.broadcast %71 : vector<16x1xi1> to vector<16x64xi1>
    %73 = vector.broadcast %cst_38 : f32 to vector<16x64xf32>
    %74 = arith.select %72, %70, %73 : vector<16x64xi1>, vector<16x64xf32>
    %75 = arith.truncf %74 : vector<16x64xf32> to vector<16x64xbf16>
    %c5_39 = arith.constant 5 : index
    %c0_40 = arith.constant 0 : index
    %c0_41 = arith.constant 0 : index
    %76 = vector.load %arg2[%c5_39, %c0_40, %c0_41] : memref<9x64x128xbf16, #tpu.memory_space<vmem>>, vector<1x64x128xbf16>
    %77 = vector.shape_cast %76 : vector<1x64x128xbf16> to vector<64x128xbf16>
    %cst_42 = arith.constant dense<0.000000e+00> : vector<16x128xf32>
    %78 = tpu.matmul %75, %77, %cst_42 {dimension_numbers = #tpu.dot_dimension_numbers<[1], [0], [0], [1], [0, 0, 1, 1], [], []>} : vector<16x64xbf16>, vector<64x128xbf16>, vector<16x128xf32> -> vector<16x128xf32>
    %79 = arith.addf %68, %78 : vector<16x128xf32>
    %c0_43 = arith.constant 0 : index
    %c8 = arith.constant 8 : index
    %c0_44 = arith.constant 0 : index
    %80 = vector.load %arg1[%c0_43, %c8, %c0_44] : memref<1x26x64xf32, #tpu.memory_space<vmem>>, vector<1x16x64xf32>
    %81 = vector.shape_cast %80 : vector<1x16x64xf32> to vector<16x64xf32>
    %cst_45 = arith.constant 0.000000e+00 : f32
    %82 = vector.shape_cast %18 : vector<16x1xi1> to vector<16x1xi1>
    %83 = vector.broadcast %82 : vector<16x1xi1> to vector<16x64xi1>
    %84 = vector.broadcast %cst_45 : f32 to vector<16x64xf32>
    %85 = arith.select %83, %81, %84 : vector<16x64xi1>, vector<16x64xf32>
    %86 = arith.truncf %85 : vector<16x64xf32> to vector<16x64xbf16>
    %c6_46 = arith.constant 6 : index
    %c0_47 = arith.constant 0 : index
    %c0_48 = arith.constant 0 : index
    %87 = vector.load %arg2[%c6_46, %c0_47, %c0_48] : memref<9x64x128xbf16, #tpu.memory_space<vmem>>, vector<1x64x128xbf16>
    %88 = vector.shape_cast %87 : vector<1x64x128xbf16> to vector<64x128xbf16>
    %cst_49 = arith.constant dense<0.000000e+00> : vector<16x128xf32>
    %89 = tpu.matmul %86, %88, %cst_49 {dimension_numbers = #tpu.dot_dimension_numbers<[1], [0], [0], [1], [0, 0, 1, 1], [], []>} : vector<16x64xbf16>, vector<64x128xbf16>, vector<16x128xf32> -> vector<16x128xf32>
    %90 = arith.addf %79, %89 : vector<16x128xf32>
    %c0_50 = arith.constant 0 : index
    %c9 = arith.constant 9 : index
    %c0_51 = arith.constant 0 : index
    %91 = vector.load %arg1[%c0_50, %c9, %c0_51] : memref<1x26x64xf32, #tpu.memory_space<vmem>>, vector<1x16x64xf32>
    %92 = vector.shape_cast %91 : vector<1x16x64xf32> to vector<16x64xf32>
    %93 = arith.truncf %92 : vector<16x64xf32> to vector<16x64xbf16>
    %c7 = arith.constant 7 : index
    %c0_52 = arith.constant 0 : index
    %c0_53 = arith.constant 0 : index
    %94 = vector.load %arg2[%c7, %c0_52, %c0_53] : memref<9x64x128xbf16, #tpu.memory_space<vmem>>, vector<1x64x128xbf16>
    %95 = vector.shape_cast %94 : vector<1x64x128xbf16> to vector<64x128xbf16>
    %cst_54 = arith.constant dense<0.000000e+00> : vector<16x128xf32>
    %96 = tpu.matmul %93, %95, %cst_54 {dimension_numbers = #tpu.dot_dimension_numbers<[1], [0], [0], [1], [0, 0, 1, 1], [], []>} : vector<16x64xbf16>, vector<64x128xbf16>, vector<16x128xf32> -> vector<16x128xf32>
    %97 = arith.addf %90, %96 : vector<16x128xf32>
    %c0_55 = arith.constant 0 : index
    %c10 = arith.constant 10 : index
    %c0_56 = arith.constant 0 : index
    %98 = vector.load %arg1[%c0_55, %c10, %c0_56] : memref<1x26x64xf32, #tpu.memory_space<vmem>>, vector<1x16x64xf32>
    %99 = vector.shape_cast %98 : vector<1x16x64xf32> to vector<16x64xf32>
    %cst_57 = arith.constant 0.000000e+00 : f32
    %100 = vector.shape_cast %20 : vector<16x1xi1> to vector<16x1xi1>
    %101 = vector.broadcast %100 : vector<16x1xi1> to vector<16x64xi1>
    %102 = vector.broadcast %cst_57 : f32 to vector<16x64xf32>
    %103 = arith.select %101, %99, %102 : vector<16x64xi1>, vector<16x64xf32>
    %104 = arith.truncf %103 : vector<16x64xf32> to vector<16x64xbf16>
    %c8_58 = arith.constant 8 : index
    %c0_59 = arith.constant 0 : index
    %c0_60 = arith.constant 0 : index
    %105 = vector.load %arg2[%c8_58, %c0_59, %c0_60] : memref<9x64x128xbf16, #tpu.memory_space<vmem>>, vector<1x64x128xbf16>
    %106 = vector.shape_cast %105 : vector<1x64x128xbf16> to vector<64x128xbf16>
    %cst_61 = arith.constant dense<0.000000e+00> : vector<16x128xf32>
    %107 = tpu.matmul %104, %106, %cst_61 {dimension_numbers = #tpu.dot_dimension_numbers<[1], [0], [0], [1], [0, 0, 1, 1], [], []>} : vector<16x64xbf16>, vector<64x128xbf16>, vector<16x128xf32> -> vector<16x128xf32>
    %108 = arith.addf %97, %107 : vector<16x128xf32>
    %c0_62 = arith.constant 0 : index
    %c0_63 = arith.constant 0 : index
    %109 = vector.load %arg3[%c0_62, %c0_63] : memref<1x128xf32, #tpu.memory_space<vmem>>, vector<1x128xf32>
    %110 = vector.broadcast %109 : vector<1x128xf32> to vector<16x128xf32>
    %111 = arith.addf %108, %110 : vector<16x128xf32>
    %cst_64 = arith.constant 0.000000e+00 : f32
    %112 = vector.broadcast %cst_64 : f32 to vector<16x128xf32>
    %113 = arith.maximumf %111, %112 : vector<16x128xf32>
    %114 = arith.truncf %113 : vector<16x128xf32> to vector<16x128xbf16>
    %c0_65 = arith.constant 0 : index
    %c0_66 = arith.constant 0 : index
    %c0_67 = arith.constant 0 : index
    %115 = vector.load %arg4[%c0_65, %c0_66, %c0_67] : memref<1x16x128xbf16, #tpu.memory_space<vmem>>, vector<1x16x128xbf16>
    %116 = vector.shape_cast %115 : vector<1x16x128xbf16> to vector<16x128xbf16>
    %117 = vector.shape_cast %114 : vector<16x128xbf16> to vector<1x16x128xbf16>
    tpu.vector_store %arg4[%c0_65, %c0_66, %c0_67], %117 {strides = array<i32>} : memref<1x16x128xbf16, #tpu.memory_space<vmem>>, vector<1x16x128xbf16>,
    return
  }
  func.func @transform_0(%arg0: i32) -> (i32, i32, i32) {
    %c0_i32 = arith.constant 0 : i32
    %c0_i32_0 = arith.constant 0 : i32
    %c0_i32_1 = arith.constant 0 : i32
    return %arg0, %c0_i32, %c0_i32_0 : i32, i32, i32
  }
  func.func @transform_1(%arg0: i32) -> (i32, i32, i32) {
    %c0_i32 = arith.constant 0 : i32
    %c0_i32_0 = arith.constant 0 : i32
    %c0_i32_1 = arith.constant 0 : i32
    %c0_i32_2 = arith.constant 0 : i32
    return %c0_i32, %c0_i32_0, %c0_i32_1 : i32, i32, i32
  }
  func.func @transform_2(%arg0: i32) -> (i32, i32) {
    %c0_i32 = arith.constant 0 : i32
    %c0_i32_0 = arith.constant 0 : i32
    %c0_i32_1 = arith.constant 0 : i32
    return %c0_i32, %c0_i32_0 : i32, i32
  }
  func.func @transform_3(%arg0: i32) -> (i32, i32, i32) {
    %c0_i32 = arith.constant 0 : i32
    %c0_i32_0 = arith.constant 0 : i32
    %c0_i32_1 = arith.constant 0 : i32
    return %arg0, %c0_i32, %c0_i32_0 : i32, i32, i32
  }
}

module attributes {stable_mosaic.version = 11 : i64} {
  func.func @_matmul_bias_kernel(%arg0: i32, %arg1: memref<32x128xbf16, #tpu.memory_space<vmem>>, %arg2: memref<128x256xbf16, #tpu.memory_space<vmem>>, %arg3: memref<1x256xf32, #tpu.memory_space<vmem>>, %arg4: memref<32x256xbf16, #tpu.memory_space<vmem>>) attributes {dimension_semantics = [#tpu.dimension_semantics<parallel>], iteration_bounds = array<i64: 1>, scalar_prefetch = 0 : i64, scratch_operands = 0 : i64, tpu.core_type = #tpu.core_type<tc>, window_params = [{transform_indices = @transform_0, window_bounds = array<i64: 32, 128>}, {pipeline_mode = #tpu.pipeline_mode<synchronous>, transform_indices = @transform_1, window_bounds = array<i64: 128, 256>}, {pipeline_mode = #tpu.pipeline_mode<synchronous>, transform_indices = @transform_2, window_bounds = array<i64: 1, 256>}, {transform_indices = @transform_3, window_bounds = array<i64: 32, 256>}]} {
    %c0 = arith.constant 0 : index
    %c0_0 = arith.constant 0 : index
    %0 = vector.load %arg1[%c0, %c0_0] : memref<32x128xbf16, #tpu.memory_space<vmem>>, vector<32x128xbf16>
    %c0_1 = arith.constant 0 : index
    %c0_2 = arith.constant 0 : index
    %1 = vector.load %arg2[%c0_1, %c0_2] : memref<128x256xbf16, #tpu.memory_space<vmem>>, vector<128x256xbf16>
    %cst = arith.constant dense<0.000000e+00> : vector<32x256xf32>
    %2 = tpu.matmul %0, %1, %cst {dimension_numbers = #tpu.dot_dimension_numbers<[1], [0], [0], [1], [0, 0, 1, 1], [], []>} : vector<32x128xbf16>, vector<128x256xbf16>, vector<32x256xf32> -> vector<32x256xf32>
    %c0_3 = arith.constant 0 : index
    %c0_4 = arith.constant 0 : index
    %3 = vector.load %arg3[%c0_3, %c0_4] : memref<1x256xf32, #tpu.memory_space<vmem>>, vector<1x256xf32>
    %4 = vector.broadcast %3 : vector<1x256xf32> to vector<32x256xf32>
    %5 = arith.addf %2, %4 : vector<32x256xf32>
    %cst_5 = arith.constant 0.000000e+00 : f32
    %6 = vector.broadcast %cst_5 : f32 to vector<32x256xf32>
    %7 = arith.maximumf %5, %6 : vector<32x256xf32>
    %8 = arith.truncf %7 : vector<32x256xf32> to vector<32x256xbf16>
    %c0_6 = arith.constant 0 : index
    %c0_7 = arith.constant 0 : index
    %9 = vector.load %arg4[%c0_6, %c0_7] : memref<32x256xbf16, #tpu.memory_space<vmem>>, vector<32x256xbf16>
    tpu.vector_store %arg4[%c0_6, %c0_7], %8 {strides = array<i32>} : memref<32x256xbf16, #tpu.memory_space<vmem>>, vector<32x256xbf16>,
    return
  }
  func.func @transform_0(%arg0: i32) -> (i32, i32) {
    %c0_i32 = arith.constant 0 : i32
    %c0_i32_0 = arith.constant 0 : i32
    return %arg0, %c0_i32 : i32, i32
  }
  func.func @transform_1(%arg0: i32) -> (i32, i32) {
    %c0_i32 = arith.constant 0 : i32
    %c0_i32_0 = arith.constant 0 : i32
    %c0_i32_1 = arith.constant 0 : i32
    return %c0_i32, %c0_i32_0 : i32, i32
  }
  func.func @transform_2(%arg0: i32) -> (i32, i32) {
    %c0_i32 = arith.constant 0 : i32
    %c0_i32_0 = arith.constant 0 : i32
    %c0_i32_1 = arith.constant 0 : i32
    return %c0_i32, %c0_i32_0 : i32, i32
  }
  func.func @transform_3(%arg0: i32) -> (i32, i32) {
    %c0_i32 = arith.constant 0 : i32
    %c0_i32_0 = arith.constant 0 : i32
    return %arg0, %c0_i32 : i32, i32
  }
}

module attributes {stable_mosaic.version = 11 : i64} {
  func.func @_matmul_bias_kernel(%arg0: i32, %arg1: memref<128x64xbf16, #tpu.memory_space<vmem>>, %arg2: memref<64x128xbf16, #tpu.memory_space<vmem>>, %arg3: memref<1x128xf32, #tpu.memory_space<vmem>>, %arg4: memref<128x128xbf16, #tpu.memory_space<vmem>>) attributes {dimension_semantics = [#tpu.dimension_semantics<parallel>], iteration_bounds = array<i64: 1>, scalar_prefetch = 0 : i64, scratch_operands = 0 : i64, tpu.core_type = #tpu.core_type<tc>, window_params = [{transform_indices = @transform_0, window_bounds = array<i64: 128, 64>}, {pipeline_mode = #tpu.pipeline_mode<synchronous>, transform_indices = @transform_1, window_bounds = array<i64: 64, 128>}, {pipeline_mode = #tpu.pipeline_mode<synchronous>, transform_indices = @transform_2, window_bounds = array<i64: 1, 128>}, {transform_indices = @transform_3, window_bounds = array<i64: 128, 128>}]} {
    %c0 = arith.constant 0 : index
    %c0_0 = arith.constant 0 : index
    %0 = vector.load %arg1[%c0, %c0_0] : memref<128x64xbf16, #tpu.memory_space<vmem>>, vector<128x64xbf16>
    %c0_1 = arith.constant 0 : index
    %c0_2 = arith.constant 0 : index
    %1 = vector.load %arg2[%c0_1, %c0_2] : memref<64x128xbf16, #tpu.memory_space<vmem>>, vector<64x128xbf16>
    %cst = arith.constant dense<0.000000e+00> : vector<128x128xf32>
    %2 = tpu.matmul %0, %1, %cst {dimension_numbers = #tpu.dot_dimension_numbers<[1], [0], [0], [1], [0, 0, 1, 1], [], []>} : vector<128x64xbf16>, vector<64x128xbf16>, vector<128x128xf32> -> vector<128x128xf32>
    %c0_3 = arith.constant 0 : index
    %c0_4 = arith.constant 0 : index
    %3 = vector.load %arg3[%c0_3, %c0_4] : memref<1x128xf32, #tpu.memory_space<vmem>>, vector<1x128xf32>
    %4 = vector.broadcast %3 : vector<1x128xf32> to vector<128x128xf32>
    %5 = arith.addf %2, %4 : vector<128x128xf32>
    %cst_5 = arith.constant 0.000000e+00 : f32
    %6 = vector.broadcast %cst_5 : f32 to vector<128x128xf32>
    %7 = arith.maximumf %5, %6 : vector<128x128xf32>
    %8 = arith.truncf %7 : vector<128x128xf32> to vector<128x128xbf16>
    %c0_6 = arith.constant 0 : index
    %c0_7 = arith.constant 0 : index
    %9 = vector.load %arg4[%c0_6, %c0_7] : memref<128x128xbf16, #tpu.memory_space<vmem>>, vector<128x128xbf16>
    tpu.vector_store %arg4[%c0_6, %c0_7], %8 {strides = array<i32>} : memref<128x128xbf16, #tpu.memory_space<vmem>>, vector<128x128xbf16>,
    return
  }
  func.func @transform_0(%arg0: i32) -> (i32, i32) {
    %c0_i32 = arith.constant 0 : i32
    %c0_i32_0 = arith.constant 0 : i32
    return %arg0, %c0_i32 : i32, i32
  }
  func.func @transform_1(%arg0: i32) -> (i32, i32) {
    %c0_i32 = arith.constant 0 : i32
    %c0_i32_0 = arith.constant 0 : i32
    %c0_i32_1 = arith.constant 0 : i32
    return %c0_i32, %c0_i32_0 : i32, i32
  }
  func.func @transform_2(%arg0: i32) -> (i32, i32) {
    %c0_i32 = arith.constant 0 : i32
    %c0_i32_0 = arith.constant 0 : i32
    %c0_i32_1 = arith.constant 0 : i32
    return %c0_i32, %c0_i32_0 : i32, i32
  }
  func.func @transform_3(%arg0: i32) -> (i32, i32) {
    %c0_i32 = arith.constant 0 : i32
    %c0_i32_0 = arith.constant 0 : i32
    return %arg0, %c0_i32 : i32, i32
  }
}

module attributes {stable_mosaic.version = 11 : i64} {
  func.func @_matmul_bias_kernel(%arg0: i32, %arg1: memref<512x32xbf16, #tpu.memory_space<vmem>>, %arg2: memref<32x128xbf16, #tpu.memory_space<vmem>>, %arg3: memref<1x128xf32, #tpu.memory_space<vmem>>, %arg4: memref<512x128xf32, #tpu.memory_space<vmem>>) attributes {dimension_semantics = [#tpu.dimension_semantics<parallel>], iteration_bounds = array<i64: 1>, scalar_prefetch = 0 : i64, scratch_operands = 0 : i64, tpu.core_type = #tpu.core_type<tc>, window_params = [{transform_indices = @transform_0, window_bounds = array<i64: 512, 32>}, {pipeline_mode = #tpu.pipeline_mode<synchronous>, transform_indices = @transform_1, window_bounds = array<i64: 32, 128>}, {pipeline_mode = #tpu.pipeline_mode<synchronous>, transform_indices = @transform_2, window_bounds = array<i64: 1, 128>}, {transform_indices = @transform_3, window_bounds = array<i64: 512, 128>}]} {
    %c0 = arith.constant 0 : index
    %c0_0 = arith.constant 0 : index
    %0 = vector.load %arg1[%c0, %c0_0] : memref<512x32xbf16, #tpu.memory_space<vmem>>, vector<512x32xbf16>
    %c0_1 = arith.constant 0 : index
    %c0_2 = arith.constant 0 : index
    %1 = vector.load %arg2[%c0_1, %c0_2] : memref<32x128xbf16, #tpu.memory_space<vmem>>, vector<32x128xbf16>
    %cst = arith.constant dense<0.000000e+00> : vector<512x128xf32>
    %2 = tpu.matmul %0, %1, %cst {dimension_numbers = #tpu.dot_dimension_numbers<[1], [0], [0], [1], [0, 0, 1, 1], [], []>} : vector<512x32xbf16>, vector<32x128xbf16>, vector<512x128xf32> -> vector<512x128xf32>
    %c0_3 = arith.constant 0 : index
    %c0_4 = arith.constant 0 : index
    %3 = vector.load %arg3[%c0_3, %c0_4] : memref<1x128xf32, #tpu.memory_space<vmem>>, vector<1x128xf32>
    %4 = vector.broadcast %3 : vector<1x128xf32> to vector<512x128xf32>
    %5 = arith.addf %2, %4 : vector<512x128xf32>
    %c0_5 = arith.constant 0 : index
    %c0_6 = arith.constant 0 : index
    %6 = vector.load %arg4[%c0_5, %c0_6] : memref<512x128xf32, #tpu.memory_space<vmem>>, vector<512x128xf32>
    tpu.vector_store %arg4[%c0_5, %c0_6], %5 {strides = array<i32>} : memref<512x128xf32, #tpu.memory_space<vmem>>, vector<512x128xf32>,
    return
  }
  func.func @transform_0(%arg0: i32) -> (i32, i32) {
    %c0_i32 = arith.constant 0 : i32
    %c0_i32_0 = arith.constant 0 : i32
    return %arg0, %c0_i32 : i32, i32
  }
  func.func @transform_1(%arg0: i32) -> (i32, i32) {
    %c0_i32 = arith.constant 0 : i32
    %c0_i32_0 = arith.constant 0 : i32
    %c0_i32_1 = arith.constant 0 : i32
    return %c0_i32, %c0_i32_0 : i32, i32
  }
  func.func @transform_2(%arg0: i32) -> (i32, i32) {
    %c0_i32 = arith.constant 0 : i32
    %c0_i32_0 = arith.constant 0 : i32
    %c0_i32_1 = arith.constant 0 : i32
    return %c0_i32, %c0_i32_0 : i32, i32
  }
  func.func @transform_3(%arg0: i32) -> (i32, i32) {
    %c0_i32 = arith.constant 0 : i32
    %c0_i32_0 = arith.constant 0 : i32
    return %arg0, %c0_i32 : i32, i32
  }
}

</mosaic_0001>

<bundles_post_ra>
// kernel: simple_encoder_decoder.7
= control target key start
LH: loop header
LB: loop body
LE: loop exit
PB: predicated region body
PF: predicated region fallthrough
CT: control target
= control target key end

     0   :  { %s1853_s12 = smov 0   ;;  %s2295_s0 = inlined_call_operand.vmem [shape: f32[2,82,32], index: 0, kind: input, shape index: {}]   ;;  %s2296_s1 = inlined_call_operand.vmem [shape: bf16[9,32,64], index: 1, kind: input, shape index: {}]   ;;  %s2297_s2 = inlined_call_operand.vmem [shape: f32[1,64], index: 2, kind: input, shape index: {}]   ;;  %s2298_s3 = inlined_call_operand.vmem [shape: f32[2,64,64], index: 3, kind: output, shape index: {}]  }
   0x1 LB: > { %s1470_s13 = sadd.s32 4294967295, %s1831_s12   ;;  %p1474_p0 = scmp.ge.s32.totalorder %s1831_s12, 1  ;;  %s1831_s12 = sphi %s1853_s12, %s13_s12  }
   0x2   : > { %p137_p1 = scmp.lt.s32.totalorder %s1831_s12, 3 }
   0x4   : > { %p138_p2 = pnand %p1474_p0, %p137_p1 }
   0x5   : > { %v1807_v0 = vld [vmem:[%s2296_s1 + $0x10] sm:$0xff] (!%p138_p2)   ;;  %p161_p3 = scmp.lt.s32.totalorder (!%p138_p2), %s1470_s13, 1  ;;  %v172_v1 = vlaneseq (!%p138_p2)  ;;  %v1867_v2 = vld [vmem:[%s2296_s1 + $0x40] sm:$0xff] (!%p138_p2)   ;;  %v1809_v3 = vld [vmem:[%s2296_s1 + $0x18] sm:$0xff] (!%p138_p2)   ;;  %vm362_vm0 = vcmask (!%p138_p2), 261120   ;;  %v2306_v39 = vmov (!%p138_p2), 0 }
   0x6   : > { %141 = sbr.rel (%p138_p2) target bundleno = 311 (0x137), region = 32  ;;  %1622 = vmatprep.subr.bf16.mxu1 (!%p138_p2), %v1807_v0  ;;  %1670 = vmatprep.subr.bf16.mxu0 (!%p138_p2), %v1867_v2  ;;  %v1878_v4 = vld [vmem:[%s2296_s1 + $0x48] sm:$0xff] (!%p138_p2)   ;;  %v1811_v6 = vld [vmem:[%s2296_s1] sm:$0xff] (!%p138_p2)   ;;  %v1812_v7 = vld [vmem:[%s2296_s1 + $0x50] sm:$0xff] (!%p138_p2)  }
   0x7   : > { %1623 = vmatpush3.bf16.msra.mxu1 (!%p138_p2), %v1807_v0  ;;  %v1880_v5 = vshrl.u32 (!%p138_p2), %v172_v1, 7  ;;  %1671 = vmatpush3.bf16.msra.mxu0 (!%p138_p2), %v1867_v2  ;;  %v1813_v24 = vld [vmem:[%s2296_s1 + $0x58] sm:$0xff] (!%p138_p2)   ;;  %v1814_v27 = vld [vmem:[%s2296_s1 + $0x8] sm:$0xff] (!%p138_p2)   ;;  %v1815_v43 = vld [vmem:[%s2296_s1 + $0x60] sm:$0xff] (!%p138_p2)  }
   0x8   : > { %1624 = vmatprep.subr.bf16.mxu1 (!%p138_p2), %v1809_v3  ;;  %1672 = vmatprep.subr.bf16.mxu0 (!%p138_p2), %v1878_v4  ;;  %v1816_v59 = vld [vmem:[%s2296_s1 + $0x20] sm:$0xff] (!%p138_p2)  }
   0x9   : > { %v174_v8 = vadd.s32 (!%p138_p2), 8, %v1880_v5  ;;  %v185_v9 = vand.u32 (!%p138_p2), 7, %v1880_v5  ;;  %v175_v14 = vadd.s32 (!%p138_p2), 16, %v1880_v5  ;;  %v176_v15 = vadd.s32 (!%p138_p2), 24, %v1880_v5 }
   0xa   : > { %v177_v35 = vadd.s32 (!%p138_p2), 32, %v1880_v5  ;;  %v178_v54 = vadd.s32 (!%p138_p2), 40, %v1880_v5 }
   0xb   : > { %1625 = vmatpush3.bf16.msra.mxu1 (!%p138_p2), %v1809_v3  ;;  %v192_v13 = vand.u32 (!%p138_p2), 7, %v174_v8  ;;  %1673 = vmatpush3.bf16.msra.mxu0 (!%p138_p2), %v1878_v4  ;;  %vm1909_vm1 = vcmp.le.s32.totalorder (!%p138_p2), %v185_v9, 6  ;;  %v199_v29 = vand.u32 (!%p138_p2), 7, %v175_v14  ;;  %v206_v30 = vand.u32 (!%p138_p2), 7, %v176_v15 }
   0xc   : > { %1634 = vmatprep.subr.bf16.mxu1 (!%p138_p2), %v1811_v6  ;;  %1682 = vmatprep.subr.bf16.mxu0 (!%p138_p2), %v1812_v7  ;;  %vm1962_vm4 = vcmp.ge.s32.totalorder (!%p138_p2), %v185_v9, 1  ;;  %v213_v55 = vand.u32 (!%p138_p2), 7, %v177_v35  ;;  %v220_v62 = vand.u32 (!%p138_p2), 7, %v178_v54  ;;  %v2320_v9 = vmov (!%p138_p2), 0 }
   0xd   : > { %s2337_s13 = smov (!%p161_p3, %s1470_s13), 1  ;;  %vm1921_vm2 = vcmp.le.s32.totalorder %v192_v13, 6  ;;  %vm1958_vm3 = vcmp.le.s32.totalorder %v199_v29, 6  ;;  %vm1968_vm5 = vcmp.le.s32.totalorder %v206_v30, 6  ;;  %vm1975_vm6 = vcmp.ge.s32.totalorder %v192_v13, 1 }
   0xe   : > { %s1798_s22 = smul.u32 88, %s2337_s13  ;;  %v2307_v39 = vsel %vm1958_vm3, 4294967295, %v2306_v39  ;;  %vm1980_vm7 = vcmp.ge.s32.totalorder %v199_v29, 1  ;;  %vm2007_vm8 = vcmp.ge.s32.totalorder %v206_v30, 1  ;;  %vm2020_vm9 = vcmp.le.s32.totalorder %v213_v55, 6  ;;  %s1567_s4 = sshll.u32 %s2337_s13, 6 }
   0xf   : > { %vm2040_vm10 = vcmp.le.s32.totalorder %v220_v62, 6  ;;  %vm2044_vm11 = vcmp.ge.s32.totalorder %v213_v55, 1  ;;  %vm2048_vm12 = vcmp.ge.s32.totalorder %v220_v62, 1  ;;  %v1819_v55 = vld [vmem:[%s2296_s1 + $0x70] sm:$0xff]   ;;  %s2274_s7 = scalar_lea.vmem %s2298_s3, %s1567_s4 }
  0x10   : > { %s1895_s29 = scalar_lea.vmem %s2295_s0, %s1798_s22  ;;  %v2321_v9 = vsel %vm2040_vm10, 4294967295, %v2320_v9 }
  0x11   : > { %v333_v10 = vld [vmem:[%s1895_s29 + $0x1] sm:$0xff]  ;;  %v334_v11 = vld [vmem:[%s1895_s29 + $0x9] sm:$0xff]  ;;  %v790_v12 = vld [vmem:[%s1895_s29 + $0x11] sm:$0xff] }
  0x12   : > { %v341_v16 = vpack.c.bf16 %v334_v11, %v333_v10  ;;  %v797_v17 = vpack.c.bf16 %v790_v12, %v334_v11  ;;  %v336_v18 = vld [vmem:[%s1895_s29 + $0x19] sm:$0xff]  ;;  %v792_v19 = vld [vmem:[%s1895_s29 + $0x21] sm:$0xff]  ;;  %v1907_v20 = vld [vmem:[%s1895_s29 + $0x29] sm:$0xff] }
  0x13   : > { %v1913_v22 = vpack.c.bf16 %v336_v18, %v790_v12  ;;  %v798_v23 = vpack.c.bf16 %v792_v19, %v336_v18  ;;  %v1919_v25 = vpack.c.bf16 %v1907_v20, %v792_v19  ;;  %v1931_v28 = vld [vmem:[%s1895_s29 + $0xa] sm:$0xff]  ;;  %v1937_v31 = vld [vmem:[%s1895_s29 + $0x12] sm:$0xff]  ;;  %v1943_v33 = vld [vmem:[%s1895_s29 + $0x1a] sm:$0xff] }
  0x14   : > { %1626 = vmatprep.mubr.msk.bf16.mxu1 %vm362_vm0, %v341_v16  ;;  %1674 = vmatprep.mubr.msk.bf16.mxu0 %vm362_vm0, %v797_v17  ;;  %v911_v32 = vsel %vm1909_vm1, %v1931_v28, 0.0  ;;  %v1946_v34 = vld [vmem:[%s1895_s29 + $0x22] sm:$0xff]  ;;  %v1950_v36 = vld [vmem:[%s1895_s29 + $0x31] sm:$0xff]  ;;  %v1953_v37 = vld [vmem:[%s1895_s29 + $0x39] sm:$0xff]  ;;  %v912_v38 = vsel %vm1921_vm2, %v1937_v31, 0.0  ;;  %v913_v47 = vsel %vm1958_vm3, %v1943_v33, 0.0 }
  0x15   : > { %1627 = vmatmul.mubr.msk.bf16.vlgmr.msra.gmra.mrb[0].mxu1 %vm362_vm0, %v1913_v22  ;;  %1675 = vmatmul.mubr.msk.bf16.vlgmr.msra.gmra.mrb[0].mxu0 %vm362_vm0, %v798_v23  ;;  %v919_v41 = vpack.c.bf16 %v912_v38, %v911_v32  ;;  %v293_v45 = vld [vmem:[%s1895_s29] sm:$0xff]  ;;  %v914_v48 = vsel %vm1968_vm5, %v1946_v34, 0.0  ;;  %v1992_v49 = vpack.c.bf16 %v1953_v37, %v1950_v36  ;;  %v1996_v50 = vld [vmem:[%s1895_s29 + $0x2a] sm:$0xff]  ;;  %v2015_v58 = vld [vmem:[%s1895_s29 + $0x18] sm:$0xff]  ;;  %v1269_v10 = vsel %vm1909_vm1, %v1937_v31, 0.0 }
  0x16   : > { %1635 = vmatpush3.bf16.msra.mxu1 %v1811_v6  ;;  %1683 = vmatpush3.bf16.msra.mxu0 %v1812_v7  ;;  %v1999_v51 = vld [vmem:[%s1895_s29 + $0x8] sm:$0xff]  ;;  %v317_v52 = vsel %vm1962_vm4, %v293_v45, 0.0  ;;  %v2004_v53 = vld [vmem:[%s1895_s29 + $0x10] sm:$0xff]  ;;  %v920_v60 = vpack.c.bf16 %v914_v48, %v913_v47  ;;  %v915_v3 = vsel %vm2020_vm9, %v1996_v50, 0.0  ;;  %v179_v6 = vadd.s32 48, %v1880_v5  ;;  %v2057_v14 = vld [vmem:[%s1895_s29 + $0x3a] sm:$0xff] }
  0x17   : > { %1684 = vmatprep.subr.bf16.mxu0 %v1813_v24  ;;  %1630 = vmatprep.mubr.msk.bf16.mxu1 %vm362_vm0, %v1919_v25  ;;  %v318_v57 = vsel %vm1975_vm6, %v1999_v51, 0.0  ;;  %v2025_v0 = vld [vmem:[%s1895_s29 + $0x32] sm:$0xff]  ;;  %v319_v1 = vsel %vm1980_vm7, %v2004_v53, 0.0  ;;  %v180_v7 = vadd.s32 56, %v1880_v5  ;;  %v320_v8 = vsel %vm2007_vm8, %v2015_v58, 0.0  ;;  %v2060_v15 = vld [vmem:[%s1895_s29 + $0x20] sm:$0xff] }
  0x18   : > { %1636 = vmatprep.subr.bf16.mxu1 %v1814_v27  ;;  %1686 = vmatprep.mubr.msk.bf16.mxu0 %vm362_vm0, %v919_v41  ;;  %v325_v61 = vpack.c.bf16 %v318_v57, %v317_v52  ;;  %v916_v5 = vsel %vm2040_vm10, %v2025_v0, 0.0  ;;  %v227_v12 = vand.u32 7, %v179_v6  ;;  %v2063_v16 = vld [vmem:[%s1895_s29 + $0x28] sm:$0xff]  ;;  %v326_v30 = vpack.c.bf16 %v320_v8, %v319_v1  ;;  %v2087_v32 = vld [vmem:[%s1895_s29 + $0x30] sm:$0xff]  ;;  %v2090_v35 = vld [vmem:[%s1895_s29 + $0x38] sm:$0xff] }
  0x19   : > { %v234_v13 = vand.u32 7, %v180_v7  ;;  %v921_v17 = vpack.c.bf16 %v916_v5, %v915_v3  ;;  %v2066_v18 = vld [vmem:[%s1895_s29 + $0x42] sm:$0xff]  ;;  %v322_v29 = vsel %vm2048_vm12, %v2063_v16, 0.0  ;;  %v1033_v52 = vsel %vm1962_vm4, %v2004_v53, 0.0  ;;  %v1820_v6 = vld [vmem:[%s2296_s1 + $0x30] sm:$0xff]  }
  0x1a   : > { %1685 = vmatpush3.bf16.msra.mxu0 %v1813_v24  ;;  %1637 = vmatpush3.bf16.msra.mxu1 %v1814_v27  ;;  %v1817_v19 = vld [vmem:[%s2296_s1 + $0x68] sm:$0xff]   ;;  %vm2071_vm13 = vcmp.le.s32.totalorder %v227_v12, 6  ;;  %v321_v27 = vsel %vm2044_vm11, %v2060_v15, 0.0  ;;  %vm2102_vm15 = vcmp.ge.s32.totalorder %v227_v12, 1  ;;  %v1034_v54 = vsel %vm1975_vm6, %v2015_v58, 0.0 }
  0x1b   : > { %1694 = vmatprep.subr.bf16.mxu0 %v1815_v43  ;;  %1646 = vmatprep.subr.bf16.mxu1 %v1816_v59  ;;  %vm2075_vm14 = vcmp.le.s32.totalorder %v234_v13, 6  ;;  %v1818_v38 = vld [vmem:[%s2296_s1 + $0x28] sm:$0xff]   ;;  %v917_v41 = vsel %vm2071_vm13, %v2057_v14, 0.0  ;;  %vm2106_vm10 = vcmp.ge.s32.totalorder %v234_v13, 1  ;;  %v1041_v1 = vpack.c.bf16 %v1034_v54, %v1033_v52  ;;  %v1564_v23 = vld [vmem:[%s2297_s2] ss:$0 sm:$0xff] }
  0x1c   : > { %v918_v45 = vsel %vm2075_vm14, %v2066_v18, 0.0  ;;  %v529_v57 = vld [vmem:[%s1895_s29 + $0x2] sm:$0xff]  ;;  %v324_v62 = vsel %vm2106_vm10, %v2090_v35, 0.0  ;;  %v1035_v8 = vsel %vm1980_vm7, %v2060_v15, 0.0  ;;  %v1037_v12 = vsel %vm2044_vm11, %v2087_v32, 0.0 }
  0x1d   : > { %1631 = vmatmul.mubr.msk.bf16.gmra.mrb[4].mxu1 %vm362_vm0, %v1992_v49  ;;  %v553_v3 = vsel %vm1909_vm1, %v529_v57, 0.0  ;;  %v1038_v13 = vsel %vm2048_vm12, %v2090_v35, 0.0  ;;  %v677_v40 = vsel %vm1980_vm7, %v2015_v58, 0.0  ;;  %v678_v44 = vsel %vm2007_vm8, %v2060_v15, 0.0  ;;  %v1153_v56 = vld [vmem:[%s1895_s29 + $0x41] sm:$0xff]  ;;  %v1154_v58 = vld [vmem:[%s1895_s29 + $0x49] sm:$0xff] }
  0x1e   : > { %1638 = vmatprep.mubr.msk.bf16.mxu1 %vm362_vm0, %v325_v61  ;;  %v323_v61 = vsel %vm2102_vm15, %v2087_v32, 0.0  ;;  %v684_v46 = vpack.c.bf16 %v678_v44, %v677_v40  ;;  %v1270_v11 = vsel %vm1921_vm2, %v1943_v33, 0.0  ;;  %vm2335_vm1 = vnez %v2307_v39 }
  0x1f   : > { %v328_v7 = vpack.c.bf16 %v324_v62, %v323_v61  ;;  %v1822_v61 = vld [vmem:[%s2296_s1 + $0x38] sm:$0xff]   ;;  %v1823_v62 = vld [vmem:[%s2296_s1 + $0x80] sm:$0xff]   ;;  %v1272_v26 = vsel %vm1968_vm5, %v1996_v50, 0.0 }
  0x21   : > { %1687 = vmatmul.mubr.msk.bf16.vlgmr.msra.gmra.mrb[0].mxu0 %vm362_vm0, %v920_v60  ;;  %v922_v60 = vpack.c.bf16 %v918_v45, %v917_v41  ;;  %v1821_v41 = vld [vmem:[%s2296_s1 + $0x78] sm:$0xff]   ;;  %v557_v45 = vsel %vm2020_vm9, %v1946_v34, 0.0 }
  0x22   : > { %1695 = vmatpush3.bf16.msra.mxu0 %v1815_v43  ;;  %1690 = vmatprep.mubr.msk.bf16.mxu0 %vm362_vm0, %v921_v17  ;;  %v327_v43 = vpack.c.bf16 %v322_v29, %v321_v27  ;;  %v556_v27 = vsel %vm1968_vm5, %v1943_v33, 0.0  ;;  %v1043_v29 = vpack.c.bf16 %v1038_v13, %v1037_v12  ;;  %v1273_v33 = vsel %vm2020_vm9, %v2025_v0, 0.0 }
  0x23   : > { %1696 = vmatprep.subr.bf16.mxu0 %v1817_v19 }
  0x25   : > { %1639 = vmatmul.mubr.msk.bf16.vlgmr.msra.gmra.mrb[0].mxu1 %vm362_vm0, %v326_v30  ;;  %v1031_v30 = vld [vmem:[%s1895_s29 + $0x40] sm:$0xff] }
  0x26   : > { %1647 = vmatpush3.bf16.msra.mxu1 %v1816_v59  ;;  %1697 = vmatpush3.bf16.msra.mxu0 %v1817_v19  ;;  %v554_v59 = vsel %vm1921_vm2, %v1931_v28, 0.0  ;;  %v1036_v28 = vsel %vm2007_vm8, %v2063_v16, 0.0  ;;  %v555_v19 = vsel %vm1958_vm3, %v1937_v31, 0.0  ;;  %vm2334_vm3 = vnez %v2321_v9 }
  0x27   : > { %1642 = vmatprep.mubr.msk.bf16.mxu1 %vm362_vm0, %v327_v43  ;;  %1648 = vmatprep.subr.bf16.mxu1 %v1818_v38  ;;  %v561_v5 = vpack.c.bf16 %v554_v59, %v553_v3  ;;  %v1042_v17 = vpack.c.bf16 %v1036_v28, %v1035_v8  ;;  %v558_v43 = vsel %vm2334_vm3, %v1996_v50, 0.0  ;;  %v562_v52 = vpack.c.bf16 %v556_v27, %v555_v19 }
  0x28   : > { %1706 = vmatprep.subr.bf16.mxu0 %v1819_v55  ;;  %v1039_v54 = vsel %vm2102_vm15, %v1031_v30, 0.0  ;;  %v560_v3 = vsel %vm2075_vm14, %v2057_v14, 0.0  ;;  %v675_v59 = vsel %vm1962_vm4, %v1999_v51, 0.0  ;;  %v1824_v51 = vld [vmem:[%s2296_s1 + $0x88] sm:$0xff]   ;;  %v799_v31 = vpack.c.bf16 %v1950_v36, %v1907_v20 }
  0x29   : > { %1691 = vmatmul.mubr.msk.bf16.gmra.mrb[4].mxu0 %vm362_vm0, %v922_v60  ;;  %v563_v60 = vpack.c.bf16 %v558_v43, %v557_v45  ;;  %v1274_v39 = vsel %vm2334_vm3, %v2057_v14, 0.0  ;;  %v1275_v20 = vsel %vm2071_vm13, %v2066_v18, 0.0  ;;  %v800_v50 = vpack.c.bf16 %v1153_v56, %v1953_v37 }
  0x2a   : > { %1649 = vmatpush3.bf16.msra.mxu1 %v1818_v38  ;;  %1698 = vmatprep.mubr.msk.bf16.mxu0 %vm362_vm0, %v1041_v1  ;;  %v1032_v38 = vld [vmem:[%s1895_s29 + $0x48] sm:$0xff]  ;;  %v559_v1 = vsel %vm2071_vm13, %v2025_v0, 0.0  ;;  %v1279_v42 = vpack.c.bf16 %v1274_v39, %v1273_v33 }
  0x2b   : > { %1658 = vmatprep.subr.bf16.mxu1 %v1820_v6  ;;  %v1040_v57 = vsel %vm2106_vm10, %v1032_v38, 0.0 }
  0x2d   : > { %1643 = vmatmul.mubr.msk.bf16.gmra.mrb[4].mxu1 %vm362_vm0, %v328_v7  ;;  %v564_v7 = vpack.c.bf16 %v560_v3, %v559_v1 }
  0x2e   : > { %1650 = vmatprep.mubr.msk.bf16.mxu1 %vm362_vm0, %v561_v5 }
  0x31   : > { %1699 = vmatmul.mubr.msk.bf16.vlgmr.msra.gmra.mrb[0].mxu0 %vm362_vm0, %v1042_v17 }
  0x32   : > { %1707 = vmatpush3.bf16.msra.mxu0 %v1819_v55  ;;  %1702 = vmatprep.mubr.msk.bf16.mxu0 %vm362_vm0, %v1043_v29  ;;  %v1044_v55 = vpack.c.bf16 %v1040_v57, %v1039_v54 }
  0x33   : > { %1708 = vmatprep.subr.bf16.mxu0 %v1821_v41 }
  0x35   : > { %1651 = vmatmul.mubr.msk.bf16.vlgmr.msra.gmra.mrb[0].mxu1 %vm362_vm0, %v562_v52 }
  0x36   : > { %1659 = vmatpush3.bf16.msra.mxu1 %v1820_v6  ;;  %1709 = vmatpush3.bf16.msra.mxu0 %v1821_v41  ;;  %v676_v6 = vsel %vm1975_vm6, %v2004_v53, 0.0  ;;  %v680_v53 = vsel %vm2048_vm12, %v2087_v32, 0.0  ;;  %v1277_v32 = vpack.c.bf16 %v1270_v11, %v1269_v10 }
  0x37   : > { %1654 = vmatprep.mubr.msk.bf16.mxu1 %vm362_vm0, %v563_v60  ;;  %1660 = vmatprep.subr.bf16.mxu1 %v1822_v61  ;;  %v683_v8 = vpack.c.bf16 %v676_v6, %v675_v59 }
  0x38   : > { %1718 = vmatprep.subr.bf16.mxu0 %v1823_v62 }
  0x39   : > { %1703 = vmatmul.mubr.msk.bf16.gmra.mrb[4].mxu0 %vm362_vm0, %v1044_v55 }
  0x3a   : > { %1661 = vmatpush3.bf16.msra.mxu1 %v1822_v61  ;;  %1710 = vmatprep.mubr.msk.bf16.mxu0 %vm362_vm0, %v1913_v22  ;;  %v679_v22 = vsel %vm2044_vm11, %v2063_v16, 0.0  ;;  %v682_v16 = vsel %vm2106_vm10, %v1031_v30, 0.0 }
  0x3b   : > { %1730 = vmatprep.subr.bf16.mxu1 %v1867_v2  ;;  %v685_v15 = vpack.c.bf16 %v680_v53, %v679_v22 }
  0x3d   : > { %1655 = vmatmul.mubr.msk.bf16.gmra.mrb[4].mxu1 %vm362_vm0, %v564_v7 }
  0x3e   : > { %1662 = vmatprep.mubr.msk.bf16.mxu1 %vm362_vm0, %v683_v8 }
  0x41   : > { %1711 = vmatmul.mubr.msk.bf16.vlgmr.msra.gmra.mrb[0].mxu0 %vm362_vm0, %v1919_v25  ;;  %v1158_v25 = vpack.c.bf16 %v1154_v58, %v1153_v56 }
  0x42   : > { %1719 = vmatpush3.bf16.msra.mxu0 %v1823_v62  ;;  %1714 = vmatprep.mubr.msk.bf16.mxu0 %vm362_vm0, %v1992_v49  ;;  %v681_v49 = vsel %vm2102_vm15, %v2090_v35, 0.0 }
  0x43   : > { %1720 = vmatprep.subr.bf16.mxu0 %v1824_v51  ;;  %v686_v21 = vpack.c.bf16 %v682_v16, %v681_v49 }
  0x45   : > { %1663 = vmatmul.mubr.msk.bf16.vlgmr.msra.gmra.mrb[0].mxu1 %vm362_vm0, %v684_v46 }
  0x46   : > { %1732 = vmatpush3.bf16.msra.mxu1 %v1867_v2  ;;  %1721 = vmatpush3.bf16.msra.mxu0 %v1824_v51  ;;  %v1271_v2 = vsel %vm2335_vm1, %v1946_v34, 0.0 }
  0x47   : > { %1666 = vmatprep.mubr.msk.bf16.mxu1 %vm362_vm0, %v685_v15  ;;  %1731 = vmatprep.subr.bf16.mxu1 %v1878_v4  ;;  %v1278_v34 = vpack.c.bf16 %v1272_v26, %v1271_v2 }
  0x49   : > { %1715 = vmatmul.mubr.msk.bf16.gmra.mrb[4].mxu0 %vm362_vm0, %v1158_v25 }
  0x4a   : > { %1733 = vmatpush3.bf16.msra.mxu1 %v1878_v4  ;;  %1722 = vmatprep.mubr.msk.bf16.mxu0 %vm362_vm0, %v1277_v32  ;;  %v1268_v4 = vld [vmem:[%s1895_s29 + $0x4a] sm:$0xff] }
  0x4b   : > { %v1276_v36 = vsel %vm2075_vm14, %v1268_v4, 0.0 }
  0x4c   : > { %v1280_v63 = vpack.c.bf16 %v1276_v36, %v1275_v20 }
  0x4d   : > { %1667 = vmatmul.mubr.msk.bf16.gmra.mrb[4].mxu1 %vm362_vm0, %v686_v21 }
  0x4e   : > { %1678 = vmatprep.mubr.msk.bf16.mxu1 %vm362_vm0, %v799_v31 }
  0x51   : > { %1723 = vmatmul.mubr.msk.bf16.vlgmr.msra.gmra.mrb[0].mxu0 %vm362_vm0, %v1278_v34 }
  0x52   : > { %1726 = vmatprep.mubr.msk.bf16.mxu0 %vm362_vm0, %v1279_v42 }
  0x59   : > { %1679 = vmatmul.mubr.msk.bf16.vlgmr.msra.gmra.mrb[4].mxu1 %vm362_vm0, %v800_v50  ;;  %1727 = vmatmul.mubr.msk.bf16.gmra.mrb[4].mxu0 %vm362_vm0, %v1280_v63  ;;  %vm1406_vm0 = vcmask 523264  }
 0x118   : > { %v1664_v0 = vpop.f32.mrb[0].mxu1 }
 0x119   : > { %v750_v9 = vpop.f32.mrb[1].mxu1 }
 0x11a   : > { %v1665_v14 = vpop.f32.mrb[2].mxu1 }
 0x11b   : > { %v753_v35 = vpop.f32.mrb[3].mxu1 }
 0x124   : > { %v1724_v47 = vpop.f32.mrb[0].mxu0 }
 0x125   : > { %v1734_v18 = vadd.f32 %v1724_v47, %v1664_v0  ;;  %v1344_v24 = vpop.f32.mrb[1].mxu0 }
 0x126   : > { %v1735_v48 = vadd.f32 %v1344_v24, %v750_v9  ;;  %v1725_v28 = vpop.f32.mrb[2].mxu0 }
 0x127   : > { %v1392_v37 = vadd.f32 %v1734_v18, %v1564_v23  ;;  %v1736_v5 = vadd.f32 %v1725_v28, %v1665_v14  ;;  %v1347_v12 = vpop.f32.mrb[3].mxu0 }
 0x128   : > { %v1390_v13 = vadd.f32 %v1735_v48, %v1564_v23  ;;  %v1737_v17 = vadd.f32 %v1347_v12, %v753_v35 }
 0x129   : > { %v1400_v19 = vmax.f32 %v1392_v37, 0.0  ;;  %v1393_v27 = vadd.f32 %v1736_v5, %v1564_v23 }
 0x12a   : > { %v1398_v29 = vmax.f32 %v1390_v13, 0.0  ;;  %v1391_v30 = vadd.f32 %v1737_v17, %v1564_v23 }
 0x12b   : > { %1409 = vst.msk [vmem:[%s2274_s7 + $0x10] sm:$0xff] %vm1406_vm0, %v1400_v19  ;;  %v1401_v38 = vmax.f32 %v1393_v27, 0.0 }
 0x12c   : > { %1407 = vst.msk [vmem:[%s2274_s7] sm:$0xff] %vm1406_vm0, %v1398_v29  ;;  %v1399_v41 = vmax.f32 %v1391_v30, 0.0  ;;  %v1680_v45 = vpop.f32.mrb[4].mxu1  ;;  %v1728_v43 = vpop.f32.mrb[4].mxu0 }
 0x12d   : > { %1410 = vst.msk [vmem:[%s2274_s7 + $0x18] sm:$0xff] %vm1406_vm0, %v1401_v38  ;;  %v1738_v52 = vadd.f32 %v1728_v43, %v1680_v45  ;;  %v880_v54 = vpop.f32.mrb[5].mxu1  ;;  %v1360_v57 = vpop.f32.mrb[5].mxu0 }
 0x12e   : > { %1408 = vst.msk [vmem:[%s2274_s7 + $0x8] sm:$0xff] %vm1406_vm0, %v1399_v41  ;;  %v1739_v60 = vadd.f32 %v1360_v57, %v880_v54  ;;  %v1681_v61 = vpop.f32.mrb[6].mxu1  ;;  %v1729_v62 = vpop.f32.mrb[6].mxu0 }
 0x12f   : > { %v1396_v55 = vadd.f32 %v1738_v52, %v1564_v23  ;;  %v1740_v1 = vadd.f32 %v1729_v62, %v1681_v61  ;;  %v883_v3 = vpop.f32.mrb[7].mxu1  ;;  %v1363_v59 = vpop.f32.mrb[7].mxu0 }
 0x130   : > { %v1394_v6 = vadd.f32 %v1739_v60, %v1564_v23  ;;  %v1741_v7 = vadd.f32 %v1363_v59, %v883_v3 }
 0x131   : > { %v1404_v8 = vmax.f32 %v1396_v55, 0.0  ;;  %v1397_v40 = vadd.f32 %v1740_v1, %v1564_v23 }
 0x132   : > { %v1402_v44 = vmax.f32 %v1394_v6, 0.0  ;;  %v1395_v51 = vadd.f32 %v1741_v7, %v1564_v23 }
 0x133   : > { %1413 = vst.msk [vmem:[%s2274_s7 + $0x30] sm:$0xff] %vm1406_vm0, %v1404_v8  ;;  %v1405_v22 = vmax.f32 %v1397_v40, 0.0 }
 0x134   : > { %1411 = vst.msk [vmem:[%s2274_s7 + $0x20] sm:$0xff] %vm1406_vm0, %v1402_v44  ;;  %v1403_v53 = vmax.f32 %v1395_v51, 0.0 }
 0x135   : > { %1414 = vst.msk [vmem:[%s2274_s7 + $0x38] sm:$0xff] %vm1406_vm0, %v1405_v22 }
 0x136   : > { %1412 = vst.msk [vmem:[%s2274_s7 + $0x28] sm:$0xff] %vm1406_vm0, %v1403_v53 }
 0x137 PF: > { %s13_s12 = sadd.s32 1, %s1831_s12  }
 0x138   : > { %p10_p4 = scmp.ge.s32.totalorder %s13_s12, 4  }
 0x13a   :  { %12 = sbr.rel (!%p10_p4) target bundleno = 1 (0x1), region = 70 }

// kernel: simple_encoder_decoder.6
= control target key start
LH: loop header
LB: loop body
LE: loop exit
PB: predicated region body
PF: predicated region fallthrough
CT: control target
= control target key end

     0   :  { %s4643_s12 = smov 0   ;;  %s5865_s0 = inlined_call_operand.vmem [shape: f32[2,290,4], index: 0, kind: input, shape index: {}]   ;;  %s5866_s1 = inlined_call_operand.vmem [shape: bf16[9,4,32], index: 1, kind: input, shape index: {}]   ;;  %s5867_s2 = inlined_call_operand.vmem [shape: f32[1,32], index: 2, kind: input, shape index: {}]   ;;  %s5868_s3 = inlined_call_operand.vmem [shape: f32[2,256,32], index: 3, kind: output, shape index: {}]  }
   0x1 LB: > { %s3715_s13 = sadd.s32 4294967295, %s4621_s12   ;;  %p3719_p0 = scmp.ge.s32.totalorder %s4621_s12, 1  ;;  %s4621_s12 = sphi %s4643_s12, %s13_s12  }
   0x2   : > { %p137_p1 = scmp.lt.s32.totalorder %s4621_s12, 3 }
   0x4   : > { %p138_p2 = pnand %p3719_p0, %p137_p1 }
   0x6   : > { %141 = sbr.rel (%p138_p2) target bundleno = 526 (0x20e), region = 32 }
   0xd   : > { %v3723_v0 = vld [vmem:[%s5866_s1 + $0x2] sm:$0x3]  ;;  %vm5872_vm0 = vcmask 1041408   ;;  %v4657_v1 = vld [vmem:[%s5866_s1 + $0x8] sm:$0x3]  ;;  %p161_p3 = scmp.lt.s32.totalorder %s3715_s13, 1  ;;  %v172_v20 = vlaneseq }
   0xe   : > { %4596 = vmatprep.subr.msk.bf16.mxu1 %vm5872_vm0, %v3723_v0  ;;  %4600 = vmatprep.subr.msk.bf16.mxu0 %vm5872_vm0, %v4657_v1  ;;  %v899_v2 = vsel %vm5872_vm0, %v3723_v0, 0  ;;  %v4665_v3 = vsel %vm5872_vm0, %v4657_v1, 0  ;;  %v797_v4 = vld [vmem:[%s5866_s1] sm:$0x3]  ;;  %v3807_v5 = vld [vmem:[%s5866_s1 + $0xa] sm:$0x3] }
   0xf   : > { %5923 = vst [vmem:[#allocation2_spill] sm:$0xff] %v4665_v3  ;;  %4033 = vmatpush3.bf16.msra.mxu1 %v899_v2  ;;  %4169 = vmatpush3.bf16.msra.mxu0 %v4665_v3  ;;  %s6191_s13 = smov (!%p161_p3, %s3715_s13), 1  ;;  %vm5874_vm1 = vcmask 31744   ;;  %v1111_v14 = vsel %vm5872_vm0, %v797_v4, 0  ;;  %v2415_v18 = vsel %vm5872_vm0, %v3807_v5, 0  ;;  %v4723_v27 = vshrl.u32 %v172_v20, 7 }
  0x10   : > { %4597 = vmatprep.subr.msk.bf16.mxu1 %vm5872_vm0, %v797_v4  ;;  %4602 = vmatprep.subr.msk.bf16.mxu0 %vm5872_vm0, %v3807_v5  ;;  %s4606_s22 = smul.u32 296, %s6191_s13  ;;  %v4704_v21 = vld [vmem:[%s5866_s1 + $0xc] sm:$0x3]  ;;  %v4711_v22 = vld [vmem:[%s5866_s1 + $0x4] sm:$0x3]  ;;  %v5928_v50 = vmov 0 }
  0x11   : > { %v174_v30 = vadd.s32 8, %v4723_v27  ;;  %v176_v38 = vadd.s32 24, %v4723_v27  ;;  %v178_v41 = vadd.s32 40, %v4723_v27  ;;  %v180_v52 = vadd.s32 56, %v4723_v27  ;;  %s3878_s11 = sshll.u32 %s6191_s13, 8 }
  0x12   : > { %s4682_s25 = scalar_lea.vmem %s5865_s0, %s4606_s22  ;;  %v5931_v53 = vmov 0  ;;  %v182_v55 = vadd.s32 72, %v4723_v27  ;;  %s5761_s16 = scalar_lea.vmem %s5868_s3, %s3878_s11 }
  0x13   : > { %v798_v6 = vld [vmem:[%s4682_s25 + $0x1] sm:$0xff]  ;;  %v799_v7 = vld [vmem:[%s4682_s25 + $0x9] sm:$0xff]  ;;  %v1990_v8 = vld [vmem:[%s4682_s25 + $0x11] sm:$0xff]  ;;  %v216_v35 = vand.u32 15, %v174_v30  ;;  %v230_v46 = vand.u32 15, %v176_v38  ;;  %v244_v47 = vand.u32 15, %v178_v41 }
  0x14   : > { %v830_v9 = vpack.c.bf16 %v799_v7, %v798_v6  ;;  %v1991_v10 = vld [vmem:[%s4682_s25 + $0x19] sm:$0xff]  ;;  %v1992_v11 = vld [vmem:[%s4682_s25 + $0x21] sm:$0xff]  ;;  %v1993_v12 = vld [vmem:[%s4682_s25 + $0x29] sm:$0xff]  ;;  %v258_v0 = vand.u32 15, %v180_v52  ;;  %v272_v4 = vand.u32 15, %v182_v55  ;;  %v209_v38 = vand.u32 15, %v4723_v27 }
  0x15   : > { %v2022_v13 = vpack.c.bf16 %v1991_v10, %v1990_v8  ;;  %v4691_v15 = vpack.c.bf16 %v1993_v12, %v1992_v11  ;;  %v1994_v16 = vld [vmem:[%s4682_s25 + $0x31] sm:$0xff]  ;;  %v1995_v17 = vld [vmem:[%s4682_s25 + $0x39] sm:$0xff]  ;;  %v1996_v23 = vld [vmem:[%s4682_s25 + $0x41] sm:$0xff]  ;;  %vm4751_vm2 = vcmp.le.s32.totalorder %v216_v35, 14  ;;  %vm4776_vm3 = vcmp.le.s32.totalorder %v230_v46, 14 }
  0x16   : > { %4034 = vmatprep.mubr.msk.bf16.mxu1 %vm5874_vm1, %v830_v9  ;;  %v4697_v19 = vpack.c.bf16 %v1995_v17, %v1994_v16  ;;  %v1997_v24 = vld [vmem:[%s4682_s25 + $0x49] sm:$0xff]  ;;  %v1998_v25 = vld [vmem:[%s4682_s25 + $0x51] sm:$0xff]  ;;  %v1999_v26 = vld [vmem:[%s4682_s25 + $0x59] sm:$0xff]  ;;  %v5929_v50 = vsel %vm4776_vm3, 4294967295, %v5928_v50  ;;  %vm4786_vm4 = vcmp.le.s32.totalorder %v244_v47, 14  ;;  %v184_v8 = vadd.s32 88, %v4723_v27 }
  0x17   : > { %4170 = vmatprep.mubr.msk.bf16.mxu0 %vm5874_vm1, %v2022_v13  ;;  %4035 = vmatmul.mubr.msk.bf16.vlgmr.msra.gmra.mrb[0].mxu1 %vm5874_vm1, %v2022_v13  ;;  %v4727_v28 = vpack.c.bf16 %v1997_v24, %v1996_v23  ;;  %v4729_v29 = vpack.c.bf16 %v1999_v26, %v1998_v25  ;;  %v2000_v31 = vld [vmem:[%s4682_s25 + $0x61] sm:$0xff]  ;;  %v2001_v32 = vld [vmem:[%s4682_s25 + $0x69] sm:$0xff]  ;;  %v2002_v33 = vld [vmem:[%s4682_s25 + $0x71] sm:$0xff]  ;;  %5930 = vst [vmem:[#allocation5_spill] sm:$0xff] %v5929_v50  ;;  %v5932_v53 = vsel %vm4786_vm4, 4294967295, %v5931_v53  ;;  %v2741_v9 = vsel %vm5872_vm0, %v4704_v21, 0 }
  0x18   : > { %4067 = vmatpush3.bf16.msra.mxu1 %v1111_v14  ;;  %4171 = vmatmul.mubr.msk.bf16.vlgmr.msra.gmra.mrb[0].mxu0 %vm5874_vm1, %v4691_v15  ;;  %v2003_v34 = vld [vmem:[%s4682_s25 + $0x79] sm:$0xff]  ;;  %v4744_v36 = vpack.c.bf16 %v2001_v32, %v2000_v31  ;;  %v2004_v42 = vld [vmem:[%s4682_s25 + $0x81] sm:$0xff]  ;;  %v2005_v43 = vld [vmem:[%s4682_s25 + $0x89] sm:$0xff]  ;;  %5933 = vst [vmem:[#allocation6_spill] sm:$0xff] %v5932_v53  ;;  %vm4824_vm5 = vcmp.le.s32.totalorder %v258_v0, 14  ;;  %v5936_v10 = vmov 0 }
  0x19   : > { %4203 = vmatpush3.bf16.msra.mxu0 %v2415_v18  ;;  %4038 = vmatprep.mubr.msk.bf16.mxu1 %vm5874_vm1, %v4691_v15  ;;  %v4746_v37 = vpack.c.bf16 %v2003_v34, %v2002_v33  ;;  %v4756_v40 = vld [vmem:[%s4682_s25 + $0x1a] sm:$0xff]  ;;  %v4768_v44 = vld [vmem:[%s4682_s25 + $0x12] sm:$0xff]  ;;  %v4773_v48 = vpack.c.bf16 %v2005_v43, %v2004_v42  ;;  %v4781_v51 = vld [vmem:[%s4682_s25 + $0x2a] sm:$0xff]  ;;  %v5937_v10 = vsel %vm4824_vm5, 4294967295, %v5936_v10  ;;  %v186_v12 = vadd.s32 104, %v4723_v27 }
  0x1a   : > { %4174 = vmatprep.mubr.msk.bf16.mxu0 %vm5874_vm1, %v4697_v19  ;;  %4603 = vmatprep.subr.msk.bf16.mxu0 %vm5872_vm0, %v4704_v21  ;;  %v2317_v45 = vsel %vm4751_vm2, %v4756_v40, 0.0  ;;  %v4791_v54 = vld [vmem:[%s4682_s25 + $0x3a] sm:$0xff]  ;;  %v816_v56 = vld [vmem:[%s4682_s25 + $0x91] sm:$0xff]  ;;  %v4802_v58 = vld [vmem:[%s4682_s25 + $0x22] sm:$0xff]  ;;  %v2319_v59 = vsel %vm4776_vm3, %v4781_v51, 0.0  ;;  %5938 = vst [vmem:[#allocation9_spill] sm:$0xff] %v5937_v10 }
  0x1b   : > { %4598 = vmatprep.subr.msk.bf16.mxu1 %vm5872_vm0, %v4711_v22  ;;  %5924 = vst [vmem:[#allocation3_spill] sm:$0xff] %v4746_v37  ;;  %5927 = vst [vmem:[#allocation4_spill] sm:$0xff] %v4773_v48  ;;  %v2348_v49 = vpack.c.bf16 %v2317_v45, %v4768_v44  ;;  %v817_v57 = vld [vmem:[%s4682_s25 + $0x99] sm:$0xff]  ;;  %v818_v60 = vld [vmem:[%s4682_s25 + $0xa1] sm:$0xff]  ;;  %v2321_v63 = vsel %vm4786_vm4, %v4791_v54, 0.0  ;;  %v2349_v5 = vpack.c.bf16 %v2319_v59, %v4802_v58  ;;  %vm4834_vm6 = vcmp.le.s32.totalorder %v272_v4, 14 }
  0x1c   : > { %v819_v61 = vld [vmem:[%s4682_s25 + $0xa9] sm:$0xff]  ;;  %v4810_v62 = vld [vmem:[%s4682_s25 + $0x32] sm:$0xff]  ;;  %v4815_v2 = vpack.c.bf16 %v817_v57, %v816_v56  ;;  %v5939_v13 = vmov 0  ;;  %v4839_v14 = vld [vmem:[%s4682_s25 + $0x5a] sm:$0xff]  ;;  %v188_v16 = vadd.s32 120, %v4723_v27  ;;  %v190_v21 = vadd.s32 136, %v4723_v27 }
  0x1d   : > { %v4818_v6 = vpack.c.bf16 %v819_v61, %v818_v60  ;;  %v2350_v7 = vpack.c.bf16 %v2321_v63, %v4810_v62  ;;  %v4829_v11 = vld [vmem:[%s4682_s25 + $0x4a] sm:$0xff]  ;;  %v5940_v13 = vsel %vm4834_vm6, 4294967295, %v5939_v13  ;;  %v821_v20 = vld [vmem:[%s4682_s25 + $0xb9] sm:$0xff]  ;;  %v4855_v23 = vld [vmem:[%s4682_s25 + $0x42] sm:$0xff]  ;;  %v286_v30 = vand.u32 15, %v184_v8 }
  0x1e   : > { %5934 = vst [vmem:[#allocation7_spill] sm:$0xff] %v4815_v2  ;;  %5941 = vst [vmem:[#allocation10_spill] sm:$0xff] %v5940_v13  ;;  %v4845_v17 = vld [vmem:[%s5866_s1 + $0xe] sm:$0x3]  ;;  %v820_v18 = vld [vmem:[%s4682_s25 + $0xb1] sm:$0xff]  ;;  %v2323_v24 = vsel %vm4824_vm5, %v4829_v11, 0.0 }
  0x1f   : > { %4039 = vmatmul.mubr.msk.bf16.gmra.mrb[4].mxu1 %vm5874_vm1, %v4697_v19  ;;  %5935 = vst [vmem:[#allocation8_spill] sm:$0xff] %v4818_v6  ;;  %v822_v25 = vld [vmem:[%s4682_s25 + $0xc1] sm:$0xff]  ;;  %v823_v26 = vld [vmem:[%s4682_s25 + $0xc9] sm:$0xff]  ;;  %v2292_v31 = vld [vmem:[%s4682_s25 + $0x52] sm:$0xff]  ;;  %v2325_v32 = vsel %vm4834_vm6, %v4839_v14, 0.0  ;;  %v300_v33 = vand.u32 15, %v186_v12  ;;  %v4868_v34 = vpack.c.bf16 %v821_v20, %v820_v18  ;;  %v2351_v41 = vpack.c.bf16 %v2323_v24, %v4855_v23 }
  0x20   : > { %4175 = vmatmul.mubr.msk.bf16.gmra.mrb[4].mxu0 %vm5874_vm1, %v4727_v28  ;;  %4042 = vmatprep.mubr.msk.bf16.mxu1 %vm5874_vm1, %v4727_v28  ;;  %v314_v35 = vand.u32 15, %v188_v16  ;;  %v4872_v42 = vpack.c.bf16 %v823_v26, %v822_v25  ;;  %v328_v43 = vand.u32 15, %v190_v21  ;;  %v4875_v45 = vadd.s32 16, %v4723_v27  ;;  %v2297_v55 = vld [vmem:[%s4682_s25 + $0x7a] sm:$0xff]  ;;  %v824_v57 = vld [vmem:[%s4682_s25 + $0xd1] sm:$0xff]  ;;  %v827_v4 = vld [vmem:[%s4682_s25 + $0xe9] sm:$0xff] }
  0x21   : > { %4178 = vmatprep.mubr.msk.bf16.mxu0 %vm5874_vm1, %v4729_v29  ;;  %5942 = vst [vmem:[#allocation11_spill] sm:$0xff] %v4868_v34  ;;  %v2352_v46 = vpack.c.bf16 %v2325_v32, %v2292_v31  ;;  %vm4877_vm7 = vcmp.le.s32.totalorder %v286_v30, 14  ;;  %v5944_v47 = vmov 0  ;;  %vm4882_vm8 = vcmp.le.s32.totalorder %v300_v33, 14  ;;  %v825_v59 = vld [vmem:[%s4682_s25 + $0xd9] sm:$0xff]  ;;  %v826_v0 = vld [vmem:[%s4682_s25 + $0xe1] sm:$0xff] }
  0x22   : > { %5943 = vst [vmem:[#allocation12_spill] sm:$0xff] %v4872_v42  ;;  %v5945_v47 = vsel %vm4877_vm7, 4294967295, %v5944_v47  ;;  %v5947_v52 = vmov 0  ;;  %v192_v56 = vadd.s32 152, %v4723_v27  ;;  %vm4892_vm9 = vcmp.le.s32.totalorder %v314_v35, 14  ;;  %v2296_v12 = vld [vmem:[%s4682_s25 + $0x72] sm:$0xff] }
  0x23   : > { %5946 = vst [vmem:[#allocation13_spill] sm:$0xff] %v5945_v47  ;;  %v5948_v52 = vsel %vm4882_vm8, 4294967295, %v5947_v52  ;;  %v5950_v60 = vmov 0  ;;  %v194_v61 = vadd.s32 168, %v4723_v27  ;;  %vm4904_vm10 = vcmp.ge.s32.totalorder %v209_v38, 1  ;;  %v3232_v39 = vld [vmem:[%s4682_s25 + $0x32] sm:$0xff] }
  0x24   : > { %5949 = vst [vmem:[#allocation14_spill] sm:$0xff] %v5948_v52  ;;  %v5951_v60 = vsel %vm4892_vm9, 4294967295, %v5950_v60  ;;  %vm4908_vm11 = vcmp.le.s32.totalorder %v328_v43, 14  ;;  %v2329_v16 = vsel %vm4882_vm8, %v2297_v55, 0.0  ;;  %v196_v18 = vadd.s32 184, %v4723_v27  ;;  %v2299_v43 = vld [vmem:[%s4682_s25 + $0x8a] sm:$0xff] }
  0x25   : > { %5952 = vst [vmem:[#allocation15_spill] sm:$0xff] %v5951_v60  ;;  %v198_v20 = vadd.s32 200, %v4723_v27  ;;  %v1373_v21 = vsel %vm4776_vm3, %v4756_v40, 0.0  ;;  %v4923_v24 = vpack.c.bf16 %v825_v59, %v824_v57  ;;  %v342_v25 = vand.u32 15, %v192_v56  ;;  %v653_v56 = vld [vmem:[%s4682_s25] sm:$0xff] }
  0x26   : > { %v4926_v26 = vadd.s32 32, %v4723_v27  ;;  %v4929_v30 = vpack.c.bf16 %v1373_v21, %v4768_v44  ;;  %v4931_v32 = vpack.c.bf16 %v827_v4, %v826_v0  ;;  %v356_v33 = vand.u32 15, %v194_v61  ;;  %v2301_v57 = vld [vmem:[%s4682_s25 + $0x9a] sm:$0xff] }
  0x27   : > { %4043 = vmatmul.mubr.msk.bf16.gmra.mrb[8].mxu1 %vm5874_vm1, %v4729_v29  ;;  %5958 = vst [vmem:[#allocation17_spill] sm:$0xff] %v4923_v24  ;;  %v1375_v35 = vsel %vm4786_vm4, %v4781_v51, 0.0  ;;  %v1377_v40 = vsel %vm4824_vm5, %v4791_v54, 0.0  ;;  %v370_v59 = vand.u32 15, %v196_v18  ;;  %v384_v61 = vand.u32 15, %v198_v20  ;;  %v829_v4 = vld [vmem:[%s4682_s25 + $0xf9] sm:$0xff] }
  0x28   : > { %4179 = vmatmul.mubr.msk.bf16.gmra.mrb[8].mxu0 %vm5874_vm1, %v4744_v36  ;;  %4046 = vmatprep.mubr.msk.bf16.mxu1 %vm5874_vm1, %v4744_v36  ;;  %5959 = vst [vmem:[#allocation18_spill] sm:$0xff] %v4931_v32  ;;  %v4944_v44 = vpack.c.bf16 %v1377_v40, %v4810_v62  ;;  %v1379_v51 = vsel %vm4834_vm6, %v4829_v11, 0.0  ;;  %v1381_v54 = vsel %vm4877_vm7, %v4839_v14, 0.0  ;;  %vm4954_vm12 = vcmp.le.s32.totalorder %v342_v25, 14  ;;  %v828_v11 = vld [vmem:[%s4682_s25 + $0xf1] sm:$0xff]  ;;  %v2298_v18 = vld [vmem:[%s4682_s25 + $0x82] sm:$0xff] }
  0x29   : > { %4182 = vmatprep.mubr.msk.bf16.mxu0 %vm5874_vm1, %v4746_v37  ;;  %v237_v62 = vand.u32 15, %v4926_v26  ;;  %v4962_v0 = vpack.c.bf16 %v1381_v54, %v2292_v31  ;;  %v2331_v14 = vsel %vm4892_vm9, %v2299_v43, 0.0  ;;  %vm4970_vm13 = vcmp.le.s32.totalorder %v356_v33, 14  ;;  %v654_v20 = vld [vmem:[%s4682_s25 + $0x8] sm:$0xff]  ;;  %v2300_v25 = vld [vmem:[%s4682_s25 + $0x92] sm:$0xff] }
  0x2a   : > { %v1385_v31 = vsel %vm4892_vm9, %v2297_v55, 0.0  ;;  %v749_v21 = vsel %vm4904_vm10, %v653_v56, 0.0  ;;  %v2303_v33 = vld [vmem:[%s4682_s25 + $0xaa] sm:$0xff]  ;;  %vm4995_vm14 = vcmp.le.s32.totalorder %v370_v59, 14  ;;  %v5966_v40 = vmov 0 }
  0x2b   : > { %v4990_v55 = vpack.c.bf16 %v1385_v31, %v2296_v12  ;;  %v5967_v40 = vsel %vm4995_vm14, 4294967295, %v5966_v40  ;;  %vm4999_vm15 = vcmp.le.s32.totalorder %v384_v61, 14  ;;  %v1387_v56 = vsel %vm4908_vm11, %v2299_v43, 0.0  ;;  %v5010_v54 = vld [vmem:[%s4682_s25 + $0xca] sm:$0xff]  ;;  %v5023_v31 = vld [vmem:[%s4682_s25 + $0xc2] sm:$0xff] }
  0x2c   : > { %5968 = vst [vmem:[#allocation21_spill] sm:$0xff] %v5967_v40  ;;  %v1391_v61 = vsel %vm4970_vm13, %v2303_v33, 0.0  ;;  %v5020_v43 = vpack.c.bf16 %v829_v4, %v828_v11  ;;  %v179_v60 = vadd.s32 48, %v4723_v27  ;;  %v5973_v4 = vand.u32 15, %v4875_v45  ;;  %v656_v45 = vld [vmem:[%s4682_s25 + $0x18] sm:$0xff] }
  0x2d   : > { %v181_v47 = vadd.s32 64, %v4723_v27  ;;  %vm6022_vm5 = vcmask 31744   ;;  %v199_v13 = vadd.s32 208, %v4723_v27 }
  0x2e   : > { %5972 = vst [vmem:[#allocation23_spill] sm:$0xff] %v5020_v43  ;;  %vm6023_vm4 = vmmov %vm6022_vm5 }
  0x2f   : > { %4047 = vmatmul.mubr.msk.bf16.gmra.mrb[12].mxu1 %vm5874_vm1, %v4746_v37  ;;  %vm6024_vm3 = vmmov %vm6023_vm4 }
  0x30   : > { %4183 = vmatmul.mubr.msk.bf16.gmra.mrb[12].mxu0 %vm5874_vm1, %v4773_v48  ;;  %4050 = vmatprep.mubr.msk.bf16.mxu1 %vm5874_vm1, %v4773_v48  ;;  %v5231_v48 = vld [vmem:[%s4682_s25 + $0x70] sm:$0xff] }
  0x31   : > { %4204 = vmatprep.mubr.msk.bf16.mxu0 %vm5874_vm1, %v2348_v49  ;;  %v2295_v49 = vld [vmem:[%s4682_s25 + $0x6a] sm:$0xff] }
  0x32   : > { %v2327_v63 = vsel %vm4877_vm7, %v2295_v49, 0.0 }
  0x37   : > { %4051 = vmatmul.mubr.msk.bf16.gmra.mrb[16].mxu1 %vm5874_vm1, %v4815_v2 }
  0x38   : > { %4205 = vmatmul.mubr.msk.bf16.vlgmr.msra.gmra.mrb[0].mxu0 %vm5874_vm1, %v2349_v5  ;;  %4054 = vmatprep.mubr.msk.bf16.mxu1 %vm5874_vm1, %v4818_v6  ;;  %v5295_v5 = vld [vmem:[%s4682_s25 + $0x90] sm:$0xff] }
  0x39   : > { %4237 = vmatpush3.bf16.msra.mxu0 %v2741_v9  ;;  %4208 = vmatprep.mubr.msk.bf16.mxu0 %vm5874_vm1, %v2350_v7  ;;  %v5955_v7 = vmov 0  ;;  %v2294_v9 = vld [vmem:[%s4682_s25 + $0x62] sm:$0xff] }
  0x3a   : > { %4604 = vmatprep.subr.msk.bf16.mxu0 %vm5872_vm0, %v4845_v17  ;;  %v5956_v7 = vsel %vm4908_vm11, 4294967295, %v5955_v7  ;;  %v2353_v38 = vpack.c.bf16 %v2327_v63, %v2294_v9  ;;  %v4960_v63 = vpack.c.bf16 %v1379_v51, %v4855_v23  ;;  %v1383_v23 = vsel %vm4882_vm8, %v2295_v49, 0.0  ;;  %v2304_v51 = vld [vmem:[%s4682_s25 + $0xb2] sm:$0xff] }
  0x3b   : > { %5957 = vst [vmem:[#allocation16_spill] sm:$0xff] %v5956_v7  ;;  %v2333_v49 = vsel %vm4908_vm11, %v2301_v57, 0.0  ;;  %v4988_v26 = vpack.c.bf16 %v1383_v23, %v2294_v9  ;;  %v1389_v9 = vsel %vm4954_vm12, %v2301_v57, 0.0  ;;  %v781_v7 = vpack.c.bf16 %v654_v20, %v749_v21 }
  0x3c   : > { %v5014_v59 = vpack.c.bf16 %v1389_v9, %v2300_v25  ;;  %v2355_v9 = vpack.c.bf16 %v2331_v14, %v2298_v18  ;;  %v2356_v11 = vpack.c.bf16 %v2333_v49, %v2300_v25  ;;  %vm5038_vm0 = vcmp.ge.s32.totalorder %v5973_v4, 1  ;;  %v5049_v14 = vld [vmem:[%s4682_s25 + $0x20] sm:$0xff]  ;;  %v5064_v25 = vld [vmem:[%s4682_s25 + $0x28] sm:$0xff] }
  0x3d   : > { %vm5978_vm11 = vcmask 31744   ;;  %v2335_v20 = vsel %vm4954_vm12, %v2303_v33, 0.0  ;;  %v265_v49 = vand.u32 15, %v181_v47 }
  0x3e   : > { %vm5979_vm9 = vmmov %vm5978_vm11 }
  0x3f   : > { %4055 = vmatmul.mubr.msk.bf16.gmra.mrb[20].mxu1 %vm5874_vm1, %v4868_v34  ;;  %vm5980_vm8 = vmmov %vm5979_vm9 }
  0x40   : > { %4209 = vmatmul.mubr.msk.bf16.gmra.mrb[4].mxu0 %vm5874_vm1, %v2351_v41  ;;  %4058 = vmatprep.mubr.msk.bf16.mxu1 %vm5874_vm1, %v4872_v42  ;;  %v2354_v41 = vpack.c.bf16 %v2329_v16, %v2296_v12  ;;  %v5963_v16 = vmov 0  ;;  %v2302_v12 = vld [vmem:[%s4682_s25 + $0xa2] sm:$0xff]  ;;  %vm5981_vm7 = vmmov %vm5980_vm8 }
  0x41   : > { %4212 = vmatprep.mubr.msk.bf16.mxu0 %vm5874_vm1, %v2352_v46  ;;  %v4941_v46 = vpack.c.bf16 %v1375_v35, %v4802_v58  ;;  %v5960_v58 = vmov 0  ;;  %v5964_v16 = vsel %vm4970_vm13, 4294967295, %v5963_v16  ;;  %v2305_v35 = vld [vmem:[%s4682_s25 + $0xba] sm:$0xff]  ;;  %v5025_v57 = vpack.c.bf16 %v1391_v61, %v2302_v12 }
  0x42   : > { %v5961_v58 = vsel %vm4954_vm12, 4294967295, %v5960_v58  ;;  %5965 = vst [vmem:[#allocation20_spill] sm:$0xff] %v5964_v16  ;;  %v1393_v23 = vsel %vm4995_vm14, %v2305_v35, 0.0  ;;  %v2337_v33 = vsel %vm4970_vm13, %v2305_v35, 0.0  ;;  %v183_v16 = vadd.s32 80, %v4723_v27 }
  0x43   : > { %5962 = vst [vmem:[#allocation19_spill] sm:$0xff] %v5961_v58  ;;  %v5027_v8 = vpack.c.bf16 %v1393_v23, %v2304_v51  ;;  %v655_v23 = vld [vmem:[%s4682_s25 + $0x10] sm:$0xff]  ;;  %v2358_v35 = vpack.c.bf16 %v2337_v33, %v2304_v51 }
  0x44   : > { %v1696_v21 = vsel %vm4904_vm10, %v655_v23, 0.0 }
  0x47   : > { %4059 = vmatmul.mubr.msk.bf16.gmra.mrb[24].mxu1 %vm5874_vm1, %v4923_v24 }
  0x48   : > { %4213 = vmatmul.mubr.msk.bf16.gmra.mrb[8].mxu0 %vm5874_vm1, %v2353_v38  ;;  %4062 = vmatprep.mubr.msk.bf16.mxu1 %vm5874_vm1, %v4931_v32  ;;  %v5969_v38 = vmov 0  ;;  %v5156_v32 = vld [vmem:[%s4682_s25 + $0x50] sm:$0xff] }
  0x49   : > { %4216 = vmatprep.mubr.msk.bf16.mxu0 %vm5874_vm1, %v2354_v41  ;;  %v5970_v38 = vsel %vm4999_vm15, 4294967295, %v5969_v38  ;;  %v5012_v41 = vpack.c.bf16 %v1387_v56, %v2298_v18  ;;  %v1395_v56 = vsel %vm4999_vm15, %v5010_v54, 0.0  ;;  %vm5044_vm1 = vcmp.ge.s32.totalorder %v237_v62, 1 }
  0x4a   : > { %5971 = vst [vmem:[#allocation22_spill] sm:$0xff] %v5970_v38  ;;  %v5034_v52 = vpack.c.bf16 %v1395_v56, %v5023_v31  ;;  %v751_v18 = vsel %vm5038_vm0, %v655_v23, 0.0  ;;  %v251_v62 = vand.u32 15, %v179_v60  ;;  %v5069_v56 = vpack.c.bf16 %v656_v45, %v1696_v21  ;;  %v5087_v21 = vld [vmem:[%s4682_s25 + $0x30] sm:$0xff] }
  0x4b   : > { %v1698_v60 = vsel %vm5038_vm0, %v5049_v14, 0.0  ;;  %v2357_v23 = vpack.c.bf16 %v2335_v20, %v2302_v12  ;;  %v200_v12 = vadd.s32 216, %v4723_v27  ;;  %v2339_v20 = vsel %vm4995_vm14, %v5010_v54, 0.0 }
  0x4c   : > { %5982 = vst [vmem:[#allocation24_spill] sm:$0xff] %v5069_v56  ;;  %v1700_v40 = vsel %vm5044_vm1, %v5087_v21, 0.0 }
  0x4d   : > { %v398_v10 = vand.u32 15, %v200_v12  ;;  %v2359_v12 = vpack.c.bf16 %v2339_v20, %v5023_v31  ;;  %v5170_v31 = vld [vmem:[%s4682_s25 + $0x60] sm:$0xff]  ;;  %v187_v20 = vadd.s32 112, %v4723_v27 }
  0x4f   : > { %4063 = vmatmul.mubr.msk.bf16.gmra.mrb[28].mxu1 %vm5978_vm11, %v5020_v43  ;;  %v307_v42 = vand.u32 15, %v187_v20 }
  0x50   : > { %4217 = vmatmul.mubr.msk.bf16.gmra.mrb[12].mxu0 %vm5979_vm9, %v2355_v9  ;;  %4068 = vmatprep.mubr.msk.bf16.mxu1 %vm5980_vm8, %v781_v7  ;;  %v753_v7 = vsel %vm5044_vm1, %v5049_v14, 0.0  ;;  %v5077_v9 = vpack.c.bf16 %v5064_v25, %v1698_v60  ;;  %vm5082_vm8 = vcmp.ge.s32.totalorder %v251_v62, 1  ;;  %vm5090_vm9 = vcmp.ge.s32.totalorder %v265_v49, 1  ;;  %v5117_v49 = vld [vmem:[%s4682_s25 + $0x38] sm:$0xff]  ;;  %v5404_v60 = vld [vmem:[%s4682_s25 + $0xd0] sm:$0xff] }
  0x51   : > { %4220 = vmatprep.mubr.msk.bf16.mxu0 %vm5981_vm7, %v2356_v11  ;;  %v782_v11 = vpack.c.bf16 %v656_v45, %v751_v18  ;;  %vm5984_vm7 = vcmask 1041408   ;;  %v783_v58 = vpack.c.bf16 %v5064_v25, %v753_v7  ;;  %v5095_v45 = vld [vmem:[%s4682_s25 + $0x40] sm:$0xff]  ;;  %v185_v18 = vadd.s32 96, %v4723_v27 }
  0x52   : > { %5983 = vst [vmem:[#allocation25_spill] sm:$0xff] %v5077_v9  ;;  %v1469_v4 = vsel %vm5984_vm7, %v4711_v22, 0  ;;  %v5098_v22 = vld [vmem:[%s4682_s25 + $0xda] sm:$0xff]  ;;  %v755_v51 = vsel %vm5082_vm8, %v5087_v21, 0.0  ;;  %v202_v62 = vadd.s32 232, %v4723_v27  ;;  %vm5989_vm7 = vmmov %vm5978_vm11  ;;  %v757_v33 = vsel %vm5090_vm9, %v5095_v45, 0.0 }
  0x53   : > { %v5113_v7 = vld [vmem:[%s5866_s1 + $0x6] sm:$0x3]  ;;  %v2341_v54 = vsel %vm4999_vm15, %v5098_v22, 0.0  ;;  %vm5991_vm14 = vmmov %vm5989_vm7  ;;  %v293_v53 = vand.u32 15, %v185_v18  ;;  %v5137_v38 = vpack.c.bf16 %v5117_v49, %v1700_v40  ;;  %vm6002_vm15 = vcmask 31744   ;;  %v5214_v9 = vld [vmem:[%s4682_s25 + $0xf2] sm:$0xff] }
  0x54   : > { %v412_v50 = vand.u32 15, %v202_v62  ;;  %vm6007_vm12 = vmmov %vm6002_vm15  ;;  %6012 = vst [vmem:[#allocation33_spill] sm:$0xff] %v5214_v9  ;;  %v2650_v47 = vsel %vm5090_vm9, %v5170_v31, 0.0  ;;  %v5452_v62 = vld [vmem:[%s4682_s25 + $0xf8] sm:$0xff] }
  0x55   : > { %5993 = vst [vmem:[#allocation27_spill] sm:$0xff] %v5137_v38  ;;  %vm6008_vm6 = vmmov %vm6007_vm12 }
  0x56   : > { %vm5176_vm13 = vcmp.le.s32.totalorder %v412_v50, 14 }
  0x57   : > { %4069 = vmatmul.mubr.msk.bf16.vlgmr.msra.gmra.mrb[0].mxu1 %vm5978_vm11, %v782_v11  ;;  %v279_v11 = vand.u32 15, %v183_v16  ;;  %vm5990_vm11 = vmmov %vm5989_vm7  ;;  %v1702_v16 = vsel %vm5082_vm8, %v5095_v45, 0.0 }
  0x58   : > { %4101 = vmatpush3.bf16.msra.mxu1 %v1469_v4  ;;  %4221 = vmatmul.mubr.msk.bf16.gmra.mrb[16].mxu0 %vm5989_vm7, %v2357_v23  ;;  %v5131_v4 = vld [vmem:[%s4682_s25 + $0x48] sm:$0xff]  ;;  %v5134_v23 = vld [vmem:[%s4682_s25 + $0xd2] sm:$0xff]  ;;  %vm5994_vm7 = vcmask 1041408  }
  0x59   : > { %4072 = vmatprep.mubr.msk.bf16.mxu1 %vm5990_vm11, %v783_v58  ;;  %4224 = vmatprep.mubr.msk.bf16.mxu0 %vm5991_vm14, %v2358_v35  ;;  %5992 = vst [vmem:[#allocation26_spill] sm:$0xff] %v5134_v23  ;;  %v5145_v58 = vpack.c.bf16 %v5131_v4, %v1702_v16  ;;  %v784_v35 = vpack.c.bf16 %v5117_v49, %v755_v51  ;;  %vm5151_vm14 = vcmp.ge.s32.totalorder %v279_v11, 1  ;;  %vm5158_vm11 = vcmp.le.s32.totalorder %v398_v10, 14  ;;  %v5163_v51 = vld [vmem:[%s4682_s25 + $0xea] sm:$0xff]  ;;  %v5186_v11 = vld [vmem:[%s4682_s25 + $0x58] sm:$0xff] }
  0x5a   : > { %4599 = vmatprep.subr.msk.bf16.mxu1 %vm5994_vm7, %v5113_v7  ;;  %v785_v18 = vpack.c.bf16 %v5131_v4, %v757_v33  ;;  %v2360_v40 = vpack.c.bf16 %v2341_v54, %v5134_v23  ;;  %vm5165_vm7 = vcmp.ge.s32.totalorder %v293_v53, 1  ;;  %v204_v33 = vadd.s32 248, %v4723_v27  ;;  %v5181_v53 = vld [vmem:[%s4682_s25 + $0xfa] sm:$0xff]  ;;  %v3260_v16 = vld [vmem:[%s4682_s25 + $0x112] sm:$0xff] }
  0x5b   : > { %5995 = vst [vmem:[#allocation28_spill] sm:$0xff] %v5145_v58  ;;  %v189_v54 = vadd.s32 128, %v4723_v27  ;;  %v6003_v10 = vmov 0  ;;  %6006 = vst [vmem:[#allocation30_spill] sm:$0xff] %v5181_v53  ;;  %v759_v24 = vsel %vm5151_vm14, %v5156_v32, 0.0  ;;  %v2343_v50 = vsel %vm5158_vm11, %v5163_v51, 0.0 }
  0x5c   : > { %v6004_v10 = vsel %vm5176_vm13, 4294967295, %v6003_v10  ;;  %v5205_v58 = vld [vmem:[%s4682_s25 + $0x68] sm:$0xff]  ;;  %v426_v38 = vand.u32 15, %v204_v33  ;;  %v1706_v3 = vsel %vm5151_vm14, %v5170_v31, 0.0  ;;  %v786_v20 = vpack.c.bf16 %v5186_v11, %v759_v24 }
  0x5d   : > { %6005 = vst [vmem:[#allocation29_spill] sm:$0xff] %v6004_v10  ;;  %v321_v6 = vand.u32 15, %v189_v54  ;;  %v5220_v56 = vpack.c.bf16 %v5205_v58, %v1706_v3  ;;  %v6016_v3 = vmov 0  ;;  %v5238_v54 = vld [vmem:[%s4682_s25 + $0x10a] sm:$0xff]  ;;  %v191_v24 = vadd.s32 144, %v4723_v27 }
  0x5e   : > { %6019 = vst [vmem:[#allocation36_spill] sm:$0xff] %v5238_v54  ;;  %v5349_v10 = vld [vmem:[%s4682_s25 + $0xb0] sm:$0xff] }
  0x5f   : > { %4073 = vmatmul.mubr.msk.bf16.gmra.mrb[4].mxu1 %vm6002_vm15, %v784_v35  ;;  %v761_v35 = vsel %vm5165_vm7, %v5170_v31, 0.0  ;;  %6013 = vst [vmem:[#allocation34_spill] sm:$0xff] %v5220_v56  ;;  %vm5233_vm15 = vcmp.le.s32.totalorder %v426_v38, 14  ;;  %v5253_v38 = vld [vmem:[%s4682_s25 + $0x78] sm:$0xff]  ;;  %v1708_v56 = vsel %vm5165_vm7, %v5231_v48, 0.0  ;;  %v203_v31 = vadd.s32 240, %v4723_v27 }
  0x60   : > { %4225 = vmatmul.mubr.msk.bf16.gmra.mrb[20].mxu0 %vm6007_vm12, %v2359_v12  ;;  %4076 = vmatprep.mubr.msk.bf16.mxu1 %vm6008_vm6, %v785_v18  ;;  %v1704_v12 = vsel %vm5090_vm9, %v5156_v32, 0.0  ;;  %vm6009_vm12 = vmmov %vm6008_vm6  ;;  %v5202_v18 = vld [vmem:[%s4682_s25 + $0xe2] sm:$0xff]  ;;  %vm5226_vm6 = vcmp.ge.s32.totalorder %v307_v42, 1  ;;  %v6017_v3 = vsel %vm5233_vm15, 4294967295, %v6016_v3 }
  0x61   : > { %4228 = vmatprep.mubr.msk.bf16.mxu0 %vm6009_vm12, %v2360_v40  ;;  %6010 = vst [vmem:[#allocation31_spill] sm:$0xff] %v5202_v18  ;;  %v5208_v34 = vpack.c.bf16 %v5186_v11, %v1704_v12  ;;  %v2345_v40 = vsel %vm5176_vm13, %v5181_v53, 0.0  ;;  %v2361_v33 = vpack.c.bf16 %v2343_v50, %v5202_v18  ;;  %v787_v12 = vpack.c.bf16 %v5205_v58, %v761_v35  ;;  %v5246_v42 = vld [vmem:[%s4682_s25 + $0x80] sm:$0xff]  ;;  %vm6025_vm13 = vmmov %vm6024_vm3 }
  0x62   : > { %6018 = vst [vmem:[#allocation35_spill] sm:$0xff] %v6017_v3  ;;  %vm5241_vm12 = vcmp.ge.s32.totalorder %v321_v6, 1  ;;  %v193_v35 = vadd.s32 160, %v4723_v27  ;;  %v2347_v6 = vsel %vm5233_vm15, %v5238_v54, 0.0  ;;  %v5275_v3 = vpack.c.bf16 %v5253_v38, %v1708_v56  ;;  %vm6042_vm15 = vmmov %vm6022_vm5 }
  0x63   : > { %6011 = vst [vmem:[#allocation32_spill] sm:$0xff] %v5208_v34  ;;  %v2362_v34 = vpack.c.bf16 %v2345_v40, %v5214_v9  ;;  %v763_v40 = vsel %vm5226_vm6, %v5231_v48, 0.0  ;;  %v335_v9 = vand.u32 15, %v191_v24  ;;  %v1710_v54 = vsel %vm5226_vm6, %v5246_v42, 0.0 }
  0x64   : > { %6027 = vst [vmem:[#allocation38_spill] sm:$0xff] %v5275_v3  ;;  %v349_v53 = vand.u32 15, %v193_v35  ;;  %v788_v18 = vpack.c.bf16 %v5253_v38, %v763_v40  ;;  %v5303_v35 = vld [vmem:[%s4682_s25 + $0xa0] sm:$0xff]  ;;  %v197_v40 = vadd.s32 192, %v4723_v27 }
  0x67   : > { %4077 = vmatmul.mubr.msk.bf16.gmra.mrb[8].mxu1 %vm6022_vm5, %v786_v20  ;;  %v5266_v20 = vld [vmem:[%s4682_s25 + $0x102] sm:$0xff] }
  0x68   : > { %4229 = vmatmul.mubr.msk.bf16.gmra.mrb[24].mxu0 %vm6023_vm4, %v2361_v33  ;;  %4080 = vmatprep.mubr.msk.bf16.mxu1 %vm6024_vm3, %v787_v12  ;;  %6026 = vst [vmem:[#allocation37_spill] sm:$0xff] %v5266_v20  ;;  %v5269_v33 = vld [vmem:[%s4682_s25 + $0x88] sm:$0xff]  ;;  %v765_v12 = vsel %vm5241_vm12, %v5246_v42, 0.0  ;;  %v2363_v24 = vpack.c.bf16 %v2347_v6, %v5266_v20  ;;  %vm5290_vm3 = vcmp.ge.s32.totalorder %v335_v9, 1  ;;  %vm5298_vm4 = vcmp.ge.s32.totalorder %v349_v53, 1 }
  0x69   : > { %4232 = vmatprep.mubr.msk.bf16.mxu0 %vm6025_vm13, %v2362_v34  ;;  %v2642_v34 = vsel %vm4904_vm10, %v5049_v14, 0.0  ;;  %v5284_v37 = vpack.c.bf16 %v5269_v33, %v1710_v54  ;;  %v789_v56 = vpack.c.bf16 %v5269_v33, %v765_v12  ;;  %v195_v14 = vadd.s32 176, %v4723_v27  ;;  %vm6033_vm10 = vmmov %vm6022_vm5 }
  0x6a   : > { %v2674_v3 = vpack.c.bf16 %v5064_v25, %v2642_v34  ;;  %vm6034_vm13 = vmmov %vm6022_vm5  ;;  %v5310_v25 = vld [vmem:[%s4682_s25 + $0x98] sm:$0xff]  ;;  %v767_v9 = vsel %vm5290_vm3, %v5295_v5, 0.0  ;;  %v2644_v53 = vsel %vm5038_vm0, %v5087_v21, 0.0  ;;  %v1712_v6 = vsel %vm5241_vm12, %v5295_v5, 0.0 }
  0x6b   : > { %6028 = vst [vmem:[#allocation39_spill] sm:$0xff] %v5284_v37  ;;  %v769_v12 = vsel %vm5298_vm4, %v5303_v35, 0.0  ;;  %v363_v34 = vand.u32 15, %v195_v14  ;;  %v1714_v61 = vsel %vm5290_vm3, %v5303_v35, 0.0  ;;  %v2646_v21 = vsel %vm5044_vm1, %v5095_v45, 0.0  ;;  %v5511_v37 = vld [vmem:[%s4682_s25 + $0x108] sm:$0xff] }
  0x6c   : > { %v790_v20 = vpack.c.bf16 %v5310_v25, %v767_v9  ;;  %v2675_v14 = vpack.c.bf16 %v5117_v49, %v2644_v53  ;;  %vm6038_vm1 = vcmask 1041408   ;;  %v5359_v49 = vld [vmem:[%s4682_s25 + $0xc0] sm:$0xff]  ;;  %v5366_v9 = vld [vmem:[%s5866_s1 + $0x10] sm:$0x3]  ;;  %v2660_v2 = vsel %vm5290_vm3, %v5349_v10, 0.0 }
  0x6d   : > { %vm5344_vm0 = vcmp.ge.s32.totalorder %v363_v34, 1  ;;  %v3035_v45 = vsel %vm6038_vm1, %v4845_v17, 0  ;;  %v676_v17 = vld [vmem:[%s4682_s25 + $0xb8] sm:$0xff]  ;;  %vm6043_vm1 = vmmov %vm6022_vm5  ;;  %v678_v34 = vld [vmem:[%s4682_s25 + $0xc8] sm:$0xff]  ;;  %v2662_v50 = vsel %vm5298_vm4, %v5359_v49, 0.0 }
  0x6e   : > { %v771_v53 = vsel %vm5344_vm0, %v5349_v10, 0.0  ;;  %vm6065_vm3 = vmmov %vm6043_vm1  ;;  %v2664_v23 = vsel %vm5344_vm0, %v5404_v60, 0.0 }
  0x6f   : > { %4081 = vmatmul.mubr.msk.bf16.gmra.mrb[12].mxu1 %vm6022_vm5, %v788_v18  ;;  %v5323_v18 = vld [vmem:[%s4682_s25 + $0xa8] sm:$0xff] }
  0x70   : > { %4233 = vmatmul.mubr.msk.bf16.gmra.mrb[28].mxu0 %vm6033_vm10, %v2363_v24  ;;  %4084 = vmatprep.mubr.msk.bf16.mxu1 %vm6034_vm13, %v789_v56  ;;  %v5329_v24 = vpack.c.bf16 %v5310_v25, %v1712_v6  ;;  %v5338_v56 = vpack.c.bf16 %v5323_v18, %v1714_v61  ;;  %v791_v6 = vpack.c.bf16 %v5323_v18, %v769_v12  ;;  %vm6041_vm13 = vmmov %vm6022_vm5  ;;  %v2648_v12 = vsel %vm5082_vm8, %v5156_v32, 0.0 }
  0x71   : > { %4238 = vmatprep.mubr.msk.bf16.mxu0 %vm6022_vm5, %v2674_v3  ;;  %v377_v3 = vand.u32 15, %v197_v40  ;;  %v1718_v32 = vsel %vm5344_vm0, %v5359_v49, 0.0  ;;  %vm6045_vm8 = vcmask 1041408   ;;  %vm6069_vm0 = vmmov %vm6043_vm1 }
  0x72   : > { %6035 = vst [vmem:[#allocation40_spill] sm:$0xff] %v5329_v24  ;;  %v2676_v24 = vpack.c.bf16 %v5131_v4, %v2646_v21  ;;  %v201_v4 = vadd.s32 224, %v4723_v27  ;;  %v391_v21 = vand.u32 15, %v199_v13  ;;  %v2677_v13 = vpack.c.bf16 %v5186_v11, %v2648_v12 }
  0x73   : > { %vm5354_vm10 = vcmp.ge.s32.totalorder %v377_v3, 1  ;;  %v2652_v11 = vsel %vm5151_vm14, %v5231_v48, 0.0 }
  0x74   : > { %v773_v61 = vsel %vm5354_vm10, %v5359_v49, 0.0  ;;  %v2640_v49 = vld [vmem:[%s4682_s25 + $0x110] sm:$0xff] }
  0x77   : > { %4085 = vmatmul.mubr.msk.bf16.gmra.mrb[16].mxu1 %vm6041_vm13, %v790_v20  ;;  %v1716_v20 = vsel %vm5298_vm4, %v5349_v10, 0.0  ;;  %vm6050_vm13 = vmmov %vm6043_vm1 }
  0x78   : > { %4239 = vmatmul.mubr.msk.bf16.vlgmr.msra.gmra.mrb[0].mxu0 %vm6022_vm5, %v2675_v14  ;;  %4088 = vmatprep.mubr.msk.bf16.mxu1 %vm6042_vm15, %v791_v6  ;;  %v5385_v3 = vpack.c.bf16 %v676_v17, %v1716_v20  ;;  %v405_v14 = vand.u32 15, %v201_v4  ;;  %v792_v6 = vpack.c.bf16 %v676_v17, %v771_v53  ;;  %v2678_v20 = vpack.c.bf16 %v5205_v58, %v2650_v47  ;;  %vm6051_vm5 = vmmov %vm6043_vm1  ;;  %v5418_v58 = vld [vmem:[%s4682_s25 + $0xd8] sm:$0xff]  ;;  %v5428_v53 = vld [vmem:[%s4682_s25 + $0xe8] sm:$0xff] }
  0x79   : > { %4271 = vmatpush3.bf16.msra.mxu0 %v3035_v45  ;;  %4242 = vmatprep.mubr.msk.bf16.mxu0 %vm6043_vm1, %v2676_v24  ;;  %v5395_v24 = vpack.c.bf16 %v678_v34, %v1718_v32  ;;  %v793_v45 = vpack.c.bf16 %v678_v34, %v773_v61  ;;  %vm5399_vm15 = vcmp.ge.s32.totalorder %v391_v21, 1  ;;  %v5412_v32 = vld [vmem:[%s4682_s25 + $0xe0] sm:$0xff]  ;;  %v419_v61 = vand.u32 15, %v203_v31 }
  0x7a   : > { %6044 = vst [vmem:[#allocation41_spill] sm:$0xff] %v5385_v3  ;;  %4605 = vmatprep.subr.msk.bf16.mxu0 %vm6045_vm8, %v5366_v9  ;;  %vm5407_vm9 = vcmp.ge.s32.totalorder %v405_v14, 1  ;;  %v775_v27 = vsel %vm5399_vm15, %v5404_v60, 0.0  ;;  %vm6052_vm8 = vmmov %vm6043_vm1  ;;  %v2654_v21 = vsel %vm5165_vm7, %v5246_v42, 0.0  ;;  %v2679_v14 = vpack.c.bf16 %v5253_v38, %v2652_v11 }
  0x7b   : > { %v777_v12 = vsel %vm5407_vm9, %v5412_v32, 0.0  ;;  %v794_v47 = vpack.c.bf16 %v5418_v58, %v775_v27  ;;  %v2680_v48 = vpack.c.bf16 %v5269_v33, %v2654_v21  ;;  %vm5440_vm14 = vcmp.ge.s32.totalorder %v419_v61, 1  ;;  %vm6057_vm7 = vmmov %vm6043_vm1  ;;  %v1274_v33 = vld [vmem:[%s4682_s25 + $0x2] sm:$0xff] }
  0x7c   : > { %v795_v43 = vpack.c.bf16 %v5428_v53, %v777_v12  ;;  %v2656_v38 = vsel %vm5226_vm6, %v5295_v5, 0.0  ;;  %v2658_v31 = vsel %vm5241_vm12, %v5303_v35, 0.0  ;;  %vm6060_vm6 = vmmov %vm6043_vm1  ;;  %v2683_v5 = vpack.c.bf16 %v676_v17, %v2660_v2 }
  0x7d   : > { %v2681_v11 = vpack.c.bf16 %v5310_v25, %v2656_v38  ;;  %v2682_v61 = vpack.c.bf16 %v5323_v18, %v2658_v31  ;;  %vm6062_vm12 = vcmask 1041408   ;;  %v2684_v25 = vpack.c.bf16 %v678_v34, %v2662_v50  ;;  %v6112_v38 = vld [vmem:[#allocation27_spill] sm:$0xff]  ;;  %v6118_v31 = vld [vmem:[#allocation17_spill] sm:$0xff]  ;;  %v6124_v50 = vld [vmem:[#allocation34_spill] sm:$0xff] }
  0x7e   : > { %v1795_v35 = vsel %vm6062_vm12, %v5113_v7, 0  ;;  %v2666_v7 = vsel %vm5354_vm10, %v5412_v32, 0.0  ;;  %vm6066_vm4 = vmmov %vm6062_vm12  ;;  %v2672_v17 = vsel %vm5440_vm14, %v2640_v49, 0.0  ;;  %v3235_v49 = vld [vmem:[%s4682_s25 + $0x4a] sm:$0xff]  ;;  %v1722_v40 = vsel %vm5399_vm15, %v5412_v32, 0.0 }
  0x7f   : > { %4089 = vmatmul.mubr.msk.bf16.gmra.mrb[20].mxu1 %vm6050_vm13, %v792_v6  ;;  %vm6055_vm13 = vmmov %vm6043_vm1  ;;  %v2686_v10 = vpack.c.bf16 %v5428_v53, %v2666_v7  ;;  %v2967_v7 = vld [vmem:[%s4682_s25 + $0x119] sm:$0xff]  ;;  %v1741_v3 = vpack.c.bf16 %v5428_v53, %v1722_v40 }
  0x80   : > { %4243 = vmatmul.mubr.msk.bf16.gmra.mrb[4].mxu0 %vm6051_vm5, %v2677_v13  ;;  %4092 = vmatprep.mubr.msk.bf16.mxu1 %vm6043_vm1, %v793_v45  ;;  %v5445_v13 = vld [vmem:[%s4682_s25 + $0xf0] sm:$0xff]  ;;  %vm6056_vm5 = vmmov %vm6043_vm1 }
  0x81   : > { %4246 = vmatprep.mubr.msk.bf16.mxu0 %vm6052_vm8, %v2678_v20  ;;  %v1275_v45 = vld [vmem:[%s4682_s25 + $0xa] sm:$0xff]  ;;  %v779_v42 = vsel %vm5440_vm14, %v5445_v13, 0.0  ;;  %vm6058_vm8 = vmmov %vm6043_vm1  ;;  %v3244_v53 = vld [vmem:[%s4682_s25 + $0x92] sm:$0xff] }
  0x82   : > { %v1371_v20 = vsel %vm4751_vm2, %v1275_v45, 0.0  ;;  %v796_v27 = vpack.c.bf16 %v5452_v62, %v779_v42  ;;  %vm6071_vm12 = vmmov %vm6069_vm0  ;;  %v6109_v45 = vld [vmem:[#allocation2_spill] sm:$0xff]  ;;  %v6110_v42 = vld [vmem:[#allocation11_spill] sm:$0xff] }
  0x83   : > { %v1402_v12 = vpack.c.bf16 %v1371_v20, %v1274_v33  ;;  %v6114_v33 = vld [vmem:[#allocation12_spill] sm:$0xff] }
  0x84   : > { %v6116_v20 = vld [vmem:[#allocation28_spill] sm:$0xff] }
  0x87   : > { %4093 = vmatmul.mubr.msk.bf16.gmra.mrb[24].mxu1 %vm6055_vm13, %v794_v47  ;;  %vm6059_vm13 = vmmov %vm6043_vm1  ;;  %v6102_v47 = vld [vmem:[#allocation7_spill] sm:$0xff] }
  0x88   : > { %4247 = vmatmul.mubr.msk.bf16.gmra.mrb[8].mxu0 %vm6056_vm5, %v2679_v14  ;;  %4096 = vmatprep.mubr.msk.bf16.mxu1 %vm6057_vm7, %v795_v43  ;;  %vm6061_vm5 = vmmov %vm6043_vm1  ;;  %v6104_v14 = vld [vmem:[#allocation24_spill] sm:$0xff] }
  0x89   : > { %4250 = vmatprep.mubr.msk.bf16.mxu0 %vm6043_vm1, %v2680_v48  ;;  %vm6063_vm7 = vmmov %vm6043_vm1  ;;  %v6106_v43 = vld [vmem:[#allocation8_spill] sm:$0xff]  ;;  %v6108_v48 = vld [vmem:[#allocation25_spill] sm:$0xff] }
  0x8f   : > { %4097 = vmatmul.mubr.msk.bf16.gmra.mrb[28].mxu1 %vm6058_vm8, %v796_v27  ;;  %vm6064_vm8 = vmmov %vm6043_vm1  ;;  %v6120_v27 = vld [vmem:[#allocation32_spill] sm:$0xff] }
  0x90   : > { %4251 = vmatmul.mubr.msk.bf16.gmra.mrb[12].mxu0 %vm6059_vm13, %v2681_v11  ;;  %4102 = vmatprep.mubr.msk.bf16.mxu1 %vm6060_vm6, %v1402_v12  ;;  %vm6067_vm13 = vmmov %vm6043_vm1  ;;  %v6122_v11 = vld [vmem:[#allocation18_spill] sm:$0xff] }
  0x91   : > { %4254 = vmatprep.mubr.msk.bf16.mxu0 %vm6061_vm5, %v2682_v61  ;;  %vm6068_vm6 = vmmov %vm6043_vm1  ;;  %v2964_v12 = vld [vmem:[%s4682_s25 + $0x101] sm:$0xff]  ;;  %v2965_v61 = vld [vmem:[%s4682_s25 + $0x109] sm:$0xff] }
  0x92   : > { %vm6070_vm5 = vmmov %vm6069_vm0  ;;  %v5597_v2 = vpack.c.bf16 %v2965_v61, %v2964_v12  ;;  %v6154_v12 = vld [vmem:[#allocation14_spill] sm:$0xff] }
  0x97   : > { %4103 = vmatmul.mubr.msk.bf16.vlgmr.msra.gmra.mrb[0].mxu1 %vm6063_vm7, %v4929_v30  ;;  %v2685_v30 = vpack.c.bf16 %v5418_v58, %v2664_v23  ;;  %vm6072_vm7 = vmmov %vm6069_vm0  ;;  %v2966_v23 = vld [vmem:[%s4682_s25 + $0x111] sm:$0xff] }
  0x98   : > { %4135 = vmatpush3.bf16.msra.mxu1 %v1795_v35  ;;  %4255 = vmatmul.mubr.msk.bf16.gmra.mrb[16].mxu0 %vm6043_vm1, %v2683_v5  ;;  %vm6073_vm1 = vmmov %vm6069_vm0  ;;  %v3231_v5 = vld [vmem:[%s4682_s25 + $0x2a] sm:$0xff] }
  0x99   : > { %4106 = vmatprep.mubr.msk.bf16.mxu1 %vm6064_vm8, %v4941_v46  ;;  %4258 = vmatprep.mubr.msk.bf16.mxu0 %vm6065_vm3, %v2684_v25  ;;  %v5501_v46 = vld [vmem:[%s4682_s25 + $0x100] sm:$0xff]  ;;  %vm6074_vm8 = vmmov %vm6069_vm0  ;;  %v6125_v35 = vld [vmem:[#allocation23_spill] sm:$0xff] }
  0x9a   : > { %4601 = vmatprep.subr.msk.bf16.mxu1 %vm6066_vm4, %v4657_v1  ;;  %v2668_v1 = vsel %vm5399_vm15, %v5445_v13, 0.0  ;;  %v2670_v54 = vsel %vm5407_vm9, %v5501_v46, 0.0  ;;  %vm6075_vm3 = vmmov %vm6069_vm0  ;;  %v6127_v25 = vld [vmem:[#allocation38_spill] sm:$0xff]  ;;  %v1726_v4 = vsel %vm5440_vm14, %v5501_v46, 0.0 }
  0x9b   : > { %v2688_v18 = vpack.c.bf16 %v5511_v37, %v2670_v54  ;;  %vm6076_vm4 = vmmov %vm6069_vm0  ;;  %v1743_v6 = vpack.c.bf16 %v5511_v37, %v1726_v4  ;;  %v6167_v37 = vld [vmem:[#allocation19_spill] sm:$0xff] }
  0x9f   : > { %4107 = vmatmul.mubr.msk.bf16.gmra.mrb[4].mxu1 %vm6067_vm13, %v4944_v44  ;;  %v2687_v44 = vpack.c.bf16 %v5452_v62, %v2668_v1  ;;  %vm6077_vm13 = vmmov %vm6069_vm0  ;;  %v2983_v1 = vpack.c.bf16 %v2967_v7, %v2966_v23  ;;  %v2006_v23 = vld [vmem:[%s4682_s25 + $0x91] sm:$0xff]  ;;  %v2007_v7 = vld [vmem:[%s4682_s25 + $0x99] sm:$0xff] }
  0xa0   : > { %4259 = vmatmul.mubr.msk.bf16.gmra.mrb[20].mxu0 %vm6068_vm6, %v2685_v30  ;;  %4110 = vmatprep.mubr.msk.bf16.mxu1 %vm6069_vm0, %v4960_v63  ;;  %v2641_v63 = vld [vmem:[%s4682_s25 + $0x118] sm:$0xff]  ;;  %vm6078_vm6 = vmmov %vm6069_vm0  ;;  %vm6079_vm0 = vcmask 1041408   ;;  %v3230_v30 = vld [vmem:[%s4682_s25 + $0x22] sm:$0xff] }
  0xa1   : > { %4262 = vmatprep.mubr.msk.bf16.mxu0 %vm6070_vm5, %v2686_v10  ;;  %v2689_v34 = vpack.c.bf16 %v2641_v63, %v2672_v17  ;;  %vm6080_vm5 = vmmov %vm6073_vm1  ;;  %v3263_v10 = vsel %vm4751_vm2, %v3231_v5, 0.0  ;;  %v6133_v63 = vld [vmem:[#allocation40_spill] sm:$0xff]  ;;  %v6136_v17 = vld [vmem:[#allocation5_spill] sm:$0xff] }
  0xa2   : > { %v3294_v54 = vpack.c.bf16 %v3263_v10, %v3230_v30  ;;  %vm6137_vm2 = vnez %v6136_v17  ;;  %v3246_v30 = vld [vmem:[%s4682_s25 + $0xa2] sm:$0xff]  ;;  %v6162_v10 = vld [vmem:[#allocation16_spill] sm:$0xff] }
  0xa3   : > { %v3248_v17 = vld [vmem:[%s4682_s25 + $0xb2] sm:$0xff] }
  0xa7   : > { %4111 = vmatmul.mubr.msk.bf16.gmra.mrb[8].mxu1 %vm6071_vm12, %v4962_v0  ;;  %v3361_v0 = vsel %vm6079_vm0, %v5366_v9, 0  ;;  %vm6081_vm12 = vmmov %vm6073_vm1  ;;  %v6100_v9 = vld [vmem:[#allocation33_spill] sm:$0xff] }
  0xa8   : > { %4263 = vmatmul.mubr.msk.bf16.gmra.mrb[24].mxu0 %vm6072_vm7, %v2687_v44  ;;  %4114 = vmatprep.mubr.msk.bf16.mxu1 %vm6073_vm1, %v4988_v26  ;;  %vm6082_vm7 = vmmov %vm6073_vm1  ;;  %v6089_v26 = vld [vmem:[#allocation26_spill] sm:$0xff] }
  0xa9   : > { %4266 = vmatprep.mubr.msk.bf16.mxu0 %vm6074_vm8, %v2688_v18  ;;  %vm6083_vm8 = vmmov %vm6073_vm1  ;;  %v3233_v44 = vld [vmem:[%s4682_s25 + $0x3a] sm:$0xff]  ;;  %v6130_v18 = vld [vmem:[#allocation39_spill] sm:$0xff] }
  0xaa   : > { %vm6091_vm0 = vmmov %vm6073_vm1 }
  0xaf   : > { %4115 = vmatmul.mubr.msk.bf16.gmra.mrb[12].mxu1 %vm6075_vm3, %v4990_v55  ;;  %vm6084_vm3 = vmmov %vm6073_vm1 }
  0xb0   : > { %4267 = vmatmul.mubr.msk.bf16.gmra.mrb[28].mxu0 %vm6076_vm4, %v2689_v34  ;;  %4118 = vmatprep.mubr.msk.bf16.mxu1 %vm6077_vm13, %v5012_v41  ;;  %vm6085_vm4 = vmmov %vm6073_vm1  ;;  %v3265_v34 = vsel %vm6137_vm2, %v3233_v44, 0.0 }
  0xb1   : > { %4272 = vmatprep.mubr.msk.bf16.mxu0 %vm6078_vm6, %v4691_v15  ;;  %v1397_v15 = vsel %vm5158_vm11, %v5098_v22, 0.0  ;;  %vm6086_vm13 = vmmov %vm6073_vm1 }
  0xb2   : > { %v1415_v55 = vpack.c.bf16 %v1397_v15, %v6089_v26  ;;  %v6138_v15 = vld [vmem:[#allocation6_spill] sm:$0xff] }
  0xb7   : > { %4119 = vmatmul.mubr.msk.bf16.gmra.mrb[16].mxu1 %vm6080_vm5, %v5014_v59  ;;  %vm6093_vm5 = vmmov %vm6091_vm0  ;;  %v6096_v59 = vld [vmem:[#allocation35_spill] sm:$0xff] }
  0xb8   : > { %4273 = vmatmul.mubr.msk.bf16.vlgmr.msra.gmra.mrb[0].mxu0 %vm6081_vm12, %v4697_v19  ;;  %4122 = vmatprep.mubr.msk.bf16.mxu1 %vm6082_vm7, %v5025_v57  ;;  %v6087_v19 = vld [vmem:[#allocation29_spill] sm:$0xff]  ;;  %vm6094_vm12 = vmmov %vm6091_vm0  ;;  %vm6097_vm7 = vnez %v6096_v59 }
  0xb9   : > { %4305 = vmatpush3.bf16.msra.mxu0 %v3361_v0  ;;  %4276 = vmatprep.mubr.msk.bf16.mxu0 %vm6073_vm1, %v4727_v28  ;;  %vm6088_vm6 = vnez %v6087_v19  ;;  %vm6099_vm1 = vmmov %vm6091_vm0  ;;  %v3234_v0 = vld [vmem:[%s4682_s25 + $0x42] sm:$0xff] }
  0xba   : > { %v1399_v28 = vsel %vm6088_vm6, %v5163_v51, 0.0 }
  0xbf   : > { %4123 = vmatmul.mubr.msk.bf16.gmra.mrb[20].mxu1 %vm6083_vm8, %v5027_v8  ;;  %v6090_v8 = vld [vmem:[#allocation31_spill] sm:$0xff]  ;;  %vm6101_vm8 = vmmov %vm6091_vm0 }
  0xc0   : > { %4277 = vmatmul.mubr.msk.bf16.gmra.mrb[4].mxu0 %vm6084_vm3, %v4729_v29  ;;  %4126 = vmatprep.mubr.msk.bf16.mxu1 %vm6085_vm4, %v5034_v52  ;;  %v1416_v41 = vpack.c.bf16 %v1399_v28, %v6090_v8  ;;  %v6092_v29 = vld [vmem:[#allocation3_spill] sm:$0xff]  ;;  %v6095_v52 = vld [vmem:[#allocation30_spill] sm:$0xff]  ;;  %vm6103_vm3 = vmmov %vm6091_vm0 }
  0xc1   : > { %4280 = vmatprep.mubr.msk.bf16.mxu0 %vm6086_vm13, %v4744_v36  ;;  %v1401_v57 = vsel %vm6097_vm7, %v6095_v52, 0.0  ;;  %v6098_v36 = vld [vmem:[#allocation4_spill] sm:$0xff]  ;;  %vm6105_vm4 = vmmov %vm6091_vm0 }
  0xc2   : > { %v1417_v21 = vpack.c.bf16 %v1401_v57, %v6100_v9  ;;  %vm6107_vm13 = vmmov %vm6091_vm0  ;;  %v3239_v57 = vld [vmem:[%s4682_s25 + $0x6a] sm:$0xff] }
  0xc7   : > { %4127 = vmatmul.mubr.msk.bf16.gmra.mrb[24].mxu1 %vm6091_vm0, %v1415_v55  ;;  %v3295_v55 = vpack.c.bf16 %v3265_v34, %v3232_v39  ;;  %v2009_v39 = vld [vmem:[%s4682_s25 + $0xa9] sm:$0xff] }
  0xc8   : > { %4281 = vmatmul.mubr.msk.bf16.gmra.mrb[8].mxu0 %vm6093_vm5, %v6092_v29  ;;  %4130 = vmatprep.mubr.msk.bf16.mxu1 %vm6094_vm12, %v1416_v41  ;;  %vm6111_vm5 = vmmov %vm6091_vm0  ;;  %v3237_v29 = vld [vmem:[%s4682_s25 + $0x5a] sm:$0xff] }
  0xc9   : > { %4284 = vmatprep.mubr.msk.bf16.mxu0 %vm6099_vm1, %v6098_v36  ;;  %vm6113_vm12 = vmmov %vm6091_vm0  ;;  %v6142_v36 = vld [vmem:[#allocation41_spill] sm:$0xff] }
  0xca   : > { %vm6115_vm1 = vmmov %vm6091_vm0 }
  0xcf   : > { %4131 = vmatmul.mubr.msk.bf16.gmra.mrb[28].mxu1 %vm6101_vm8, %v1417_v21  ;;  %vm6117_vm8 = vmmov %vm6091_vm0  ;;  %v3236_v21 = vld [vmem:[%s4682_s25 + $0x52] sm:$0xff] }
  0xd0   : > { %4285 = vmatmul.mubr.msk.bf16.gmra.mrb[12].mxu0 %vm6103_vm3, %v6102_v47  ;;  %4136 = vmatprep.mubr.msk.bf16.mxu1 %vm6105_vm4, %v6104_v14  ;;  %vm6119_vm3 = vmmov %vm6091_vm0  ;;  %v6144_v47 = vld [vmem:[#allocation9_spill] sm:$0xff] }
  0xd1   : > { %4288 = vmatprep.mubr.msk.bf16.mxu0 %vm6107_vm13, %v6106_v43  ;;  %vm6121_vm4 = vmmov %vm6091_vm0  ;;  %v1720_v43 = vsel %vm5354_vm10, %v5404_v60, 0.0  ;;  %v3240_v60 = vld [vmem:[%s4682_s25 + $0x72] sm:$0xff] }
  0xd2   : > { %vm6123_vm13 = vmmov %vm6091_vm0 }
  0xd7   : > { %4137 = vmatmul.mubr.msk.bf16.vlgmr.msra.gmra.mrb[0].mxu1 %vm6091_vm0, %v6108_v48  ;;  %v3238_v48 = vld [vmem:[%s4682_s25 + $0x62] sm:$0xff] }
  0xd8   : > { %4339 = vmatpush3.bf16.msra.mxu1 %v6109_v45  ;;  %4289 = vmatmul.mubr.msk.bf16.gmra.mrb[16].mxu0 %vm6111_vm5, %v6110_v42  ;;  %vm6126_vm5 = vmmov %vm6091_vm0 }
  0xd9   : > { %4140 = vmatprep.mubr.msk.bf16.mxu1 %vm6113_vm12, %v6112_v38  ;;  %4292 = vmatprep.mubr.msk.bf16.mxu0 %vm6115_vm1, %v6114_v33  ;;  %vm6128_vm12 = vmmov %vm6091_vm0  ;;  %v1740_v38 = vpack.c.bf16 %v5418_v58, %v1720_v43  ;;  %v6152_v58 = vld [vmem:[#allocation13_spill] sm:$0xff] }
  0xda   : > { %vm6129_vm1 = vmmov %vm6091_vm0  ;;  %v6175_v43 = vld [vmem:[#allocation21_spill] sm:$0xff] }
  0xdb   : > { %vm6149_vm2 = vmmov %vm6129_vm1 }
  0xdf   : > { %4141 = vmatmul.mubr.msk.bf16.gmra.mrb[4].mxu1 %vm6117_vm8, %v6116_v20  ;;  %vm6131_vm8 = vmmov %vm6091_vm0  ;;  %v3241_v20 = vld [vmem:[%s4682_s25 + $0x7a] sm:$0xff] }
  0xe0   : > { %4293 = vmatmul.mubr.msk.bf16.gmra.mrb[20].mxu0 %vm6119_vm3, %v6118_v31  ;;  %4144 = vmatprep.mubr.msk.bf16.mxu1 %vm6121_vm4, %v6120_v27  ;;  %vm6132_vm3 = vmmov %vm6091_vm0  ;;  %v3243_v31 = vld [vmem:[%s4682_s25 + $0x8a] sm:$0xff] }
  0xe1   : > { %4296 = vmatprep.mubr.msk.bf16.mxu0 %vm6123_vm13, %v6122_v11  ;;  %vm6134_vm4 = vmmov %vm6091_vm0  ;;  %v3242_v11 = vld [vmem:[%s4682_s25 + $0x82] sm:$0xff] }
  0xe2   : > { %vm6135_vm13 = vmmov %vm6091_vm0 }
  0xe7   : > { %4145 = vmatmul.mubr.msk.bf16.gmra.mrb[8].mxu1 %vm6091_vm0, %v6124_v50  ;;  %vm6139_vm0 = vnez %v6138_v15  ;;  %v2011_v15 = vld [vmem:[%s4682_s25 + $0xb9] sm:$0xff] }
  0xe8   : > { %4297 = vmatmul.mubr.msk.bf16.gmra.mrb[24].mxu0 %vm6126_vm5, %v6125_v35  ;;  %4148 = vmatprep.mubr.msk.bf16.mxu1 %vm6128_vm12, %v6127_v25  ;;  %v3267_v28 = vsel %vm6139_vm0, %v3235_v49, 0.0  ;;  %vm6140_vm5 = vmmov %vm6129_vm1  ;;  %v3245_v35 = vld [vmem:[%s4682_s25 + $0x9a] sm:$0xff]  ;;  %v3247_v25 = vld [vmem:[%s4682_s25 + $0xaa] sm:$0xff] }
  0xe9   : > { %4300 = vmatprep.mubr.msk.bf16.mxu0 %vm6129_vm1, %v5597_v2  ;;  %v3296_v41 = vpack.c.bf16 %v3267_v28, %v3234_v0  ;;  %vm6141_vm12 = vmmov %vm6129_vm1  ;;  %v3251_v49 = vld [vmem:[%s4682_s25 + $0xca] sm:$0xff]  ;;  %v3250_v28 = vld [vmem:[%s4682_s25 + $0xc2] sm:$0xff] }
  0xea   : > { %vm6150_vm0 = vmmov %vm6129_vm1  ;;  %v2010_v0 = vld [vmem:[%s4682_s25 + $0xb1] sm:$0xff] }
  0xeb   : > { %vm6151_vm10 = vmmov %vm6150_vm0 }
  0xec   : > { %vm6156_vm15 = vmmov %vm6150_vm0 }
  0xed   : > { %vm6164_vm14 = vmmov %vm6150_vm0 }
  0xef   : > { %4149 = vmatmul.mubr.msk.bf16.gmra.mrb[12].mxu1 %vm6131_vm8, %v6130_v18  ;;  %vm6143_vm8 = vmmov %vm6129_vm1  ;;  %v3249_v18 = vld [vmem:[%s4682_s25 + $0xba] sm:$0xff] }
  0xf0   : > { %4301 = vmatmul.mubr.msk.bf16.gmra.mrb[28].mxu0 %vm6132_vm3, %v2983_v1  ;;  %4152 = vmatprep.mubr.msk.bf16.mxu1 %vm6134_vm4, %v6133_v63  ;;  %vm6145_vm3 = vnez %v6144_v47  ;;  %v2008_v63 = vld [vmem:[%s4682_s25 + $0xa1] sm:$0xff] }
  0xf1   : > { %4306 = vmatprep.mubr.msk.bf16.mxu0 %vm6135_vm13, %v3294_v54  ;;  %v3269_v14 = vsel %vm6145_vm3, %v3237_v29, 0.0  ;;  %vm6148_vm13 = vmmov %vm6129_vm1  ;;  %v2030_v54 = vpack.c.bf16 %v2007_v7, %v2006_v23  ;;  %v2031_v29 = vpack.c.bf16 %v2009_v39, %v2008_v63  ;;  %v2012_v47 = vld [vmem:[%s4682_s25 + $0xc1] sm:$0xff] }
  0xf2   : > { %v3297_v42 = vpack.c.bf16 %v3269_v14, %v3236_v21  ;;  %v2013_v14 = vld [vmem:[%s4682_s25 + $0xc9] sm:$0xff] }
  0xf7   : > { %4153 = vmatmul.mubr.msk.bf16.gmra.mrb[16].mxu1 %vm6140_vm5, %v5338_v56  ;;  %v6146_v56 = vld [vmem:[#allocation10_spill] sm:$0xff]  ;;  %vm6153_vm5 = vnez %v6152_v58 }
  0xf8   : > { %4307 = vmatmul.mubr.msk.bf16.vlgmr.msra.gmra.mrb[0].mxu0 %vm6141_vm12, %v3295_v55  ;;  %4156 = vmatprep.mubr.msk.bf16.mxu1 %vm6129_vm1, %v6142_v36  ;;  %vm6147_vm4 = vnez %v6146_v56  ;;  %v3273_v27 = vsel %vm6153_vm5, %v3241_v20, 0.0  ;;  %vm6155_vm12 = vnez %v6154_v12  ;;  %vm6157_vm1 = vmmov %vm6150_vm0  ;;  %v6169_v55 = vld [vmem:[#allocation20_spill] sm:$0xff]  ;;  %v2032_v36 = vpack.c.bf16 %v2011_v15, %v2010_v0  ;;  %v2019_v58 = vld [vmem:[%s4682_s25 + $0xf9] sm:$0xff] }
  0xf9   : > { %4310 = vmatprep.mubr.msk.bf16.mxu0 %vm6143_vm8, %v3296_v41  ;;  %v3271_v45 = vsel %vm6147_vm4, %v3239_v57, 0.0  ;;  %v3275_v61 = vsel %vm6155_vm12, %v3243_v31, 0.0  ;;  %v3299_v32 = vpack.c.bf16 %v3273_v27, %v3240_v60  ;;  %vm6159_vm8 = vmmov %vm6150_vm0  ;;  %vm6163_vm4 = vnez %v6162_v10  ;;  %v2014_v56 = vld [vmem:[%s4682_s25 + $0xd1] sm:$0xff]  ;;  %v2017_v60 = vld [vmem:[%s4682_s25 + $0xe9] sm:$0xff] }
  0xfa   : > { %v3298_v33 = vpack.c.bf16 %v3271_v45, %v3238_v48  ;;  %v3300_v5 = vpack.c.bf16 %v3275_v61, %v3242_v11  ;;  %v3279_v1 = vsel %vm6163_vm4, %v3247_v25, 0.0  ;;  %vm6170_vm5 = vnez %v6169_v55  ;;  %vm6171_vm12 = vmmov %vm6150_vm0  ;;  %v2015_v45 = vld [vmem:[%s4682_s25 + $0xd9] sm:$0xff]  ;;  %v6183_v27 = vld [vmem:[#allocation36_spill] sm:$0xff] }
  0xfb   : > { %v3302_v44 = vpack.c.bf16 %v3279_v1, %v3246_v30  ;;  %v3283_v41 = vsel %vm6170_vm5, %v3251_v49, 0.0  ;;  %v2034_v31 = vpack.c.bf16 %v2015_v45, %v2014_v56  ;;  %vm6179_vm4 = vmmov %vm6150_vm0  ;;  %v6184_v61 = vld [vmem:[#allocation37_spill] sm:$0xff] }
  0xfc   : > { %v3304_v21 = vpack.c.bf16 %v3283_v41, %v3250_v28  ;;  %vm6186_vm5 = vmmov %vm6150_vm0 }
  0xff   : > { %4157 = vmatmul.mubr.msk.bf16.gmra.mrb[20].mxu1 %vm6148_vm13, %v5395_v24  ;;  %v1724_v24 = vsel %vm5407_vm9, %v5445_v13, 0.0  ;;  %vm6158_vm9 = vmmov %vm6150_vm0  ;;  %v6160_v13 = vld [vmem:[#allocation15_spill] sm:$0xff] }
 0x100   : > { %4311 = vmatmul.mubr.msk.bf16.gmra.mrb[4].mxu0 %vm6149_vm2, %v3297_v42  ;;  %4160 = vmatprep.mubr.msk.bf16.mxu1 %vm6150_vm0, %v1740_v38  ;;  %v1742_v50 = vpack.c.bf16 %v5452_v62, %v1724_v24  ;;  %vm6161_vm3 = vnez %v6160_v13  ;;  %vm6165_vm13 = vmmov %vm6150_vm0  ;;  %v6177_v42 = vld [vmem:[#allocation22_spill] sm:$0xff] }
 0x101   : > { %4314 = vmatprep.mubr.msk.bf16.mxu0 %vm6151_vm10, %v3298_v33  ;;  %v3277_v62 = vsel %vm6161_vm3, %v3245_v35, 0.0  ;;  %vm6166_vm2 = vmmov %vm6150_vm0  ;;  %vm6168_vm10 = vnez %v6167_v37  ;;  %vm6178_vm3 = vnez %v6177_v42  ;;  %v2033_v33 = vpack.c.bf16 %v2013_v14, %v2012_v47 }
 0x102   : > { %v3301_v46 = vpack.c.bf16 %v3277_v62, %v3244_v53  ;;  %v3281_v34 = vsel %vm6168_vm10, %v3249_v18, 0.0  ;;  %v3287_v38 = vsel %vm6178_vm3, %v5163_v51, 0.0  ;;  %v3289_v51 = vsel %vm5158_vm11, %v6095_v52, 0.0  ;;  %vm6185_vm10 = vmmov %vm6150_vm0 }
 0x103   : > { %v3303_v57 = vpack.c.bf16 %v3281_v34, %v3248_v17  ;;  %v3306_v40 = vpack.c.bf16 %v3287_v38, %v6090_v8  ;;  %v3291_v8 = vsel %vm6088_vm6, %v6183_v27, 0.0  ;;  %v3307_v11 = vpack.c.bf16 %v3289_v51, %v6100_v9  ;;  %vm6187_vm11 = vmmov %vm6150_vm0 }
 0x104   : > { %vm6188_vm6 = vmmov %vm6150_vm0 }
 0x107   : > { %4161 = vmatmul.mubr.msk.bf16.gmra.mrb[24].mxu1 %vm6156_vm15, %v1741_v3  ;;  %vm6172_vm15 = vmmov %vm6150_vm0  ;;  %v3308_v3 = vpack.c.bf16 %v3291_v8, %v6184_v61 }
 0x108   : > { %4315 = vmatmul.mubr.msk.bf16.gmra.mrb[8].mxu0 %vm6157_vm1, %v3299_v32  ;;  %4164 = vmatprep.mubr.msk.bf16.mxu1 %vm6158_vm9, %v1742_v50  ;;  %vm6173_vm1 = vmmov %vm6150_vm0  ;;  %v3261_v32 = vld [vmem:[%s4682_s25 + $0x11a] sm:$0xff] }
 0x109   : > { %4318 = vmatprep.mubr.msk.bf16.mxu0 %vm6159_vm8, %v3300_v5  ;;  %vm6174_vm9 = vmmov %vm6150_vm0  ;;  %vm6176_vm8 = vnez %v6175_v43  ;;  %v3293_v19 = vsel %vm6097_vm7, %v3261_v32, 0.0  ;;  %vm3627_vm7 = vcmask 261120  }
 0x10a   : > { %v3285_v48 = vsel %vm6176_vm8, %v5098_v22, 0.0  ;;  %v2016_v22 = vld [vmem:[%s4682_s25 + $0xe1] sm:$0xff]  ;;  %v3309_v52 = vpack.c.bf16 %v3293_v19, %v3260_v16 }
 0x10b   : > { %v3305_v20 = vpack.c.bf16 %v3285_v48, %v6089_v26  ;;  %v2018_v26 = vld [vmem:[%s4682_s25 + $0xf1] sm:$0xff]  ;;  %v2035_v24 = vpack.c.bf16 %v2017_v60, %v2016_v22 }
 0x10c   : > { %v2036_v12 = vpack.c.bf16 %v2019_v58, %v2018_v26 }
 0x10f   : > { %4165 = vmatmul.mubr.msk.bf16.gmra.mrb[28].mxu1 %vm6164_vm14, %v1743_v6  ;;  %vm6180_vm14 = vmmov %vm6150_vm0 }
 0x110   : > { %4319 = vmatmul.mubr.msk.bf16.gmra.mrb[12].mxu0 %vm6165_vm13, %v3301_v46  ;;  %4186 = vmatprep.mubr.msk.bf16.mxu1 %vm6166_vm2, %v2030_v54  ;;  %vm6181_vm13 = vmmov %vm6150_vm0  ;;  %v5754_v46 = vld [vmem:[%s5867_s2] ss:$0 sm:$0xff] }
 0x111   : > { %4322 = vmatprep.mubr.msk.bf16.mxu0 %vm6150_vm0, %v3302_v44  ;;  %vm6182_vm2 = vmmov %vm6150_vm0 }
 0x117   : > { %4187 = vmatmul.mubr.msk.bf16.vlgmr.msra.gmra.mrb[16].mxu1 %vm6171_vm12, %v2031_v29  ;;  %vm6189_vm12 = vmmov %vm6150_vm0 }
 0x118   : > { %4323 = vmatmul.mubr.msk.bf16.gmra.mrb[16].mxu0 %vm6172_vm15, %v3303_v57  ;;  %4190 = vmatprep.mubr.msk.bf16.mxu1 %vm6173_vm1, %v2032_v36 }
 0x119   : > { %4326 = vmatprep.mubr.msk.bf16.mxu0 %vm6174_vm9, %v3304_v21 }
 0x11f   : > { %4191 = vmatmul.mubr.msk.bf16.gmra.mrb[20].mxu1 %vm6179_vm4, %v2033_v33 }
 0x120   : > { %4327 = vmatmul.mubr.msk.bf16.gmra.mrb[20].mxu0 %vm6180_vm14, %v3305_v20  ;;  %4194 = vmatprep.mubr.msk.bf16.mxu1 %vm6181_vm13, %v2034_v31 }
 0x121   : > { %4330 = vmatprep.mubr.msk.bf16.mxu0 %vm6182_vm2, %v3306_v40 }
 0x127   : > { %4195 = vmatmul.mubr.msk.bf16.gmra.mrb[24].mxu1 %vm6150_vm0, %v2035_v24 }
 0x128   : > { %4331 = vmatmul.mubr.msk.bf16.gmra.mrb[24].mxu0 %vm6185_vm10, %v3307_v11  ;;  %4198 = vmatprep.mubr.msk.bf16.mxu1 %vm6186_vm5, %v2036_v12 }
 0x129   : > { %4334 = vmatprep.mubr.msk.bf16.mxu0 %vm6187_vm11, %v3308_v3 }
 0x12f   : > { %4199 = vmatmul.mubr.msk.bf16.gmra.mrb[28].mxu1 %vm6188_vm6, %v5597_v2 }
 0x130   : > { %4335 = vmatmul.mubr.msk.bf16.gmra.mrb[28].mxu0 %vm6189_vm12, %v3309_v52 }
 0x1aa   : > { %v4138_v9 = vpop.f32.mrb[0].mxu1 }
 0x1ab   : > { %v1831_v50 = vpop.f32.mrb[1].mxu1 }
 0x1ac   : > { %v4139_v5 = vpop.f32.mrb[2].mxu1 }
 0x1ad   : > { %v1834_v35 = vpop.f32.mrb[3].mxu1 }
 0x1b2   : > { %v4142_v25 = vpop.f32.mrb[4].mxu1 }
 0x1b3   : > { %v1847_v4 = vpop.f32.mrb[5].mxu1 }
 0x1b4   : > { %v4143_v53 = vpop.f32.mrb[6].mxu1 }
 0x1b5   : > { %v1850_v13 = vpop.f32.mrb[7].mxu1 }
 0x1ba   : > { %v4146_v62 = vpop.f32.mrb[8].mxu1 }
 0x1bb   : > { %v1863_v23 = vpop.f32.mrb[9].mxu1 }
 0x1bc   : > { %v4147_v7 = vpop.f32.mrb[10].mxu1 }
 0x1bd   : > { %v1866_v59 = vpop.f32.mrb[11].mxu1 }
 0x1c2   : > { %v5743_v30 = vpop.f32.mrb[12].mxu1 }
 0x1c3   : > { %v5745_v10 = vpop.f32.mrb[13].mxu1 }
 0x1c4   : > { %v5747_v2 = vpop.f32.mrb[14].mxu1 }
 0x1c5   : > { %v5749_v1 = vpop.f32.mrb[15].mxu1 }
 0x1cb   : > { %v4308_v6 = vpop.f32.mrb[0].mxu0 }
 0x1cc   : > { %v4340_v54 = vadd.f32 %v4308_v6, %v4138_v9  ;;  %v3397_v44 = vpop.f32.mrb[1].mxu0 }
 0x1cd   : > { %v4341_v18 = vadd.f32 %v3397_v44, %v1831_v50  ;;  %v4309_v49 = vpop.f32.mrb[2].mxu0 }
 0x1ce   : > { %v3565_v63 = vadd.f32 %v4340_v54, %v5754_v46  ;;  %v4342_v39 = vadd.f32 %v4309_v49, %v4139_v5  ;;  %v3400_v17 = vpop.f32.mrb[3].mxu0 }
 0x1cf   : > { %v3563_v37 = vadd.f32 %v4341_v18, %v5754_v46  ;;  %v4343_v34 = vadd.f32 %v3400_v17, %v1834_v35 }
 0x1d0   : > { %v3597_v0 = vmax.f32 %v3565_v63, 0.0  ;;  %v3566_v15 = vadd.f32 %v4342_v39, %v5754_v46 }
 0x1d1   : > { %v3595_v28 = vmax.f32 %v3563_v37, 0.0  ;;  %v3564_v55 = vadd.f32 %v4343_v34, %v5754_v46 }
 0x1d2   : > { %3630 = vst.msk [vmem:[%s5761_s16 + $0x10] sm:$0xff] %vm3627_vm7, %v3597_v0  ;;  %v3598_v41 = vmax.f32 %v3566_v15, 0.0 }
 0x1d3   : > { %3628 = vst.msk [vmem:[%s5761_s16] sm:$0xff] %vm3627_vm7, %v3595_v28  ;;  %v3596_v29 = vmax.f32 %v3564_v55, 0.0  ;;  %v4312_v57 = vpop.f32.mrb[4].mxu0 }
 0x1d4   : > { %3631 = vst.msk [vmem:[%s5761_s16 + $0x18] sm:$0xff] %vm3627_vm7, %v3598_v41  ;;  %v4344_v36 = vadd.f32 %v4312_v57, %v4142_v25  ;;  %v3413_v21 = vpop.f32.mrb[5].mxu0 }
 0x1d5   : > { %3629 = vst.msk [vmem:[%s5761_s16 + $0x8] sm:$0xff] %vm3627_vm7, %v3596_v29  ;;  %v4345_v47 = vadd.f32 %v3413_v21, %v1847_v4  ;;  %v4313_v14 = vpop.f32.mrb[6].mxu0 }
 0x1d6   : > { %v3569_v43 = vadd.f32 %v4344_v36, %v5754_v46  ;;  %v4346_v48 = vadd.f32 %v4313_v14, %v4143_v53  ;;  %v3416_v56 = vpop.f32.mrb[7].mxu0 }
 0x1d7   : > { %v3567_v45 = vadd.f32 %v4345_v47, %v5754_v46  ;;  %v4347_v42 = vadd.f32 %v3416_v56, %v1850_v13 }
 0x1d8   : > { %v3601_v38 = vmax.f32 %v3569_v43, 0.0  ;;  %v3570_v33 = vadd.f32 %v4346_v48, %v5754_v46 }
 0x1d9   : > { %v3599_v20 = vmax.f32 %v3567_v45, 0.0  ;;  %v3568_v31 = vadd.f32 %v4347_v42, %v5754_v46 }
 0x1da   : > { %3634 = vst.msk [vmem:[%s5761_s16 + $0x30] sm:$0xff] %vm3627_vm7, %v3601_v38  ;;  %v3602_v40 = vmax.f32 %v3570_v33, 0.0 }
 0x1db   : > { %3632 = vst.msk [vmem:[%s5761_s16 + $0x20] sm:$0xff] %vm3627_vm7, %v3599_v20  ;;  %v3600_v22 = vmax.f32 %v3568_v31, 0.0  ;;  %v4316_v60 = vpop.f32.mrb[8].mxu0 }
 0x1dc   : > { %3635 = vst.msk [vmem:[%s5761_s16 + $0x38] sm:$0xff] %vm3627_vm7, %v3602_v40  ;;  %v4348_v51 = vadd.f32 %v4316_v60, %v4146_v62  ;;  %v3429_v26 = vpop.f32.mrb[9].mxu0 }
 0x1dd   : > { %3633 = vst.msk [vmem:[%s5761_s16 + $0x28] sm:$0xff] %vm3627_vm7, %v3600_v22  ;;  %v4349_v58 = vadd.f32 %v3429_v26, %v1863_v23  ;;  %v4317_v27 = vpop.f32.mrb[10].mxu0 }
 0x1de   : > { %v3573_v8 = vadd.f32 %v4348_v51, %v5754_v46  ;;  %v4350_v24 = vadd.f32 %v4317_v27, %v4147_v7  ;;  %v3432_v11 = vpop.f32.mrb[11].mxu0 }
 0x1df   : > { %v3571_v12 = vadd.f32 %v4349_v58, %v5754_v46  ;;  %v4351_v61 = vadd.f32 %v3432_v11, %v1866_v59 }
 0x1e0   : > { %v3605_v3 = vmax.f32 %v3573_v8, 0.0  ;;  %v3574_v32 = vadd.f32 %v4350_v24, %v5754_v46 }
 0x1e1   : > { %v3603_v16 = vmax.f32 %v3571_v12, 0.0  ;;  %v3572_v19 = vadd.f32 %v4351_v61, %v5754_v46 }
 0x1e2   : > { %3638 = vst.msk [vmem:[%s5761_s16 + $0x50] sm:$0xff] %vm3627_vm7, %v3605_v3  ;;  %v3606_v52 = vmax.f32 %v3574_v32, 0.0 }
 0x1e3   : > { %3636 = vst.msk [vmem:[%s5761_s16 + $0x40] sm:$0xff] %vm3627_vm7, %v3603_v16  ;;  %v3604_v9 = vmax.f32 %v3572_v19, 0.0  ;;  %v4320_v50 = vpop.f32.mrb[12].mxu0 }
 0x1e4   : > { %3639 = vst.msk [vmem:[%s5761_s16 + $0x58] sm:$0xff] %vm3627_vm7, %v3606_v52  ;;  %v4352_v5 = vadd.f32 %v4320_v50, %v5743_v30  ;;  %v3445_v35 = vpop.f32.mrb[13].mxu0 }
 0x1e5   : > { %3637 = vst.msk [vmem:[%s5761_s16 + $0x48] sm:$0xff] %vm3627_vm7, %v3604_v9  ;;  %v4353_v25 = vadd.f32 %v3445_v35, %v5745_v10  ;;  %v4321_v4 = vpop.f32.mrb[14].mxu0 }
 0x1e6   : > { %v3577_v53 = vadd.f32 %v4352_v5, %v5754_v46  ;;  %v4354_v13 = vadd.f32 %v4321_v4, %v5747_v2  ;;  %v3448_v62 = vpop.f32.mrb[15].mxu0 }
 0x1e7   : > { %v3575_v23 = vadd.f32 %v4353_v25, %v5754_v46  ;;  %v4355_v7 = vadd.f32 %v3448_v62, %v5749_v1 }
 0x1e8   : > { %v3609_v59 = vmax.f32 %v3577_v53, 0.0  ;;  %v3578_v30 = vadd.f32 %v4354_v13, %v5754_v46 }
 0x1e9   : > { %v3607_v6 = vmax.f32 %v3575_v23, 0.0  ;;  %v3576_v54 = vadd.f32 %v4355_v7, %v5754_v46 }
 0x1ea   : > { %3642 = vst.msk [vmem:[%s5761_s16 + $0x70] sm:$0xff] %vm3627_vm7, %v3609_v59  ;;  %v3610_v10 = vmax.f32 %v3578_v30, 0.0  ;;  %v4188_v44 = vpop.f32.mrb[16].mxu1 }
 0x1eb   : > { %3640 = vst.msk [vmem:[%s5761_s16 + $0x60] sm:$0xff] %vm3627_vm7, %v3607_v6  ;;  %v3608_v18 = vmax.f32 %v3576_v54, 0.0  ;;  %v4324_v2 = vpop.f32.mrb[16].mxu0  ;;  %v2189_v49 = vpop.f32.mrb[17].mxu1 }
 0x1ec   : > { %3643 = vst.msk [vmem:[%s5761_s16 + $0x78] sm:$0xff] %vm3627_vm7, %v3610_v10  ;;  %v4356_v63 = vadd.f32 %v4324_v2, %v4188_v44  ;;  %v3461_v1 = vpop.f32.mrb[17].mxu0  ;;  %v4189_v39 = vpop.f32.mrb[18].mxu1 }
 0x1ed   : > { %3641 = vst.msk [vmem:[%s5761_s16 + $0x68] sm:$0xff] %vm3627_vm7, %v3608_v18  ;;  %v4357_v17 = vadd.f32 %v3461_v1, %v2189_v49  ;;  %v4325_v37 = vpop.f32.mrb[18].mxu0  ;;  %v2192_v34 = vpop.f32.mrb[19].mxu1 }
 0x1ee   : > { %v3581_v0 = vadd.f32 %v4356_v63, %v5754_v46  ;;  %v4358_v15 = vadd.f32 %v4325_v37, %v4189_v39  ;;  %v3464_v28 = vpop.f32.mrb[19].mxu0 }
 0x1ef   : > { %v3579_v55 = vadd.f32 %v4357_v17, %v5754_v46  ;;  %v4359_v41 = vadd.f32 %v3464_v28, %v2192_v34 }
 0x1f0   : > { %v3613_v29 = vmax.f32 %v3581_v0, 0.0  ;;  %v3582_v57 = vadd.f32 %v4358_v15, %v5754_v46 }
 0x1f1   : > { %v3611_v36 = vmax.f32 %v3579_v55, 0.0  ;;  %v3580_v21 = vadd.f32 %v4359_v41, %v5754_v46 }
 0x1f2   : > { %3646 = vst.msk [vmem:[%s5761_s16 + $0x90] sm:$0xff] %vm3627_vm7, %v3613_v29  ;;  %v3614_v47 = vmax.f32 %v3582_v57, 0.0  ;;  %v4192_v14 = vpop.f32.mrb[20].mxu1 }
 0x1f3   : > { %3644 = vst.msk [vmem:[%s5761_s16 + $0x80] sm:$0xff] %vm3627_vm7, %v3611_v36  ;;  %v3612_v43 = vmax.f32 %v3580_v21, 0.0  ;;  %v4328_v48 = vpop.f32.mrb[20].mxu0  ;;  %v2205_v56 = vpop.f32.mrb[21].mxu1 }
 0x1f4   : > { %3647 = vst.msk [vmem:[%s5761_s16 + $0x98] sm:$0xff] %vm3627_vm7, %v3614_v47  ;;  %v4360_v45 = vadd.f32 %v4328_v48, %v4192_v14  ;;  %v3477_v42 = vpop.f32.mrb[21].mxu0  ;;  %v4193_v38 = vpop.f32.mrb[22].mxu1 }
 0x1f5   : > { %3645 = vst.msk [vmem:[%s5761_s16 + $0x88] sm:$0xff] %vm3627_vm7, %v3612_v43  ;;  %v4361_v33 = vadd.f32 %v3477_v42, %v2205_v56  ;;  %v4329_v20 = vpop.f32.mrb[22].mxu0  ;;  %v2208_v31 = vpop.f32.mrb[23].mxu1 }
 0x1f6   : > { %v3585_v40 = vadd.f32 %v4360_v45, %v5754_v46  ;;  %v4362_v22 = vadd.f32 %v4329_v20, %v4193_v38  ;;  %v3480_v60 = vpop.f32.mrb[23].mxu0 }
 0x1f7   : > { %v3583_v51 = vadd.f32 %v4361_v33, %v5754_v46  ;;  %v4363_v26 = vadd.f32 %v3480_v60, %v2208_v31 }
 0x1f8   : > { %v3617_v58 = vmax.f32 %v3585_v40, 0.0  ;;  %v3586_v27 = vadd.f32 %v4362_v22, %v5754_v46 }
 0x1f9   : > { %v3615_v8 = vmax.f32 %v3583_v51, 0.0  ;;  %v3584_v24 = vadd.f32 %v4363_v26, %v5754_v46 }
 0x1fa   : > { %3650 = vst.msk [vmem:[%s5761_s16 + $0xb0] sm:$0xff] %vm3627_vm7, %v3617_v58  ;;  %v3618_v11 = vmax.f32 %v3586_v27, 0.0  ;;  %v4196_v12 = vpop.f32.mrb[24].mxu1 }
 0x1fb   : > { %3648 = vst.msk [vmem:[%s5761_s16 + $0xa0] sm:$0xff] %vm3627_vm7, %v3615_v8  ;;  %v3616_v61 = vmax.f32 %v3584_v24, 0.0  ;;  %v4332_v3 = vpop.f32.mrb[24].mxu0  ;;  %v2221_v32 = vpop.f32.mrb[25].mxu1 }
 0x1fc   : > { %3651 = vst.msk [vmem:[%s5761_s16 + $0xb8] sm:$0xff] %vm3627_vm7, %v3618_v11  ;;  %v4364_v16 = vadd.f32 %v4332_v3, %v4196_v12  ;;  %v3493_v19 = vpop.f32.mrb[25].mxu0  ;;  %v4197_v52 = vpop.f32.mrb[26].mxu1 }
 0x1fd   : > { %3649 = vst.msk [vmem:[%s5761_s16 + $0xa8] sm:$0xff] %vm3627_vm7, %v3616_v61  ;;  %v4365_v9 = vadd.f32 %v3493_v19, %v2221_v32  ;;  %v4333_v50 = vpop.f32.mrb[26].mxu0  ;;  %v2224_v5 = vpop.f32.mrb[27].mxu1 }
 0x1fe   : > { %v3589_v35 = vadd.f32 %v4364_v16, %v5754_v46  ;;  %v4366_v25 = vadd.f32 %v4333_v50, %v4197_v52  ;;  %v3496_v4 = vpop.f32.mrb[27].mxu0 }
 0x1ff   : > { %v3587_v53 = vadd.f32 %v4365_v9, %v5754_v46  ;;  %v4367_v13 = vadd.f32 %v3496_v4, %v2224_v5 }
 0x200   : > { %v3621_v62 = vmax.f32 %v3589_v35, 0.0  ;;  %v3590_v23 = vadd.f32 %v4366_v25, %v5754_v46 }
 0x201   : > { %v3619_v7 = vmax.f32 %v3587_v53, 0.0  ;;  %v3588_v59 = vadd.f32 %v4367_v13, %v5754_v46 }
 0x202   : > { %3654 = vst.msk [vmem:[%s5761_s16 + $0xd0] sm:$0xff] %vm3627_vm7, %v3621_v62  ;;  %v3622_v30 = vmax.f32 %v3590_v23, 0.0  ;;  %v4200_v6 = vpop.f32.mrb[28].mxu1 }
 0x203   : > { %3652 = vst.msk [vmem:[%s5761_s16 + $0xc0] sm:$0xff] %vm3627_vm7, %v3619_v7  ;;  %v3620_v54 = vmax.f32 %v3588_v59, 0.0  ;;  %v4336_v10 = vpop.f32.mrb[28].mxu0  ;;  %v2237_v44 = vpop.f32.mrb[29].mxu1 }
 0x204   : > { %3655 = vst.msk [vmem:[%s5761_s16 + $0xd8] sm:$0xff] %vm3627_vm7, %v3622_v30  ;;  %v4368_v18 = vadd.f32 %v4336_v10, %v4200_v6  ;;  %v3509_v2 = vpop.f32.mrb[29].mxu0  ;;  %v4201_v49 = vpop.f32.mrb[30].mxu1 }
 0x205   : > { %3653 = vst.msk [vmem:[%s5761_s16 + $0xc8] sm:$0xff] %vm3627_vm7, %v3620_v54  ;;  %v4369_v63 = vadd.f32 %v3509_v2, %v2237_v44  ;;  %v4337_v1 = vpop.f32.mrb[30].mxu0  ;;  %v2240_v39 = vpop.f32.mrb[31].mxu1 }
 0x206   : > { %v3593_v17 = vadd.f32 %v4368_v18, %v5754_v46  ;;  %v4370_v37 = vadd.f32 %v4337_v1, %v4201_v49  ;;  %v3512_v34 = vpop.f32.mrb[31].mxu0 }
 0x207   : > { %v3591_v0 = vadd.f32 %v4369_v63, %v5754_v46  ;;  %v4371_v15 = vadd.f32 %v3512_v34, %v2240_v39 }
 0x208   : > { %v3625_v28 = vmax.f32 %v3593_v17, 0.0  ;;  %v3594_v55 = vadd.f32 %v4370_v37, %v5754_v46 }
 0x209   : > { %v3623_v41 = vmax.f32 %v3591_v0, 0.0  ;;  %v3592_v29 = vadd.f32 %v4371_v15, %v5754_v46 }
 0x20a   : > { %3658 = vst.msk [vmem:[%s5761_s16 + $0xf0] sm:$0xff] %vm3627_vm7, %v3625_v28  ;;  %v3626_v57 = vmax.f32 %v3594_v55, 0.0 }
 0x20b   : > { %3656 = vst.msk [vmem:[%s5761_s16 + $0xe0] sm:$0xff] %vm3627_vm7, %v3623_v41  ;;  %v3624_v36 = vmax.f32 %v3592_v29, 0.0 }
 0x20c   : > { %3659 = vst.msk [vmem:[%s5761_s16 + $0xf8] sm:$0xff] %vm3627_vm7, %v3626_v57 }
 0x20d   : > { %3657 = vst.msk [vmem:[%s5761_s16 + $0xe8] sm:$0xff] %vm3627_vm7, %v3624_v36 }
 0x20e PF: > { %s13_s12 = sadd.s32 1, %s4621_s12  }
 0x20f   : > { %p10_p4 = scmp.ge.s32.totalorder %s13_s12, 4  }
 0x211   :  { %12 = sbr.rel (!%p10_p4) target bundleno = 1 (0x1), region = 70 }

// kernel: simple_encoder_decoder.9
= control target key start
LH: loop header
LB: loop body
LE: loop exit
PB: predicated region body
PF: predicated region fallthrough
CT: control target
= control target key end

     0   :  { %v301_v1 = vmov 0   ;;  %v37_v19 = vlaneseq  ;;  %s391_s1 = inlined_call_operand.vmem [shape: bf16[128,256], index: 1, kind: input, shape index: {}]   ;;  %s392_s0 = inlined_call_operand.vmem [shape: bf16[32,128], index: 0, kind: input, shape index: {}]   ;;  %s393_s2 = inlined_call_operand.vmem [shape: f32[1,256], index: 2, kind: input, shape index: {}]   ;;  %s394_s3 = inlined_call_operand.vmem [shape: bf16[32,256], index: 3, kind: output, shape index: {}]  }
   0x1   :  { %v275_v0 = vld [vmem:[%s391_s1 + $0x4] ss:$8 sps:$4 sm:$0xff]   ;;  %171 = vmatprep.mubr.bf16.mxu0 %v301_v1  ;;  %181 = vmatprep.mubr.bf16.mxu1 %v301_v1  ;;  %v277_v2 = vld [vmem:[%s391_s1] ss:$8 sps:$4 sm:$0xff]   ;;  %v278_v3 = vld [vmem:[%s391_s1 + $0x14] ss:$8 sps:$4 sm:$0xff]  }
   0x2   :  { %139 = vmatprep.subr.bf16.mxu0 %v275_v0  ;;  %258 = vmatprep.subr.bf16.mxu1 %v275_v0  ;;  %v280_v4 = vld [vmem:[%s391_s1 + $0x10] ss:$8 sps:$4 sm:$0xff]   ;;  %v281_v5 = vld [vmem:[%s391_s1 + $0x24] ss:$8 sps:$4 sm:$0xff]   ;;  %v283_v6 = vld [vmem:[%s391_s1 + $0x20] ss:$8 sps:$4 sm:$0xff]  }
   0x3   :  { %140 = vmatpush1.bf16.msra.mxu0 %v277_v2  ;;  %266 = vmatpush1.bf16.msra.mxu1 %v277_v2  ;;  %v284_v7 = vld [vmem:[%s391_s1 + $0x34] ss:$8 sps:$4 sm:$0xff]   ;;  %v286_v8 = vld [vmem:[%s391_s1 + $0x30] ss:$8 sps:$4 sm:$0xff]   ;;  %v287_v9 = vld [vmem:[%s391_s1 + $0x44] ss:$8 sps:$4 sm:$0xff]  }
   0x4   :  { %141 = vmatprep.subr.bf16.mxu0 %v278_v3  ;;  %259 = vmatprep.subr.bf16.mxu1 %v278_v3  ;;  %v289_v10 = vld [vmem:[%s391_s1 + $0x40] ss:$8 sps:$4 sm:$0xff]   ;;  %v290_v11 = vld [vmem:[%s391_s1 + $0x54] ss:$8 sps:$4 sm:$0xff]   ;;  %v292_v12 = vld [vmem:[%s391_s1 + $0x50] ss:$8 sps:$4 sm:$0xff]  }
   0x5   :  { %v293_v13 = vld [vmem:[%s391_s1 + $0x64] ss:$8 sps:$4 sm:$0xff]   ;;  %v295_v14 = vld [vmem:[%s391_s1 + $0x60] ss:$8 sps:$4 sm:$0xff]   ;;  %v296_v15 = vld [vmem:[%s391_s1 + $0x74] ss:$8 sps:$4 sm:$0xff]  }
   0x6   :  { %v298_v16 = vld [vmem:[%s391_s1 + $0x70] ss:$8 sps:$4 sm:$0xff]   ;;  %v299_v17 = vld [vmem:[%s392_s0] sm:$0xff]   ;;  %v300_v18 = vld [vmem:[%s392_s0 + $0x8] sm:$0xff]   ;;  %v38_v20 = vshrl.u32 %v37_v19, 7 }
   0x7   :  { %142 = vmatpush1.bf16.msra.mxu0 %v280_v4  ;;  %267 = vmatpush1.bf16.msra.mxu1 %v280_v4  ;;  %v35_v22 = vld [vmem:[%s393_s2] sm:$0x3] }
   0x8   :  { %143 = vmatprep.subr.bf16.mxu0 %v281_v5  ;;  %260 = vmatprep.subr.bf16.mxu1 %v281_v5  ;;  %v39_v21 = vsub.s32 0, %v38_v20  ;;  %v43_v23 = vsub.s32 1, %v38_v20 }
   0xa   :  { %v40_v24 = vrot.slane %v35_v22, %v39_v21  ;;  %v44_v25 = vrot.slane %v35_v22, %v43_v23 }
   0xb   :  { %144 = vmatpush1.bf16.msra.mxu0 %v283_v6  ;;  %268 = vmatpush1.bf16.msra.mxu1 %v283_v6 }
   0xc   :  { %145 = vmatprep.subr.bf16.mxu0 %v284_v7  ;;  %261 = vmatprep.subr.bf16.mxu1 %v284_v7 }
   0xf   :  { %146 = vmatpush1.bf16.msra.mxu0 %v286_v8  ;;  %269 = vmatpush1.bf16.msra.mxu1 %v286_v8 }
  0x10   :  { %147 = vmatprep.subr.bf16.mxu0 %v287_v9  ;;  %262 = vmatprep.subr.bf16.mxu1 %v287_v9 }
  0x13   :  { %148 = vmatpush1.bf16.msra.mxu0 %v289_v10  ;;  %270 = vmatpush1.bf16.msra.mxu1 %v289_v10 }
  0x14   :  { %149 = vmatprep.subr.bf16.mxu0 %v290_v11  ;;  %263 = vmatprep.subr.bf16.mxu1 %v290_v11 }
  0x17   :  { %150 = vmatpush1.bf16.msra.mxu0 %v292_v12  ;;  %271 = vmatpush1.bf16.msra.mxu1 %v292_v12 }
  0x18   :  { %151 = vmatprep.subr.bf16.mxu0 %v293_v13  ;;  %264 = vmatprep.subr.bf16.mxu1 %v293_v13 }
  0x1b   :  { %152 = vmatpush1.bf16.msra.mxu0 %v295_v14  ;;  %272 = vmatpush1.bf16.msra.mxu1 %v295_v14 }
  0x1c   :  { %153 = vmatprep.subr.bf16.mxu0 %v296_v15  ;;  %265 = vmatprep.subr.bf16.mxu1 %v296_v15 }
  0x1f   :  { %154 = vmatpush1.bf16.msra.mxu0 %v298_v16  ;;  %273 = vmatpush1.bf16.msra.mxu1 %v298_v16 }
  0x22   :  { %172 = vmatmul.mubr.bf16.vlgmr.msra.gmra.mrb[0].mxu0 %v299_v17  ;;  %182 = vmatmul.mubr.bf16.vlgmr.msra.gmra.mrb[0].mxu1 %v300_v18 }
  0xf5   :  { %v173_v26 = vpop.f32.mrb[0].mxu0  ;;  %v183_v27 = vpop.f32.mrb[0].mxu1 }
  0xf6   :  { %v174_v28 = vadd.f32 %v173_v26, %v40_v24  ;;  %v184_v29 = vadd.f32 %v183_v27, %v40_v24  ;;  %v175_v30 = vpop.f32.mrb[1].mxu0  ;;  %v185_v31 = vpop.f32.mrb[1].mxu1 }
  0xf7   :  { %v176_v32 = vadd.f32 %v175_v30, %v44_v25  ;;  %v186_v33 = vadd.f32 %v185_v31, %v44_v25  ;;  %v177_v34 = vpop.f32.mrb[2].mxu0  ;;  %v187_v35 = vpop.f32.mrb[2].mxu1 }
  0xf8   :  { %v192_v36 = vmax.f32 %v174_v28, 0.0  ;;  %v196_v37 = vmax.f32 %v184_v29, 0.0  ;;  %v178_v38 = vadd.f32 %v177_v34, %v40_v24  ;;  %v188_v39 = vadd.f32 %v187_v35, %v40_v24  ;;  %v179_v40 = vpop.f32.mrb[3].mxu0  ;;  %v189_v41 = vpop.f32.mrb[3].mxu1 }
  0xf9   :  { %v193_v42 = vmax.f32 %v176_v32, 0.0  ;;  %v197_v43 = vmax.f32 %v186_v33, 0.0  ;;  %v180_v44 = vadd.f32 %v179_v40, %v44_v25  ;;  %v190_v45 = vadd.f32 %v189_v41, %v44_v25 }
  0xfa   :  { %v194_v46 = vmax.f32 %v178_v38, 0.0  ;;  %v198_v47 = vmax.f32 %v188_v39, 0.0 }
  0xfb   :  { %v254_v48 = vpack.c.bf16 %v193_v42, %v192_v36  ;;  %v256_v49 = vpack.c.bf16 %v197_v43, %v196_v37  ;;  %v195_v50 = vmax.f32 %v180_v44, 0.0  ;;  %v199_v51 = vmax.f32 %v190_v45, 0.0 }
  0xfd   :  { %224 = vst [vmem:[%s394_s3] sm:$0xff] %v254_v48  ;;  %226 = vst [vmem:[%s394_s3 + $0x10] sm:$0xff] %v256_v49  ;;  %v255_v52 = vpack.c.bf16 %v195_v50, %v194_v46  ;;  %v257_v53 = vpack.c.bf16 %v199_v51, %v198_v47 }
  0xff   :  { %225 = vst [vmem:[%s394_s3 + $0x8] sm:$0xff] %v255_v52  ;;  %227 = vst [vmem:[%s394_s3 + $0x18] sm:$0xff] %v257_v53 }

// kernel: simple_encoder_decoder.8
= control target key start
LH: loop header
LB: loop body
LE: loop exit
PB: predicated region body
PF: predicated region fallthrough
CT: control target
= control target key end

     0   :  { %s1394_s12 = smov 0   ;;  %s1658_s0 = inlined_call_operand.vmem [shape: f32[2,26,64], index: 0, kind: input, shape index: {}]   ;;  %s1659_s1 = inlined_call_operand.vmem [shape: bf16[9,64,128], index: 1, kind: input, shape index: {}]   ;;  %s1660_s2 = inlined_call_operand.vmem [shape: f32[1,128], index: 2, kind: input, shape index: {}]   ;;  %s1661_s3 = inlined_call_operand.vmem [shape: bf16[2,16,128], index: 3, kind: output, shape index: {}]  }
   0x1 LB: > { %s1033_s13 = sadd.s32 4294967295, %s1370_s12   ;;  %p1037_p0 = scmp.ge.s32.totalorder %s1370_s12, 1  ;;  %s1370_s12 = sphi %s1394_s12, %s13_s12  }
   0x2   : > { %p137_p1 = scmp.lt.s32.totalorder %s1370_s12, 3 }
   0x4   : > { %p138_p2 = pnand %p1037_p0, %p137_p1 }
   0x5   : > { %v1328_v0 = vld [vmem:[%s1659_s1 + $0x20] sm:$0xff] (!%p138_p2)   ;;  %v1372_v1 = vmov (!%p138_p2), 0.0   ;;  %v172_v3 = vlaneseq (!%p138_p2)  ;;  %v1330_v4 = vld [vmem:[%s1659_s1 + $0x28] sm:$0xff] (!%p138_p2)   ;;  %vm1373_vm0 = vmmov (!%p138_p2), 0   ;;  %p161_p3 = scmp.lt.s32.totalorder (!%p138_p2), %s1033_s13, 1  ;;  %v1332_v7 = vld [vmem:[%s1659_s1 + $0x30] sm:$0xff] (!%p138_p2)  }
   0x6   : > { %141 = sbr.rel (%p138_p2) target bundleno = 309 (0x135), region = 32  ;;  %1210 = vmatprep.subr.bf16.mxu0 (!%p138_p2), %v1372_v1  ;;  %1222 = vmatprep.subr.bf16.mxu1 (!%p138_p2), %v1372_v1  ;;  %v1329_v2 = vld [vmem:[%s1659_s1] sm:$0xff] (!%p138_p2)   ;;  %v1331_v5 = vld [vmem:[%s1659_s1 + $0x8] sm:$0xff] (!%p138_p2)   ;;  %v1333_v8 = vld [vmem:[%s1659_s1 + $0x10] sm:$0xff] (!%p138_p2)   ;;  %vm256_vm3 = vcmask (!%p138_p2), 523264  }
   0x7   : > { %1211 = vmatpush3.bf16.msra.mxu0 (!%p138_p2), %v1328_v0  ;;  %1218 = vmatprep.mubr.msk.bf16.mxu0 (!%p138_p2), %vm1373_vm0, %v1372_v1  ;;  %v173_v6 = vshrl.u32 (!%p138_p2), %v172_v3, 7  ;;  %v1334_v10 = vld [vmem:[%s1659_s1 + $0x38] sm:$0xff] (!%p138_p2)   ;;  %v1336_v24 = vld [vmem:[%s1659_s1 + $0x40] sm:$0xff] (!%p138_p2)   ;;  %v1338_v26 = vld [vmem:[%s1659_s1 + $0x48] sm:$0xff] (!%p138_p2)  }
   0x8   : > { %1223 = vmatpush3.bf16.msra.mxu1 (!%p138_p2), %v1329_v2  ;;  %1212 = vmatprep.subr.bf16.mxu0 (!%p138_p2), %v1372_v1  ;;  %v1335_v18 = vld [vmem:[%s1659_s1 + $0x18] sm:$0xff] (!%p138_p2)   ;;  %v1337_v25 = vld [vmem:[%s1659_s1 + $0x60] sm:$0xff] (!%p138_p2)   ;;  %v1339_v27 = vld [vmem:[%s1659_s1 + $0x68] sm:$0xff] (!%p138_p2)  }
   0x9   : > { %1224 = vmatprep.subr.bf16.mxu1 (!%p138_p2), %v1372_v1  ;;  %1230 = vmatprep.mubr.msk.bf16.mxu1 (!%p138_p2), %vm1373_vm0, %v1372_v1  ;;  %v174_v9 = vadd.s32 (!%p138_p2), 8, %v173_v6  ;;  %v179_v11 = vand.u32 (!%p138_p2), 3, %v173_v6  ;;  %v1340_v28 = vld [vmem:[%s1659_s1 + $0x50] sm:$0xff] (!%p138_p2)   ;;  %v1342_v36 = vld [vmem:[%s1659_s1 + $0x58] sm:$0xff] (!%p138_p2)   ;;  %v1344_v43 = vld [vmem:[%s1659_s1 + $0x80] sm:$0xff] (!%p138_p2)  }
   0xa   : > { %v1341_v29 = vld [vmem:[%s1659_s1 + $0x70] sm:$0xff] (!%p138_p2)   ;;  %v1343_v39 = vld [vmem:[%s1659_s1 + $0x78] sm:$0xff] (!%p138_p2)   ;;  %v1345_v45 = vld [vmem:[%s1659_s1 + $0xa0] sm:$0xff] (!%p138_p2)  }
   0xb   : > { %1213 = vmatpush3.bf16.msra.mxu0 (!%p138_p2), %v1330_v4  ;;  %v186_v13 = vand.u32 (!%p138_p2), 3, %v174_v9  ;;  %vm1449_vm1 = vcmp.ge.s32.totalorder (!%p138_p2), %v179_v11, 1  ;;  %vm1497_vm4 = vcmp.le.s32.totalorder (!%p138_p2), %v179_v11, 2  ;;  %v1346_v46 = vld [vmem:[%s1659_s1 + $0x88] sm:$0xff] (!%p138_p2)   ;;  %v1348_v48 = vld [vmem:[%s1659_s1 + $0x90] sm:$0xff] (!%p138_p2)   ;;  %v1350_v52 = vld [vmem:[%s1659_s1 + $0x98] sm:$0xff] (!%p138_p2)  }
   0xc   : > { %1225 = vmatpush3.bf16.msra.mxu1 (!%p138_p2), %v1331_v5  ;;  %1214 = vmatprep.subr.bf16.mxu0 (!%p138_p2), %v1372_v1  ;;  %v1347_v47 = vld [vmem:[%s1659_s1 + $0xa8] sm:$0xff] (!%p138_p2)   ;;  %v1349_v49 = vld [vmem:[%s1659_s1 + $0xb0] sm:$0xff] (!%p138_p2)   ;;  %v1351_v55 = vld [vmem:[%s1659_s1 + $0xb8] sm:$0xff] (!%p138_p2)  }
   0xd   : > { %s1671_s13 = smov (!%p161_p3, %s1033_s13), 1  ;;  %1226 = vmatprep.subr.bf16.mxu1 %v1372_v1  ;;  %vm1457_vm2 = vcmp.ge.s32.totalorder %v186_v13, 1  ;;  %vm1504_vm5 = vcmp.le.s32.totalorder %v186_v13, 2  ;;  %v1352_v59 = vld [vmem:[%s1659_s1 + $0xc0] sm:$0xff]   ;;  %v1354_v62 = vld [vmem:[%s1659_s1 + $0xc8] sm:$0xff]   ;;  %v1356_v0 = vld [vmem:[%s1659_s1 + $0xd0] sm:$0xff]  }
   0xe   : > { %s1156_s24 = sshll.u32 %s1671_s13, 5  ;;  %v1353_v61 = vld [vmem:[%s1659_s1 + $0xe0] sm:$0xff]   ;;  %v1355_v63 = vld [vmem:[%s1659_s1 + $0xe8] sm:$0xff]   ;;  %v1357_v2 = vld [vmem:[%s1659_s1 + $0xf0] sm:$0xff]   ;;  %s1157_s18 = sshll.u32 %s1671_s13, 3 }
   0xf   : > { %s1435_s29 = scalar_lea.vmem %s1658_s0, %s1156_s24  ;;  %1215 = vmatpush3.bf16.msra.mxu0 %v1332_v7  ;;  %v1358_v4 = vld [vmem:[%s1659_s1 + $0xd8] sm:$0xff]   ;;  %v1362_v13 = vld [vmem:[%s1659_s1 + $0x110] sm:$0xff]   ;;  %s170_s21 = scalar_lea.vmem %s1661_s3, %s1157_s18 }
  0x10   : > { %v203_v12 = vld [vmem:[%s1435_s29] sm:$0xff]  ;;  %v1443_v14 = vld [vmem:[%s1435_s29 + $0x8] sm:$0xff]  ;;  %1227 = vmatpush3.bf16.msra.mxu1 %v1333_v8  ;;  %1216 = vmatprep.subr.bf16.mxu0 %v1372_v1  ;;  %v708_v3 = vld [vmem:[%s1435_s29 + $0x10] sm:$0xff] }
  0x11   : > { %v220_v15 = vld [vmem:[%s1435_s29 + $0x1] sm:$0xff]  ;;  %v1447_v16 = vld [vmem:[%s1435_s29 + $0x9] sm:$0xff]  ;;  %v209_v20 = vsel %vm1449_vm1, %v203_v12, 0.0  ;;  %1228 = vmatprep.subr.bf16.mxu1 %v1372_v1  ;;  %v210_v21 = vsel %vm1457_vm2, %v1443_v14, 0.0  ;;  %v709_v5 = vsel %vm1449_vm1, %v1443_v14, 0.0  ;;  %v710_v6 = vsel %vm1457_vm2, %v708_v3, 0.0 }
  0x12   : > { %v222_v22 = vpack.c.bf16 %v1447_v16, %v220_v15  ;;  %v211_v23 = vpack.c.bf16 %v210_v21, %v209_v20  ;;  %v369_v30 = vld [vmem:[%s1435_s29 + $0x2] sm:$0xff]  ;;  %v1502_v32 = vld [vmem:[%s1435_s29 + $0xa] sm:$0xff]  ;;  %v1359_v7 = vld [vmem:[%s1659_s1 + $0xf8] sm:$0xff]   ;;  %v711_v9 = vpack.c.bf16 %v710_v6, %v709_v5 }
  0x13   : > { %1217 = vmatpush3.bf16.msra.mxu0 %v1334_v10  ;;  %v457_v34 = vld [vmem:[%s1435_s29 + $0x4] sm:$0xff]  ;;  %v458_v35 = vld [vmem:[%s1435_s29 + $0xc] sm:$0xff]  ;;  %v375_v37 = vsel %vm1497_vm4, %v369_v30, 0.0  ;;  %v376_v38 = vsel %vm1504_vm5, %v1502_v32, 0.0  ;;  %v1363_v15 = vld [vmem:[%s1659_s1 + $0x118] sm:$0xff]  }
  0x14   : > { %1229 = vmatpush3.bf16.msra.mxu1 %v1335_v18  ;;  %1234 = vmatprep.subr.bf16.mxu0 %v1372_v1  ;;  %v459_v40 = vsel %vm1449_vm1, %v457_v34, 0.0  ;;  %v460_v41 = vsel %vm1457_vm2, %v458_v35, 0.0  ;;  %v377_v42 = vpack.c.bf16 %v376_v38, %v375_v37  ;;  %v623_v50 = vld [vmem:[%s1435_s29 + $0x6] sm:$0xff]  ;;  %v624_v51 = vld [vmem:[%s1435_s29 + $0xe] sm:$0xff] }
  0x15   : > { %1246 = vmatprep.subr.bf16.mxu1 %v1372_v1  ;;  %v461_v44 = vpack.c.bf16 %v460_v41, %v459_v40  ;;  %v541_v53 = vld [vmem:[%s1435_s29 + $0x5] sm:$0xff]  ;;  %v542_v54 = vld [vmem:[%s1435_s29 + $0xd] sm:$0xff]  ;;  %v625_v56 = vsel %vm1497_vm4, %v623_v50, 0.0  ;;  %v626_v57 = vsel %vm1504_vm5, %v624_v51, 0.0 }
  0x16   : > { %1219 = vmatmul.mubr.msk.bf16.vlgmr.msra.gmra.mrb[0].mxu0 %vm256_vm3, %v222_v22  ;;  %v543_v58 = vpack.c.bf16 %v542_v54, %v541_v53  ;;  %v627_v60 = vpack.c.bf16 %v626_v57, %v625_v56  ;;  %v792_v8 = vld [vmem:[%s1435_s29 + $0x11] sm:$0xff]  ;;  %v1360_v10 = vld [vmem:[%s1659_s1 + $0x100] sm:$0xff]   ;;  %v1361_v12 = vld [vmem:[%s1659_s1 + $0x108] sm:$0xff]  }
  0x17   : > { %1231 = vmatmul.mubr.msk.bf16.vlgmr.msra.gmra.mrb[0].mxu1 %vm256_vm3, %v211_v23  ;;  %1235 = vmatpush3.bf16.msra.mxu0 %v1336_v24  ;;  %v793_v11 = vpack.c.bf16 %v792_v8, %v1447_v16  ;;  %v874_v14 = vld [vmem:[%s1435_s29 + $0x12] sm:$0xff]  ;;  %v875_v16 = vsel %vm1497_vm4, %v1502_v32, 0.0 }
  0x18   : > { %1247 = vmatpush3.bf16.msra.mxu1 %v1337_v25  ;;  %1236 = vmatprep.subr.bf16.mxu0 %v1372_v1  ;;  %v876_v17 = vsel %vm1504_vm5, %v874_v14, 0.0 }
  0x19   : > { %1248 = vmatprep.subr.bf16.mxu1 %v1372_v1  ;;  %1242 = vmatprep.mubr.msk.bf16.mxu0 %vm1373_vm0, %v1372_v1  ;;  %v877_v18 = vpack.c.bf16 %v876_v17, %v875_v16 }
  0x1a   : > { %1254 = vmatprep.mubr.msk.bf16.mxu1 %vm1373_vm0, %v1372_v1 }
  0x1b   : > { %1237 = vmatpush3.bf16.msra.mxu0 %v1338_v26 }
  0x1c   : > { %1249 = vmatpush3.bf16.msra.mxu1 %v1339_v27  ;;  %1238 = vmatprep.subr.bf16.mxu0 %v1372_v1 }
  0x1d   : > { %1250 = vmatprep.subr.bf16.mxu1 %v1372_v1 }
  0x1f   : > { %1239 = vmatpush3.bf16.msra.mxu0 %v1340_v28 }
  0x20   : > { %1251 = vmatpush3.bf16.msra.mxu1 %v1341_v29  ;;  %1240 = vmatprep.subr.bf16.mxu0 %v1372_v1 }
  0x21   : > { %1252 = vmatprep.subr.bf16.mxu1 %v1372_v1 }
  0x23   : > { %1241 = vmatpush3.bf16.msra.mxu0 %v1342_v36 }
  0x24   : > { %1253 = vmatpush3.bf16.msra.mxu1 %v1343_v39  ;;  %1258 = vmatprep.subr.bf16.mxu0 %v1372_v1 }
  0x25   : > { %1270 = vmatprep.subr.bf16.mxu1 %v1372_v1 }
  0x26   : > { %1243 = vmatmul.mubr.msk.bf16.vlgmr.msra.gmra.mrb[4].mxu0 %vm256_vm3, %v377_v42 }
  0x27   : > { %1259 = vmatpush3.bf16.msra.mxu0 %v1344_v43  ;;  %1255 = vmatmul.mubr.msk.bf16.vlgmr.msra.gmra.mrb[4].mxu1 %vm256_vm3, %v461_v44 }
  0x28   : > { %1271 = vmatpush3.bf16.msra.mxu1 %v1345_v45  ;;  %1260 = vmatprep.subr.bf16.mxu0 %v1372_v1 }
  0x29   : > { %1272 = vmatprep.subr.bf16.mxu1 %v1372_v1  ;;  %1266 = vmatprep.mubr.msk.bf16.mxu0 %vm1373_vm0, %v1372_v1 }
  0x2a   : > { %1278 = vmatprep.mubr.msk.bf16.mxu1 %vm1373_vm0, %v1372_v1 }
  0x2b   : > { %1261 = vmatpush3.bf16.msra.mxu0 %v1346_v46 }
  0x2c   : > { %1273 = vmatpush3.bf16.msra.mxu1 %v1347_v47  ;;  %1262 = vmatprep.subr.bf16.mxu0 %v1372_v1 }
  0x2d   : > { %1274 = vmatprep.subr.bf16.mxu1 %v1372_v1 }
  0x2f   : > { %1263 = vmatpush3.bf16.msra.mxu0 %v1348_v48 }
  0x30   : > { %1275 = vmatpush3.bf16.msra.mxu1 %v1349_v49  ;;  %1264 = vmatprep.subr.bf16.mxu0 %v1372_v1 }
  0x31   : > { %1276 = vmatprep.subr.bf16.mxu1 %v1372_v1 }
  0x33   : > { %1265 = vmatpush3.bf16.msra.mxu0 %v1350_v52 }
  0x34   : > { %1277 = vmatpush3.bf16.msra.mxu1 %v1351_v55  ;;  %1282 = vmatprep.subr.bf16.mxu0 %v1372_v1 }
  0x35   : > { %1294 = vmatprep.subr.bf16.mxu1 %v1372_v1 }
  0x36   : > { %1267 = vmatmul.mubr.msk.bf16.vlgmr.msra.gmra.mrb[8].mxu0 %vm256_vm3, %v543_v58 }
  0x37   : > { %1283 = vmatpush3.bf16.msra.mxu0 %v1352_v59  ;;  %1279 = vmatmul.mubr.msk.bf16.vlgmr.msra.gmra.mrb[8].mxu1 %vm256_vm3, %v627_v60 }
  0x38   : > { %1295 = vmatpush3.bf16.msra.mxu1 %v1353_v61  ;;  %1284 = vmatprep.subr.bf16.mxu0 %v1372_v1 }
  0x39   : > { %1296 = vmatprep.subr.bf16.mxu1 %v1372_v1  ;;  %1290 = vmatprep.mubr.msk.bf16.mxu0 %vm1373_vm0, %v1372_v1 }
  0x3a   : > { %1302 = vmatprep.mubr.msk.bf16.mxu1 %vm1373_vm0, %v1372_v1 }
  0x3b   : > { %1285 = vmatpush3.bf16.msra.mxu0 %v1354_v62 }
  0x3c   : > { %1297 = vmatpush3.bf16.msra.mxu1 %v1355_v63  ;;  %1286 = vmatprep.subr.bf16.mxu0 %v1372_v1 }
  0x3d   : > { %1298 = vmatprep.subr.bf16.mxu1 %v1372_v1 }
  0x3f   : > { %1287 = vmatpush3.bf16.msra.mxu0 %v1356_v0 }
  0x40   : > { %1299 = vmatpush3.bf16.msra.mxu1 %v1357_v2  ;;  %1288 = vmatprep.subr.bf16.mxu0 %v1372_v1  ;;  %v1151_v2 = vld [vmem:[%s1660_s2] ss:$0 sm:$0xff] }
  0x41   : > { %1300 = vmatprep.subr.bf16.mxu1 %v1372_v1 }
  0x43   : > { %1289 = vmatpush3.bf16.msra.mxu0 %v1358_v4 }
  0x44   : > { %1301 = vmatpush3.bf16.msra.mxu1 %v1359_v7  ;;  %1306 = vmatprep.subr.bf16.mxu0 %v1372_v1 }
  0x46   : > { %1291 = vmatmul.mubr.msk.bf16.vlgmr.msra.gmra.mrb[12].mxu0 %vm256_vm3, %v711_v9 }
  0x47   : > { %1307 = vmatpush3.bf16.msra.mxu0 %v1360_v10  ;;  %1303 = vmatmul.mubr.msk.bf16.vlgmr.msra.gmra.mrb[12].mxu1 %vm256_vm3, %v793_v11 }
  0x48   : > { %1308 = vmatprep.subr.bf16.mxu0 %v1372_v1  ;;  %1314 = vmatprep.mubr.msk.bf16.mxu0 %vm1373_vm0, %v1372_v1 }
  0x4b   : > { %1309 = vmatpush3.bf16.msra.mxu0 %v1361_v12 }
  0x4c   : > { %1310 = vmatprep.subr.bf16.mxu0 %v1372_v1 }
  0x4f   : > { %1311 = vmatpush3.bf16.msra.mxu0 %v1362_v13 }
  0x50   : > { %1312 = vmatprep.subr.bf16.mxu0 %v1372_v1 }
  0x53   : > { %1313 = vmatpush3.bf16.msra.mxu0 %v1363_v15 }
  0x56   : > { %1315 = vmatmul.mubr.msk.bf16.vlgmr.msra.gmra.mrb[16].mxu0 %vm256_vm3, %v877_v18 }
  0xe9   : > { %v294_v19 = vpop.f32.mrb[0].mxu0 }
  0xea   : > { %v362_v20 = vpop.f32.mrb[0].mxu1  ;;  %v1220_v21 = vpop.f32.mrb[1].mxu0 }
  0xeb   : > { %v363_v22 = vadd.f32 %v362_v20, %v294_v19  ;;  %v1232_v23 = vpop.f32.mrb[1].mxu1  ;;  %v297_v24 = vpop.f32.mrb[2].mxu0 }
  0xec   : > { %v365_v25 = vpop.f32.mrb[2].mxu1  ;;  %v1221_v26 = vpop.f32.mrb[3].mxu0 }
  0xed   : > { %v366_v27 = vadd.f32 %v365_v25, %v297_v24  ;;  %v1233_v28 = vpop.f32.mrb[3].mxu1 }
  0xf9   : > { %v448_v29 = vpop.f32.mrb[4].mxu0 }
  0xfa   : > { %v455_v30 = vadd.f32 %v448_v29, %v363_v22  ;;  %v1244_v31 = vpop.f32.mrb[5].mxu0  ;;  %v532_v32 = vpop.f32.mrb[4].mxu1 }
  0xfb   : > { %v451_v33 = vpop.f32.mrb[6].mxu0  ;;  %v1256_v1 = vpop.f32.mrb[5].mxu1 }
  0xfc   : > { %v456_v34 = vadd.f32 %v451_v33, %v366_v27  ;;  %v539_v35 = vadd.f32 %v532_v32, %v455_v30  ;;  %v1245_v36 = vpop.f32.mrb[7].mxu0  ;;  %v535_v37 = vpop.f32.mrb[6].mxu1 }
  0xfd   : > { %v1257_v38 = vpop.f32.mrb[7].mxu1 }
  0xfe   : > { %v540_v39 = vadd.f32 %v535_v37, %v456_v34 }
 0x109   : > { %v614_v40 = vpop.f32.mrb[8].mxu0 }
 0x10a   : > { %v621_v41 = vadd.f32 %v614_v40, %v539_v35  ;;  %v1268_v42 = vpop.f32.mrb[9].mxu0  ;;  %v698_v43 = vpop.f32.mrb[8].mxu1 }
 0x10b   : > { %v617_v44 = vpop.f32.mrb[10].mxu0  ;;  %v1280_v45 = vpop.f32.mrb[9].mxu1 }
 0x10c   : > { %v622_v46 = vadd.f32 %v617_v44, %v540_v39  ;;  %v705_v47 = vadd.f32 %v698_v43, %v621_v41  ;;  %v1269_v48 = vpop.f32.mrb[11].mxu0  ;;  %v701_v49 = vpop.f32.mrb[10].mxu1 }
 0x10d   : > { %v1281_v50 = vpop.f32.mrb[11].mxu1 }
 0x10e   : > { %v706_v51 = vadd.f32 %v701_v49, %v622_v46 }
 0x119   : > { %v782_v52 = vpop.f32.mrb[12].mxu0 }
 0x11a   : > { %v789_v53 = vadd.f32 %v782_v52, %v705_v47  ;;  %v1292_v54 = vpop.f32.mrb[13].mxu0  ;;  %v864_v55 = vpop.f32.mrb[12].mxu1 }
 0x11b   : > { %v785_v56 = vpop.f32.mrb[14].mxu0  ;;  %v1304_v57 = vpop.f32.mrb[13].mxu1 }
 0x11c   : > { %v790_v58 = vadd.f32 %v785_v56, %v706_v51  ;;  %v871_v59 = vadd.f32 %v864_v55, %v789_v53  ;;  %v1293_v60 = vpop.f32.mrb[15].mxu0  ;;  %v867_v61 = vpop.f32.mrb[14].mxu1 }
 0x11d   : > { %v1305_v62 = vpop.f32.mrb[15].mxu1 }
 0x11e   : > { %v872_v63 = vadd.f32 %v867_v61, %v790_v58 }
 0x129   : > { %v948_v0 = vpop.f32.mrb[16].mxu0 }
 0x12a   : > { %v955_v3 = vadd.f32 %v948_v0, %v871_v59  ;;  %v1316_v4 = vpop.f32.mrb[17].mxu0 }
 0x12b   : > { %v951_v5 = vpop.f32.mrb[18].mxu0 }
 0x12c   : > { %v964_v6 = vadd.f32 %v1151_v2, %v955_v3  ;;  %v956_v7 = vadd.f32 %v951_v5, %v872_v63  ;;  %v1317_v8 = vpop.f32.mrb[19].mxu0 }
 0x12e   : > { %v965_v9 = vadd.f32 %v1151_v2, %v956_v7  ;;  %v966_v10 = vmax.f32 %v964_v6, 0.0 }
 0x130   : > { %v967_v11 = vmax.f32 %v965_v9, 0.0 }
 0x132   : > { %v1163_v12 = vpack.c.bf16 %v967_v11, %v966_v10 }
 0x134   : > { %1164 = vst [vmem:[%s170_s21] sm:$0xff] %v1163_v12  }
 0x135 PF: > { %s13_s12 = sadd.s32 1, %s1370_s12  }
 0x136   : > { %p10_p4 = scmp.ge.s32.totalorder %s13_s12, 4  }
 0x138   :  { %12 = sbr.rel (!%p10_p4) target bundleno = 1 (0x1), region = 70 }

// kernel: simple_encoder_decoder.10
= control target key start
LH: loop header
LB: loop body
LE: loop exit
PB: predicated region body
PF: predicated region fallthrough
CT: control target
= control target key end

     0   :  { %vm110_vm0 = vcmask 523264   ;;  %s579_s1 = inlined_call_operand.vmem [shape: bf16[64,128], index: 1, kind: input, shape index: {}]   ;;  %s580_s0 = inlined_call_operand.vmem [shape: bf16[128,64], index: 0, kind: input, shape index: {}]   ;;  %s581_s2 = inlined_call_operand.vmem [shape: f32[1,128], index: 2, kind: input, shape index: {}]   ;;  %s582_s3 = inlined_call_operand.vmem [shape: bf16[128,128], index: 3, kind: output, shape index: {}]  }
   0x1   :  { %v476_v0 = vld [vmem:[%s579_s1] sm:$0xff]   ;;  %v477_v1 = vld [vmem:[%s579_s1 + $0x8] sm:$0xff]   ;;  %v478_v2 = vld [vmem:[%s579_s1 + $0x10] sm:$0xff]  }
   0x2   :  { %444 = vmatprep.subr.bf16.mxu0 %v476_v0  ;;  %468 = vmatprep.subr.bf16.mxu1 %v476_v0  ;;  %v480_v3 = vld [vmem:[%s580_s0] sm:$0xff]   ;;  %v479_v5 = vld [vmem:[%s579_s1 + $0x18] sm:$0xff]   ;;  %v482_v6 = vld [vmem:[%s580_s0 + $0x8] sm:$0xff]  }
   0x3   :  { %445 = vmatpush3.bf16.msra.mxu0 %v476_v0  ;;  %472 = vmatpush3.bf16.msra.mxu1 %v476_v0  ;;  %v481_v4 = vld [vmem:[%s580_s0 + $0x20] sm:$0xff]   ;;  %v483_v7 = vld [vmem:[%s580_s0 + $0x28] sm:$0xff]   ;;  %v484_v8 = vld [vmem:[%s580_s0 + $0x10] sm:$0xff]  }
   0x4   :  { %446 = vmatprep.subr.bf16.mxu0 %v477_v1  ;;  %469 = vmatprep.subr.bf16.mxu1 %v477_v1  ;;  %v485_v9 = vld [vmem:[%s580_s0 + $0x30] sm:$0xff]   ;;  %v486_v10 = vld [vmem:[%s580_s0 + $0x18] sm:$0xff]   ;;  %v332_v12 = vld [vmem:[%s581_s2] ss:$0 sm:$0xff] }
   0x5   :  { %452 = vmatprep.mubr.msk.bf16.mxu0 %vm110_vm0, %v480_v3  ;;  %460 = vmatprep.mubr.msk.bf16.mxu1 %vm110_vm0, %v481_v4  ;;  %v487_v11 = vld [vmem:[%s580_s0 + $0x38] sm:$0xff]  }
   0x7   :  { %447 = vmatpush3.bf16.msra.mxu0 %v477_v1  ;;  %473 = vmatpush3.bf16.msra.mxu1 %v477_v1 }
   0x8   :  { %448 = vmatprep.subr.bf16.mxu0 %v478_v2  ;;  %470 = vmatprep.subr.bf16.mxu1 %v478_v2 }
   0xb   :  { %449 = vmatpush3.bf16.msra.mxu0 %v478_v2  ;;  %474 = vmatpush3.bf16.msra.mxu1 %v478_v2 }
   0xc   :  { %450 = vmatprep.subr.bf16.mxu0 %v479_v5  ;;  %471 = vmatprep.subr.bf16.mxu1 %v479_v5 }
   0xf   :  { %451 = vmatpush3.bf16.msra.mxu0 %v479_v5  ;;  %475 = vmatpush3.bf16.msra.mxu1 %v479_v5 }
  0x12   :  { %453 = vmatmul.mubr.msk.bf16.vlgmr.msra.gmra.mrb[0].mxu0 %vm110_vm0, %v482_v6  ;;  %461 = vmatmul.mubr.msk.bf16.vlgmr.msra.gmra.mrb[0].mxu1 %vm110_vm0, %v483_v7 }
  0x13   :  { %456 = vmatprep.mubr.msk.bf16.mxu0 %vm110_vm0, %v484_v8  ;;  %464 = vmatprep.mubr.msk.bf16.mxu1 %vm110_vm0, %v485_v9 }
  0x1a   :  { %457 = vmatmul.mubr.msk.bf16.gmra.mrb[4].mxu0 %vm110_vm0, %v486_v10  ;;  %465 = vmatmul.mubr.msk.bf16.gmra.mrb[4].mxu1 %vm110_vm0, %v487_v11 }
  0xe5   :  { %v454_v13 = vpop.f32.mrb[0].mxu0  ;;  %v462_v14 = vpop.f32.mrb[0].mxu1 }
  0xe6   :  { %v178_v15 = vadd.f32 %v454_v13, %v332_v12  ;;  %v210_v16 = vadd.f32 %v462_v14, %v332_v12  ;;  %v169_v17 = vpop.f32.mrb[1].mxu0  ;;  %v201_v18 = vpop.f32.mrb[1].mxu1 }
  0xe7   :  { %v170_v19 = vadd.f32 %v332_v12, %v169_v17  ;;  %v202_v20 = vadd.f32 %v332_v12, %v201_v18  ;;  %v455_v21 = vpop.f32.mrb[2].mxu0  ;;  %v463_v22 = vpop.f32.mrb[2].mxu1 }
  0xe8   :  { %v181_v23 = vadd.f32 %v455_v21, %v332_v12  ;;  %v213_v24 = vadd.f32 %v463_v22, %v332_v12  ;;  %v172_v25 = vpop.f32.mrb[3].mxu0  ;;  %v204_v26 = vpop.f32.mrb[3].mxu1  ;;  %v234_v29 = vmax.f32 %v178_v15, 0.0  ;;  %v242_v30 = vmax.f32 %v210_v16, 0.0 }
  0xe9   :  { %v173_v27 = vadd.f32 %v332_v12, %v172_v25  ;;  %v205_v28 = vadd.f32 %v332_v12, %v204_v26  ;;  %v232_v33 = vmax.f32 %v170_v19, 0.0  ;;  %v240_v34 = vmax.f32 %v202_v20, 0.0 }
  0xea   :  { %v235_v31 = vmax.f32 %v181_v23, 0.0  ;;  %v243_v32 = vmax.f32 %v213_v24, 0.0 }
  0xeb   :  { %v233_v35 = vmax.f32 %v173_v27, 0.0  ;;  %v241_v36 = vmax.f32 %v205_v28, 0.0 }
  0xec   :  { %v393_v37 = vpack.c.bf16 %v235_v31, %v234_v29  ;;  %v413_v38 = vpack.c.bf16 %v243_v32, %v242_v30 }
  0xed   :  { %v388_v39 = vpack.c.bf16 %v233_v35, %v232_v33  ;;  %v408_v40 = vpack.c.bf16 %v241_v36, %v240_v34  ;;  %v458_v41 = vpop.f32.mrb[4].mxu0  ;;  %v466_v42 = vpop.f32.mrb[4].mxu1 }
  0xee   :  { %425 = vst [vmem:[%s582_s3 + $0x8] sm:$0xff] %v393_v37   ;;  %429 = vst [vmem:[%s582_s3 + $0x28] sm:$0xff] %v413_v38   ;;  %v194_v43 = vadd.f32 %v458_v41, %v332_v12  ;;  %v226_v44 = vadd.f32 %v466_v42, %v332_v12  ;;  %v185_v45 = vpop.f32.mrb[5].mxu0  ;;  %v217_v46 = vpop.f32.mrb[5].mxu1 }
  0xef   :  { %389 = vst [vmem:[%s582_s3] sm:$0xff] %v388_v39   ;;  %428 = vst [vmem:[%s582_s3 + $0x20] sm:$0xff] %v408_v40   ;;  %v186_v47 = vadd.f32 %v332_v12, %v185_v45  ;;  %v218_v48 = vadd.f32 %v332_v12, %v217_v46  ;;  %v459_v49 = vpop.f32.mrb[6].mxu0  ;;  %v467_v50 = vpop.f32.mrb[6].mxu1 }
  0xf0   :  { %v197_v51 = vadd.f32 %v459_v49, %v332_v12  ;;  %v229_v52 = vadd.f32 %v467_v50, %v332_v12  ;;  %v188_v53 = vpop.f32.mrb[7].mxu0  ;;  %v220_v54 = vpop.f32.mrb[7].mxu1  ;;  %v238_v57 = vmax.f32 %v194_v43, 0.0  ;;  %v246_v58 = vmax.f32 %v226_v44, 0.0 }
  0xf1   :  { %v189_v55 = vadd.f32 %v332_v12, %v188_v53  ;;  %v221_v56 = vadd.f32 %v332_v12, %v220_v54  ;;  %v236_v61 = vmax.f32 %v186_v47, 0.0  ;;  %v244_v62 = vmax.f32 %v218_v48, 0.0 }
  0xf2   :  { %v239_v59 = vmax.f32 %v197_v51, 0.0  ;;  %v247_v60 = vmax.f32 %v229_v52, 0.0 }
  0xf3   :  { %v237_v63 = vmax.f32 %v189_v55, 0.0  ;;  %v245_v0 = vmax.f32 %v221_v56, 0.0 }
  0xf4   :  { %v403_v1 = vpack.c.bf16 %v239_v59, %v238_v57  ;;  %v423_v2 = vpack.c.bf16 %v247_v60, %v246_v58 }
  0xf5   :  { %v398_v3 = vpack.c.bf16 %v237_v63, %v236_v61  ;;  %v418_v4 = vpack.c.bf16 %v245_v0, %v244_v62 }
  0xf6   :  { %427 = vst [vmem:[%s582_s3 + $0x18] sm:$0xff] %v403_v1   ;;  %431 = vst [vmem:[%s582_s3 + $0x38] sm:$0xff] %v423_v2  }
  0xf7   :  { %426 = vst [vmem:[%s582_s3 + $0x10] sm:$0xff] %v398_v3   ;;  %430 = vst [vmem:[%s582_s3 + $0x30] sm:$0xff] %v418_v4  }

// kernel: simple_encoder_decoder.11
= control target key start
LH: loop header
LB: loop body
LE: loop exit
PB: predicated region body
PF: predicated region fallthrough
CT: control target
= control target key end

     0   :  { %vm262_vm0 = vcmask 261120   ;;  %s1338_s1 = inlined_call_operand.vmem [shape: bf16[32,128], index: 1, kind: input, shape index: {}]   ;;  %s1339_s0 = inlined_call_operand.vmem [shape: bf16[512,32], index: 0, kind: input, shape index: {}]   ;;  %s1340_s2 = inlined_call_operand.vmem [shape: f32[1,128], index: 2, kind: input, shape index: {}]   ;;  %s1341_s3 = inlined_call_operand.vmem [shape: f32[512,128], index: 3, kind: output, shape index: {}]  }
   0x1   :  { %v889_v0 = vld [vmem:[%s1338_s1] sm:$0xff]   ;;  %v890_v1 = vld [vmem:[%s1338_s1 + $0x8] sm:$0xff]   ;;  %v895_v6 = vld [vmem:[%s1339_s0 + $0x10] sm:$0xff]  }
   0x2   :  { %817 = vmatprep.subr.bf16.mxu0 %v889_v0  ;;  %885 = vmatprep.subr.bf16.mxu1 %v889_v0  ;;  %v891_v2 = vld [vmem:[%s1339_s0] sm:$0xff]   ;;  %v893_v4 = vld [vmem:[%s1339_s0 + $0x8] sm:$0xff]   ;;  %v896_v7 = vld [vmem:[%s1339_s0 + $0x90] sm:$0xff]  }
   0x3   :  { %818 = vmatpush3.bf16.msra.mxu0 %v889_v0  ;;  %887 = vmatpush3.bf16.msra.mxu1 %v889_v0  ;;  %v892_v3 = vld [vmem:[%s1339_s0 + $0x80] sm:$0xff]   ;;  %v894_v5 = vld [vmem:[%s1339_s0 + $0x88] sm:$0xff]   ;;  %v897_v8 = vld [vmem:[%s1339_s0 + $0x18] sm:$0xff]  }
   0x4   :  { %819 = vmatprep.subr.bf16.mxu0 %v890_v1  ;;  %886 = vmatprep.subr.bf16.mxu1 %v890_v1  ;;  %v898_v9 = vld [vmem:[%s1339_s0 + $0x98] sm:$0xff]   ;;  %v899_v10 = vld [vmem:[%s1339_s0 + $0x20] sm:$0xff]   ;;  %v901_v12 = vld [vmem:[%s1339_s0 + $0x28] sm:$0xff]  }
   0x5   :  { %821 = vmatprep.mubr.msk.bf16.mxu0 %vm262_vm0, %v891_v2  ;;  %853 = vmatprep.mubr.msk.bf16.mxu1 %vm262_vm0, %v892_v3  ;;  %v900_v11 = vld [vmem:[%s1339_s0 + $0xa0] sm:$0xff]   ;;  %v902_v13 = vld [vmem:[%s1339_s0 + $0xa8] sm:$0xff]   ;;  %v903_v14 = vld [vmem:[%s1339_s0 + $0x30] sm:$0xff]  }
   0x6   :  { %v904_v15 = vld [vmem:[%s1339_s0 + $0xb0] sm:$0xff]   ;;  %v905_v16 = vld [vmem:[%s1339_s0 + $0x38] sm:$0xff]   ;;  %v907_v18 = vld [vmem:[%s1339_s0 + $0x40] sm:$0xff]  }
   0x7   :  { %820 = vmatpush3.bf16.msra.mxu0 %v890_v1  ;;  %888 = vmatpush3.bf16.msra.mxu1 %v890_v1  ;;  %v906_v17 = vld [vmem:[%s1339_s0 + $0xb8] sm:$0xff]   ;;  %v908_v19 = vld [vmem:[%s1339_s0 + $0xc0] sm:$0xff]   ;;  %v909_v20 = vld [vmem:[%s1339_s0 + $0x48] sm:$0xff]  }
   0x8   :  { %v910_v21 = vld [vmem:[%s1339_s0 + $0xc8] sm:$0xff]   ;;  %v911_v22 = vld [vmem:[%s1339_s0 + $0x50] sm:$0xff]   ;;  %v913_v24 = vld [vmem:[%s1339_s0 + $0x58] sm:$0xff]  }
   0x9   :  { %v912_v23 = vld [vmem:[%s1339_s0 + $0xd0] sm:$0xff]   ;;  %v914_v25 = vld [vmem:[%s1339_s0 + $0xd8] sm:$0xff]   ;;  %v915_v26 = vld [vmem:[%s1339_s0 + $0x60] sm:$0xff]  }
   0xa   :  { %822 = vmatmul.mubr.msk.bf16.vlgmr.msra.gmra.mrb[0].mxu0 %vm262_vm0, %v893_v4  ;;  %854 = vmatmul.mubr.msk.bf16.vlgmr.msra.gmra.mrb[0].mxu1 %vm262_vm0, %v894_v5  ;;  %v916_v27 = vld [vmem:[%s1339_s0 + $0xe0] sm:$0xff]   ;;  %v917_v28 = vld [vmem:[%s1339_s0 + $0x68] sm:$0xff]   ;;  %v919_v30 = vld [vmem:[%s1339_s0 + $0x70] sm:$0xff]  }
   0xb   :  { %825 = vmatprep.mubr.msk.bf16.mxu0 %vm262_vm0, %v895_v6  ;;  %857 = vmatprep.mubr.msk.bf16.mxu1 %vm262_vm0, %v896_v7  ;;  %v918_v29 = vld [vmem:[%s1339_s0 + $0xe8] sm:$0xff]   ;;  %v920_v31 = vld [vmem:[%s1339_s0 + $0xf0] sm:$0xff]   ;;  %v921_v32 = vld [vmem:[%s1339_s0 + $0x78] sm:$0xff]  }
   0xc   :  { %v922_v33 = vld [vmem:[%s1339_s0 + $0xf8] sm:$0xff]   ;;  %v1080_v34 = vld [vmem:[%s1340_s2] ss:$0 sm:$0xff] }
  0x12   :  { %826 = vmatmul.mubr.msk.bf16.gmra.mrb[4].mxu0 %vm262_vm0, %v897_v8  ;;  %858 = vmatmul.mubr.msk.bf16.gmra.mrb[4].mxu1 %vm262_vm0, %v898_v9 }
  0x13   :  { %829 = vmatprep.mubr.msk.bf16.mxu0 %vm262_vm0, %v899_v10  ;;  %861 = vmatprep.mubr.msk.bf16.mxu1 %vm262_vm0, %v900_v11 }
  0x1a   :  { %830 = vmatmul.mubr.msk.bf16.gmra.mrb[8].mxu0 %vm262_vm0, %v901_v12  ;;  %862 = vmatmul.mubr.msk.bf16.gmra.mrb[8].mxu1 %vm262_vm0, %v902_v13 }
  0x1b   :  { %833 = vmatprep.mubr.msk.bf16.mxu0 %vm262_vm0, %v903_v14  ;;  %865 = vmatprep.mubr.msk.bf16.mxu1 %vm262_vm0, %v904_v15 }
  0x22   :  { %834 = vmatmul.mubr.msk.bf16.gmra.mrb[12].mxu0 %vm262_vm0, %v905_v16  ;;  %866 = vmatmul.mubr.msk.bf16.gmra.mrb[12].mxu1 %vm262_vm0, %v906_v17 }
  0x23   :  { %837 = vmatprep.mubr.msk.bf16.mxu0 %vm262_vm0, %v907_v18  ;;  %869 = vmatprep.mubr.msk.bf16.mxu1 %vm262_vm0, %v908_v19 }
  0x2a   :  { %838 = vmatmul.mubr.msk.bf16.gmra.mrb[16].mxu0 %vm262_vm0, %v909_v20  ;;  %870 = vmatmul.mubr.msk.bf16.gmra.mrb[16].mxu1 %vm262_vm0, %v910_v21 }
  0x2b   :  { %841 = vmatprep.mubr.msk.bf16.mxu0 %vm262_vm0, %v911_v22  ;;  %873 = vmatprep.mubr.msk.bf16.mxu1 %vm262_vm0, %v912_v23 }
  0x32   :  { %842 = vmatmul.mubr.msk.bf16.gmra.mrb[20].mxu0 %vm262_vm0, %v913_v24  ;;  %874 = vmatmul.mubr.msk.bf16.gmra.mrb[20].mxu1 %vm262_vm0, %v914_v25 }
  0x33   :  { %845 = vmatprep.mubr.msk.bf16.mxu0 %vm262_vm0, %v915_v26  ;;  %877 = vmatprep.mubr.msk.bf16.mxu1 %vm262_vm0, %v916_v27 }
  0x3a   :  { %846 = vmatmul.mubr.msk.bf16.gmra.mrb[24].mxu0 %vm262_vm0, %v917_v28  ;;  %878 = vmatmul.mubr.msk.bf16.gmra.mrb[24].mxu1 %vm262_vm0, %v918_v29 }
  0x3b   :  { %849 = vmatprep.mubr.msk.bf16.mxu0 %vm262_vm0, %v919_v30  ;;  %881 = vmatprep.mubr.msk.bf16.mxu1 %vm262_vm0, %v920_v31 }
  0x42   :  { %850 = vmatmul.mubr.msk.bf16.gmra.mrb[28].mxu0 %vm262_vm0, %v921_v32  ;;  %882 = vmatmul.mubr.msk.bf16.gmra.mrb[28].mxu1 %vm262_vm0, %v922_v33 }
  0xdd   :  { %v823_v35 = vpop.f32.mrb[0].mxu0  ;;  %v855_v36 = vpop.f32.mrb[0].mxu1 }
  0xde   :  { %v402_v37 = vadd.f32 %v823_v35, %v1080_v34  ;;  %v530_v38 = vadd.f32 %v855_v36, %v1080_v34  ;;  %v393_v39 = vpop.f32.mrb[1].mxu0  ;;  %v521_v40 = vpop.f32.mrb[1].mxu1 }
  0xdf   :  { %v394_v41 = vadd.f32 %v1080_v34, %v393_v39  ;;  %v522_v42 = vadd.f32 %v1080_v34, %v521_v40  ;;  %v824_v43 = vpop.f32.mrb[2].mxu0  ;;  %v856_v44 = vpop.f32.mrb[2].mxu1 }
  0xe0   :  { %650 = vst [vmem:[%s1341_s3 + $0x10] sm:$0xff] %v402_v37  ;;  %682 = vst [vmem:[%s1341_s3 + $0x110] sm:$0xff] %v530_v38  ;;  %v405_v45 = vadd.f32 %v824_v43, %v1080_v34  ;;  %v533_v46 = vadd.f32 %v856_v44, %v1080_v34  ;;  %v396_v47 = vpop.f32.mrb[3].mxu0  ;;  %v524_v48 = vpop.f32.mrb[3].mxu1 }
  0xe1   :  { %648 = vst [vmem:[%s1341_s3] sm:$0xff] %v394_v41  ;;  %680 = vst [vmem:[%s1341_s3 + $0x100] sm:$0xff] %v522_v42  ;;  %v397_v49 = vadd.f32 %v1080_v34, %v396_v47  ;;  %v525_v50 = vadd.f32 %v1080_v34, %v524_v48 }
  0xe2   :  { %651 = vst [vmem:[%s1341_s3 + $0x18] sm:$0xff] %v405_v45  ;;  %683 = vst [vmem:[%s1341_s3 + $0x118] sm:$0xff] %v533_v46 }
  0xe3   :  { %649 = vst [vmem:[%s1341_s3 + $0x8] sm:$0xff] %v397_v49  ;;  %681 = vst [vmem:[%s1341_s3 + $0x108] sm:$0xff] %v525_v50 }
  0xe5   :  { %v827_v51 = vpop.f32.mrb[4].mxu0  ;;  %v859_v52 = vpop.f32.mrb[4].mxu1 }
  0xe6   :  { %v418_v53 = vadd.f32 %v827_v51, %v1080_v34  ;;  %v546_v54 = vadd.f32 %v859_v52, %v1080_v34  ;;  %v409_v55 = vpop.f32.mrb[5].mxu0  ;;  %v537_v56 = vpop.f32.mrb[5].mxu1 }
  0xe7   :  { %v410_v57 = vadd.f32 %v1080_v34, %v409_v55  ;;  %v538_v58 = vadd.f32 %v1080_v34, %v537_v56  ;;  %v828_v59 = vpop.f32.mrb[6].mxu0  ;;  %v860_v60 = vpop.f32.mrb[6].mxu1 }
  0xe8   :  { %654 = vst [vmem:[%s1341_s3 + $0x30] sm:$0xff] %v418_v53  ;;  %686 = vst [vmem:[%s1341_s3 + $0x130] sm:$0xff] %v546_v54  ;;  %v421_v61 = vadd.f32 %v828_v59, %v1080_v34  ;;  %v549_v62 = vadd.f32 %v860_v60, %v1080_v34  ;;  %v412_v63 = vpop.f32.mrb[7].mxu0  ;;  %v540_v0 = vpop.f32.mrb[7].mxu1 }
  0xe9   :  { %652 = vst [vmem:[%s1341_s3 + $0x20] sm:$0xff] %v410_v57  ;;  %684 = vst [vmem:[%s1341_s3 + $0x120] sm:$0xff] %v538_v58  ;;  %v413_v1 = vadd.f32 %v1080_v34, %v412_v63  ;;  %v541_v2 = vadd.f32 %v1080_v34, %v540_v0 }
  0xea   :  { %655 = vst [vmem:[%s1341_s3 + $0x38] sm:$0xff] %v421_v61  ;;  %687 = vst [vmem:[%s1341_s3 + $0x138] sm:$0xff] %v549_v62 }
  0xeb   :  { %653 = vst [vmem:[%s1341_s3 + $0x28] sm:$0xff] %v413_v1  ;;  %685 = vst [vmem:[%s1341_s3 + $0x128] sm:$0xff] %v541_v2 }
  0xed   :  { %v831_v3 = vpop.f32.mrb[8].mxu0  ;;  %v863_v4 = vpop.f32.mrb[8].mxu1 }
  0xee   :  { %v434_v5 = vadd.f32 %v831_v3, %v1080_v34  ;;  %v562_v6 = vadd.f32 %v863_v4, %v1080_v34  ;;  %v425_v7 = vpop.f32.mrb[9].mxu0  ;;  %v553_v8 = vpop.f32.mrb[9].mxu1 }
  0xef   :  { %v426_v9 = vadd.f32 %v1080_v34, %v425_v7  ;;  %v554_v10 = vadd.f32 %v1080_v34, %v553_v8  ;;  %v832_v11 = vpop.f32.mrb[10].mxu0  ;;  %v864_v12 = vpop.f32.mrb[10].mxu1 }
  0xf0   :  { %658 = vst [vmem:[%s1341_s3 + $0x50] sm:$0xff] %v434_v5  ;;  %690 = vst [vmem:[%s1341_s3 + $0x150] sm:$0xff] %v562_v6  ;;  %v437_v13 = vadd.f32 %v832_v11, %v1080_v34  ;;  %v565_v14 = vadd.f32 %v864_v12, %v1080_v34  ;;  %v428_v15 = vpop.f32.mrb[11].mxu0  ;;  %v556_v16 = vpop.f32.mrb[11].mxu1 }
  0xf1   :  { %656 = vst [vmem:[%s1341_s3 + $0x40] sm:$0xff] %v426_v9  ;;  %688 = vst [vmem:[%s1341_s3 + $0x140] sm:$0xff] %v554_v10  ;;  %v429_v17 = vadd.f32 %v1080_v34, %v428_v15  ;;  %v557_v18 = vadd.f32 %v1080_v34, %v556_v16 }
  0xf2   :  { %659 = vst [vmem:[%s1341_s3 + $0x58] sm:$0xff] %v437_v13  ;;  %691 = vst [vmem:[%s1341_s3 + $0x158] sm:$0xff] %v565_v14 }
  0xf3   :  { %657 = vst [vmem:[%s1341_s3 + $0x48] sm:$0xff] %v429_v17  ;;  %689 = vst [vmem:[%s1341_s3 + $0x148] sm:$0xff] %v557_v18 }
  0xf5   :  { %v835_v19 = vpop.f32.mrb[12].mxu0  ;;  %v867_v20 = vpop.f32.mrb[12].mxu1 }
  0xf6   :  { %v450_v21 = vadd.f32 %v835_v19, %v1080_v34  ;;  %v578_v22 = vadd.f32 %v867_v20, %v1080_v34  ;;  %v441_v23 = vpop.f32.mrb[13].mxu0  ;;  %v569_v24 = vpop.f32.mrb[13].mxu1 }
  0xf7   :  { %v442_v25 = vadd.f32 %v1080_v34, %v441_v23  ;;  %v570_v26 = vadd.f32 %v1080_v34, %v569_v24  ;;  %v836_v27 = vpop.f32.mrb[14].mxu0  ;;  %v868_v28 = vpop.f32.mrb[14].mxu1 }
  0xf8   :  { %662 = vst [vmem:[%s1341_s3 + $0x70] sm:$0xff] %v450_v21  ;;  %694 = vst [vmem:[%s1341_s3 + $0x170] sm:$0xff] %v578_v22  ;;  %v453_v29 = vadd.f32 %v836_v27, %v1080_v34  ;;  %v581_v30 = vadd.f32 %v868_v28, %v1080_v34  ;;  %v444_v31 = vpop.f32.mrb[15].mxu0  ;;  %v572_v32 = vpop.f32.mrb[15].mxu1 }
  0xf9   :  { %660 = vst [vmem:[%s1341_s3 + $0x60] sm:$0xff] %v442_v25  ;;  %692 = vst [vmem:[%s1341_s3 + $0x160] sm:$0xff] %v570_v26  ;;  %v445_v33 = vadd.f32 %v1080_v34, %v444_v31  ;;  %v573_v35 = vadd.f32 %v1080_v34, %v572_v32 }
  0xfa   :  { %663 = vst [vmem:[%s1341_s3 + $0x78] sm:$0xff] %v453_v29  ;;  %695 = vst [vmem:[%s1341_s3 + $0x178] sm:$0xff] %v581_v30 }
  0xfb   :  { %661 = vst [vmem:[%s1341_s3 + $0x68] sm:$0xff] %v445_v33  ;;  %693 = vst [vmem:[%s1341_s3 + $0x168] sm:$0xff] %v573_v35 }
  0xfd   :  { %v839_v36 = vpop.f32.mrb[16].mxu0  ;;  %v871_v37 = vpop.f32.mrb[16].mxu1 }
  0xfe   :  { %v466_v38 = vadd.f32 %v839_v36, %v1080_v34  ;;  %v594_v39 = vadd.f32 %v871_v37, %v1080_v34  ;;  %v457_v40 = vpop.f32.mrb[17].mxu0  ;;  %v585_v41 = vpop.f32.mrb[17].mxu1 }
  0xff   :  { %v458_v42 = vadd.f32 %v1080_v34, %v457_v40  ;;  %v586_v43 = vadd.f32 %v1080_v34, %v585_v41  ;;  %v840_v44 = vpop.f32.mrb[18].mxu0  ;;  %v872_v45 = vpop.f32.mrb[18].mxu1 }
 0x100   :  { %666 = vst [vmem:[%s1341_s3 + $0x90] sm:$0xff] %v466_v38  ;;  %698 = vst [vmem:[%s1341_s3 + $0x190] sm:$0xff] %v594_v39  ;;  %v469_v46 = vadd.f32 %v840_v44, %v1080_v34  ;;  %v597_v47 = vadd.f32 %v872_v45, %v1080_v34  ;;  %v460_v48 = vpop.f32.mrb[19].mxu0  ;;  %v588_v49 = vpop.f32.mrb[19].mxu1 }
 0x101   :  { %664 = vst [vmem:[%s1341_s3 + $0x80] sm:$0xff] %v458_v42  ;;  %696 = vst [vmem:[%s1341_s3 + $0x180] sm:$0xff] %v586_v43  ;;  %v461_v50 = vadd.f32 %v1080_v34, %v460_v48  ;;  %v589_v51 = vadd.f32 %v1080_v34, %v588_v49 }
 0x102   :  { %667 = vst [vmem:[%s1341_s3 + $0x98] sm:$0xff] %v469_v46  ;;  %699 = vst [vmem:[%s1341_s3 + $0x198] sm:$0xff] %v597_v47 }
 0x103   :  { %665 = vst [vmem:[%s1341_s3 + $0x88] sm:$0xff] %v461_v50  ;;  %697 = vst [vmem:[%s1341_s3 + $0x188] sm:$0xff] %v589_v51 }
 0x105   :  { %v843_v52 = vpop.f32.mrb[20].mxu0  ;;  %v875_v53 = vpop.f32.mrb[20].mxu1 }
 0x106   :  { %v482_v54 = vadd.f32 %v843_v52, %v1080_v34  ;;  %v610_v55 = vadd.f32 %v875_v53, %v1080_v34  ;;  %v473_v56 = vpop.f32.mrb[21].mxu0  ;;  %v601_v57 = vpop.f32.mrb[21].mxu1 }
 0x107   :  { %v474_v58 = vadd.f32 %v1080_v34, %v473_v56  ;;  %v602_v59 = vadd.f32 %v1080_v34, %v601_v57  ;;  %v844_v60 = vpop.f32.mrb[22].mxu0  ;;  %v876_v61 = vpop.f32.mrb[22].mxu1 }
 0x108   :  { %670 = vst [vmem:[%s1341_s3 + $0xb0] sm:$0xff] %v482_v54  ;;  %702 = vst [vmem:[%s1341_s3 + $0x1b0] sm:$0xff] %v610_v55  ;;  %v485_v62 = vadd.f32 %v844_v60, %v1080_v34  ;;  %v613_v63 = vadd.f32 %v876_v61, %v1080_v34  ;;  %v476_v0 = vpop.f32.mrb[23].mxu0  ;;  %v604_v1 = vpop.f32.mrb[23].mxu1 }
 0x109   :  { %668 = vst [vmem:[%s1341_s3 + $0xa0] sm:$0xff] %v474_v58  ;;  %700 = vst [vmem:[%s1341_s3 + $0x1a0] sm:$0xff] %v602_v59  ;;  %v477_v2 = vadd.f32 %v1080_v34, %v476_v0  ;;  %v605_v3 = vadd.f32 %v1080_v34, %v604_v1 }
 0x10a   :  { %671 = vst [vmem:[%s1341_s3 + $0xb8] sm:$0xff] %v485_v62  ;;  %703 = vst [vmem:[%s1341_s3 + $0x1b8] sm:$0xff] %v613_v63 }
 0x10b   :  { %669 = vst [vmem:[%s1341_s3 + $0xa8] sm:$0xff] %v477_v2  ;;  %701 = vst [vmem:[%s1341_s3 + $0x1a8] sm:$0xff] %v605_v3 }
 0x10d   :  { %v847_v4 = vpop.f32.mrb[24].mxu0  ;;  %v879_v5 = vpop.f32.mrb[24].mxu1 }
 0x10e   :  { %v498_v6 = vadd.f32 %v847_v4, %v1080_v34  ;;  %v626_v7 = vadd.f32 %v879_v5, %v1080_v34  ;;  %v489_v8 = vpop.f32.mrb[25].mxu0  ;;  %v617_v9 = vpop.f32.mrb[25].mxu1 }
 0x10f   :  { %v490_v10 = vadd.f32 %v1080_v34, %v489_v8  ;;  %v618_v11 = vadd.f32 %v1080_v34, %v617_v9  ;;  %v848_v12 = vpop.f32.mrb[26].mxu0  ;;  %v880_v13 = vpop.f32.mrb[26].mxu1 }
 0x110   :  { %674 = vst [vmem:[%s1341_s3 + $0xd0] sm:$0xff] %v498_v6  ;;  %706 = vst [vmem:[%s1341_s3 + $0x1d0] sm:$0xff] %v626_v7  ;;  %v501_v14 = vadd.f32 %v848_v12, %v1080_v34  ;;  %v629_v15 = vadd.f32 %v880_v13, %v1080_v34  ;;  %v492_v16 = vpop.f32.mrb[27].mxu0  ;;  %v620_v17 = vpop.f32.mrb[27].mxu1 }
 0x111   :  { %672 = vst [vmem:[%s1341_s3 + $0xc0] sm:$0xff] %v490_v10  ;;  %704 = vst [vmem:[%s1341_s3 + $0x1c0] sm:$0xff] %v618_v11  ;;  %v493_v18 = vadd.f32 %v1080_v34, %v492_v16  ;;  %v621_v19 = vadd.f32 %v1080_v34, %v620_v17 }
 0x112   :  { %675 = vst [vmem:[%s1341_s3 + $0xd8] sm:$0xff] %v501_v14  ;;  %707 = vst [vmem:[%s1341_s3 + $0x1d8] sm:$0xff] %v629_v15 }
 0x113   :  { %673 = vst [vmem:[%s1341_s3 + $0xc8] sm:$0xff] %v493_v18  ;;  %705 = vst [vmem:[%s1341_s3 + $0x1c8] sm:$0xff] %v621_v19 }
 0x115   :  { %v851_v20 = vpop.f32.mrb[28].mxu0  ;;  %v883_v21 = vpop.f32.mrb[28].mxu1 }
 0x116   :  { %v514_v22 = vadd.f32 %v851_v20, %v1080_v34  ;;  %v642_v23 = vadd.f32 %v883_v21, %v1080_v34  ;;  %v505_v24 = vpop.f32.mrb[29].mxu0  ;;  %v633_v25 = vpop.f32.mrb[29].mxu1 }
 0x117   :  { %v506_v26 = vadd.f32 %v1080_v34, %v505_v24  ;;  %v634_v27 = vadd.f32 %v1080_v34, %v633_v25  ;;  %v852_v28 = vpop.f32.mrb[30].mxu0  ;;  %v884_v29 = vpop.f32.mrb[30].mxu1 }
 0x118   :  { %678 = vst [vmem:[%s1341_s3 + $0xf0] sm:$0xff] %v514_v22  ;;  %710 = vst [vmem:[%s1341_s3 + $0x1f0] sm:$0xff] %v642_v23  ;;  %v517_v30 = vadd.f32 %v852_v28, %v1080_v34  ;;  %v645_v31 = vadd.f32 %v884_v29, %v1080_v34  ;;  %v508_v32 = vpop.f32.mrb[31].mxu0  ;;  %v636_v33 = vpop.f32.mrb[31].mxu1 }
 0x119   :  { %676 = vst [vmem:[%s1341_s3 + $0xe0] sm:$0xff] %v506_v26  ;;  %708 = vst [vmem:[%s1341_s3 + $0x1e0] sm:$0xff] %v634_v27  ;;  %v509_v35 = vadd.f32 %v1080_v34, %v508_v32  ;;  %v637_v36 = vadd.f32 %v1080_v34, %v636_v33 }
 0x11a   :  { %679 = vst [vmem:[%s1341_s3 + $0xf8] sm:$0xff] %v517_v30  ;;  %711 = vst [vmem:[%s1341_s3 + $0x1f8] sm:$0xff] %v645_v31 }
 0x11b   :  { %677 = vst [vmem:[%s1341_s3 + $0xe8] sm:$0xff] %v509_v35  ;;  %709 = vst [vmem:[%s1341_s3 + $0x1e8] sm:$0xff] %v637_v36 }

</bundles_post_ra>
